<compile_context>
chip_gen: v7x
topology: tpu7x:2x2x1
jax: 0.10.0
libtpu: 0.0.40
codegen_flags: <defaults>
</compile_context>

<pallas_src>
import jax
import jax.numpy as jnp
from jax.experimental import pallas as pl
from jax.experimental.pallas import tpu as pltpu


def _round_up(x, m):
    return (x + m - 1) // m * m


def basic_block(x, w1, g1, be1, rm1, rv1, w2, g2, be2, rm2, rv2,
                eps=1e-5, row_tile=32, out_dtype=None):
    """x: [N, H, W, C] NHWC; w*: [3, 3, Cin, Cout] HWIO; BN params: [C]."""
    N, H, W, C = x.shape
    Cout = w1.shape[-1]
    assert C == Cout, "stride=1 / downsample=None requires Cin == Cout"
    out_dtype = x.dtype if out_dtype is None else out_dtype

    # ---- fold BatchNorm (eval mode): scale into the weights, keep only bias ----
    s1 = g1 / jnp.sqrt(rv1 + eps)
    b1 = be1 - rm1 * s1
    s2 = g2 / jnp.sqrt(rv2 + eps)
    b2 = be2 - rm2 * s2
    w1f = w1 * s1[None, None, None, :]
    w2f = w2 * s2[None, None, None, :]

    # ---- geometry ----
    Cp = _round_up(C, 128)                                   # lane-dense channels
    # largest divisor of H not exceeding row_tile (amortize halo + step overhead)
    R = max(d for d in range(1, min(row_tile, H) + 1) if H % d == 0)
    T = H // R
    LPAD = 8                                                 # sublane-aligned left pad
    WP = _round_up(LPAD + W + 2, 16)                         # bf16 sublane-tile friendly
    RPAD = WP - (LPAD + W)
    # roll wrap-around safety + conv halo: need >=1 zero col each side, and the
    # wrapped columns (0 and WP-1) must lie outside the valid/halo window.
    assert LPAD >= 2 and RPAD >= 2, "padding too tight for roll/halo safety"

    # Padded bf16 input (halo pad rides along with the f32->bf16 MXU cast).
    xp = jnp.pad(x.astype(jnp.bfloat16),
                 ((0, 0), (2, 2), (LPAD, RPAD), (0, Cp - C)))

    # Weight layout: rows = dy-major x in-channel (3*Cp),
    #                cols = dx-major x out-channel (3*Cp).
    def _prep_w(wf):
        wpad = jnp.zeros((3, 3, Cp, Cp), jnp.float32).at[:, :, :C, :C].set(wf)
        return (jnp.transpose(wpad, (0, 2, 1, 3))
                .reshape(3 * Cp, 3 * Cp).astype(jnp.bfloat16))

    w1m = _prep_w(w1f)
    w2m = _prep_w(w2f)
    b1p = jnp.zeros((1, Cp), jnp.float32).at[0, :C].set(b1)
    b2p = jnp.zeros((1, Cp), jnp.float32).at[0, :C].set(b2)

    def kernel(xp_hbm, w1_ref, b1_ref, w2_ref, b2_ref, out_ref, xbuf, sem):
        n = pl.program_id(0)
        t = pl.program_id(1)
        num_t = pl.num_programs(1)
        slot = t % 2
        r0 = t * R
        if R % 8 == 0:
            r0 = pl.multiple_of(r0, 8)

        def halo_copy(nn, row0, sl):
            # rows [row0, row0+R+4) of padded image nn -> xbuf[sl]
            return pltpu.make_async_copy(
                xp_hbm.at[nn, pl.ds(row0, R + 4)], xbuf.at[sl], sem.at[sl])

        # Prime: the first row-tile of this image was never prefetched.
        @pl.when(t == 0)
        def _():
            halo_copy(n, 0, 0).start()

        # Prefetch the NEXT row-tile (same image) into the other slot; it
        # overlaps with this step's matmuls and is waited at step t+1.
        @pl.when(t + 1 < num_t)
        def _():
            nr0 = (t + 1) * R
            if R % 8 == 0:
                nr0 = pl.multiple_of(nr0, 8)
            halo_copy(n, nr0, 1 - slot).start()

        # Wait for the current tile (started at t-1, or just above when t==0).
        halo_copy(n, r0, slot).wait()
        xb = xbuf[slot]                                   # (R+4, WP, Cp) bf16

        def conv3x3(src, w_ref, rows):
            # src: (rows+2, WP, Cp) bf16; w_ref: (3*Cp, 3*Cp) bf16.
            # Three accumulating K=Cp matmuls (one per dy tap); the dx taps sit
            # in the output dimension and are combined with +-1 column shifts.
            res = None
            for dy in range(3):
                part = jnp.dot(
                    src[dy:rows + dy].reshape(rows * WP, Cp),
                    w_ref[dy * Cp:(dy + 1) * Cp, :],
                    preferred_element_type=jnp.float32)
                res = part if res is None else res + part
            q0 = res[:, 0 * Cp:1 * Cp].reshape(rows, WP, Cp)
            q1 = res[:, 1 * Cp:2 * Cp].reshape(rows, WP, Cp)
            q2 = res[:, 2 * Cp:3 * Cp].reshape(rows, WP, Cp)
            # wrapped columns 0 / WP-1 land outside the valid window (masked /
            # never sliced) -- guaranteed by LPAD>=2 / RPAD>=2 asserts above.
            return jnp.roll(q0, 1, axis=1) + q1 + jnp.roll(q2, -1, axis=1)

        # ---- conv1 (BN1 scale folded) + bias + ReLU ----
        pre1 = conv3x3(xb, w1_ref, R + 2)                 # image rows r0-1 .. r0+R
        h1 = jnp.maximum(pre1 + b1_ref[...], 0.0)
        # Zero everything outside the real image: this *is* conv2's zero padding.
        col = jax.lax.broadcasted_iota(jnp.int32, (R + 2, WP, 1), 1)
        row = jax.lax.broadcasted_iota(jnp.int32, (R + 2, WP, 1), 0)
        img_row = row + (r0 - 1)
        valid = ((col >= LPAD) & (col < LPAD + W) &
                 (img_row >= 0) & (img_row < H))
        h1 = jnp.where(valid, h1, 0.0).astype(jnp.bfloat16)

        # ---- conv2 (BN2 scale folded) + bias + residual + ReLU ----
        pre2 = conv3x3(h1, w2_ref, R)                     # image rows r0 .. r0+R-1
        residual = xb[2:R + 2, LPAD:LPAD + W, :].astype(jnp.float32)
        out = pre2[:, LPAD:LPAD + W, :] + b2_ref[...] + residual
        out_ref[0] = jnp.maximum(out, 0.0).astype(out_ref.dtype)

    # ---- VMEM budget (single-buffered weights, 2-slot halo buffer, temps) ----
    out_itemsize = jnp.dtype(out_dtype).itemsize
    vmem_bytes = (2 * (R + 4) * WP * Cp * 2            # xbuf: 2 slots, bf16
                  + 2 * (3 * Cp) * (3 * Cp) * 2        # w1m + w2m (single copy)
                  + 2 * 2 * Cp * 4                     # biases
                  + 2 * R * W * Cp * out_itemsize      # double-buffered out block
                  + 10 * (R + 4) * WP * Cp * 4)        # in-kernel f32 temporaries
    vmem_limit = int(min(max(vmem_bytes, 32 * 1024 * 1024), 64 * 1024 * 1024))

    out = pl.pallas_call(
        kernel,
        out_shape=jax.ShapeDtypeStruct((N, H, W, Cp), out_dtype),
        grid=(N, T),
        in_specs=[
            pl.BlockSpec(memory_space=pl.ANY),                    # padded x (HBM)
            pl.BlockSpec(memory_space=pltpu.MemorySpace.VMEM),    # w1 (resident, 1 copy)
            pl.BlockSpec(memory_space=pltpu.MemorySpace.VMEM),    # bn1 bias
            pl.BlockSpec(memory_space=pltpu.MemorySpace.VMEM),    # w2
            pl.BlockSpec(memory_space=pltpu.MemorySpace.VMEM),    # bn2 bias
        ],
        out_specs=pl.BlockSpec((1, R, W, Cp), lambda n, t: (n, t, 0, 0)),
        scratch_shapes=[
            pltpu.VMEM((2, R + 4, WP, Cp), jnp.bfloat16),         # 2-slot halo buffer
            pltpu.SemaphoreType.DMA((2,)),
        ],
        compiler_params=pltpu.CompilerParams(
            # t is "arbitrary": cross-step halo prefetch needs in-order t.
            # N stays "parallel" for v7x megacore (use N >= 2 to fill 2 cores).
            dimension_semantics=("parallel", "arbitrary"),
            vmem_limit_bytes=vmem_limit),
    )(xp, w1m, b1p, w2m, b2p)

    # TODO(synk): in a full ResNet stack, keep the Cp-padded bf16 layout between
    # blocks instead of slicing/casting back (saves two HBM passes per block).
    return out[..., :C].astype(x.dtype)


# ---------------------------- pure-JAX reference -----------------------------
def _conv3x3_ref(x, w):
    return jax.lax.conv_general_dilated(
        x, w, window_strides=(1, 1), padding="SAME",
        dimension_numbers=("NHWC", "HWIO", "NHWC"))


def basic_block_ref(x, w1, g1, be1, rm1, rv1, w2, g2, be2, rm2, rv2, eps=1e-5):
    s1 = g1 / jnp.sqrt(rv1 + eps)
    b1 = be1 - rm1 * s1
    s2 = g2 / jnp.sqrt(rv2 + eps)
    b2 = be2 - rm2 * s2
    h = jnp.maximum(_conv3x3_ref(x, w1) * s1 + b1, 0.0)
    o = _conv3x3_ref(h, w2) * s2 + b2 + x
    return jnp.maximum(o, 0.0)


if __name__ == "__main__":
    key = jax.random.PRNGKey(0)
    ks = jax.random.split(key, 12)

    N, H, W, C = 2, 16, 16, 4   # in_channels == channels == 4, stride = 1

    x = jax.random.normal(ks[0], (N, H, W, C), jnp.float32)
    w1 = 0.2 * jax.random.normal(ks[1], (3, 3, C, C), jnp.float32)
    w2 = 0.2 * jax.random.normal(ks[2], (3, 3, C, C), jnp.float32)

    g1 = 1.0 + 0.1 * jax.random.normal(ks[3], (C,), jnp.float32)
    be1 = 0.1 * jax.random.normal(ks[4], (C,), jnp.float32)
    rm1 = 0.05 * jax.random.normal(ks[5], (C,), jnp.float32)
    rv1 = 1.0 + 0.1 * jnp.abs(jax.random.normal(ks[6], (C,), jnp.float32))

    g2 = 1.0 + 0.1 * jax.random.normal(ks[7], (C,), jnp.float32)
    be2 = 0.1 * jax.random.normal(ks[8], (C,), jnp.float32)
    rm2 = 0.05 * jax.random.normal(ks[9], (C,), jnp.float32)
    rv2 = 1.0 + 0.1 * jnp.abs(jax.random.normal(ks[10], (C,), jnp.float32))

    args = (x, w1, g1, be1, rm1, rv1, w2, g2, be2, rm2, rv2)
    ref = basic_block_ref(*args)

    # Default row_tile (whole image per step at this tiny H): exercises the
    # prime-only path (T == 1).
    out_a = jax.block_until_ready(basic_block(*args))
    # Small row_tile -> T == 2: exercises the double-buffered halo prefetch.
    out_b = jax.block_until_ready(basic_block(*args, row_tile=8))

    for out in (out_a, out_b):
        assert out.shape == (N, H, W, C)
        max_err = jnp.max(jnp.abs(out - ref))
        # bf16 MXU inputs -> bf16-appropriate tolerance (f32 accumulation).
        assert jnp.allclose(out, ref, atol=5e-2, rtol=5e-2), (
            f"mismatch vs reference, max abs err = {max_err}")

    print("KERNEL_OK")
</pallas_src>

<mosaic_0001>
module attributes {stable_mosaic.version = 11 : i64} {
  func.func @kernel(%arg0: i32, %arg1: i32, %arg2: memref<2x20x32x128xbf16, #tpu.memory_space<any>>, %arg3: memref<384x384xbf16, #tpu.memory_space<vmem>>, %arg4: memref<1x128xf32, #tpu.memory_space<vmem>>, %arg5: memref<384x384xbf16, #tpu.memory_space<vmem>>, %arg6: memref<1x128xf32, #tpu.memory_space<vmem>>, %arg7: memref<1x16x16x128xf32, #tpu.memory_space<vmem>>, %arg8: memref<2x20x32x128xbf16, #tpu.memory_space<vmem>>, %arg9: memref<2x!tpu.dma_semaphore, #tpu.memory_space<semaphore_mem>>) attributes {dimension_semantics = [#tpu.dimension_semantics<parallel>, #tpu.dimension_semantics<arbitrary>], iteration_bounds = array<i64: 2, 1>, scalar_prefetch = 0 : i64, scratch_operands = 2 : i64, tpu.core_type = #tpu.core_type<tc>, window_params = [{}, {pipeline_mode = #tpu.pipeline_mode<synchronous>, transform_indices = @transform_1, window_bounds = array<i64: 384, 384>}, {pipeline_mode = #tpu.pipeline_mode<synchronous>, transform_indices = @transform_2, window_bounds = array<i64: 1, 128>}, {pipeline_mode = #tpu.pipeline_mode<synchronous>, transform_indices = @transform_3, window_bounds = array<i64: 384, 384>}, {pipeline_mode = #tpu.pipeline_mode<synchronous>, transform_indices = @transform_4, window_bounds = array<i64: 1, 128>}, {transform_indices = @transform_5, window_bounds = array<i64: 1, 16, 16, 128>}]} {
    %c2_i32 = arith.constant 2 : i32
    %c0_i32 = arith.constant 0 : i32
    %0 = arith.cmpi eq, %c2_i32, %c0_i32 : i32
    %c1_i32 = arith.constant 1 : i32
    %1 = arith.select %0, %c1_i32, %c2_i32 : i32
    %2 = arith.remsi %arg1, %1 : i32
    %c0_i32_0 = arith.constant 0 : i32
    %3 = arith.cmpi ne, %2, %c0_i32_0 : i32
    %c0_i32_1 = arith.constant 0 : i32
    %4 = arith.cmpi slt, %2, %c0_i32_1 : i32
    %c0_i32_2 = arith.constant 0 : i32
    %5 = arith.cmpi slt, %1, %c0_i32_2 : i32
    %6 = arith.xori %4, %5 : i1
    %7 = arith.andi %6, %3 : i1
    %8 = arith.addi %2, %1 : i32
    %9 = arith.select %7, %8, %2 : i32
    %c16_i32 = arith.constant 16 : i32
    %10 = arith.muli %arg1, %c16_i32 : i32
    %11 = tpu.assume_multiple %10, 8 : i32
    %c0_i32_3 = arith.constant 0 : i32
    %12 = arith.cmpi eq, %arg1, %c0_i32_3 : i32
    %13 = arith.extui %12 : i1 to i32
    %c0_i32_4 = arith.constant 0 : i32
    %14 = arith.cmpi ne, %13, %c0_i32_4 : i32
    scf.if %14 {
      %c0_i32_44 = arith.constant 0 : i32
      %c0_i32_45 = arith.constant 0 : i32
      %c0_i32_46 = arith.constant 0 : i32
      %c0_i32_47 = arith.constant 0 : i32
      %c0_i32_48 = arith.constant 0 : i32
      %124 = tpu.memref_slice %arg2[%arg0, %c0_i32_46, %c0_i32_47, %c0_i32_48] : memref<2x20x32x128xbf16, #tpu.memory_space<any>> -> memref<1x20x32x128xbf16, #tpu.memory_space<any>>
      %125 = tpu.memref_squeeze %124 : memref<1x20x32x128xbf16, #tpu.memory_space<any>> -> memref<20x32x128xbf16, #tpu.memory_space<any>>
      %c0_i32_49 = arith.constant 0 : i32
      %c0_i32_50 = arith.constant 0 : i32
      %c0_i32_51 = arith.constant 0 : i32
      %126 = tpu.memref_slice %arg8[%c0_i32_44, %c0_i32_49, %c0_i32_50, %c0_i32_51] : memref<2x20x32x128xbf16, #tpu.memory_space<vmem>> -> memref<1x20x32x128xbf16, #tpu.memory_space<vmem>>
      %127 = tpu.memref_squeeze %126 : memref<1x20x32x128xbf16, #tpu.memory_space<vmem>> -> memref<20x32x128xbf16, #tpu.memory_space<vmem>>
      %128 = tpu.memref_slice %arg9[%c0_i32_45] : memref<2x!tpu.dma_semaphore, #tpu.memory_space<semaphore_mem>> -> memref<1x!tpu.dma_semaphore, #tpu.memory_space<semaphore_mem>>
      %129 = tpu.memref_squeeze %128 : memref<1x!tpu.dma_semaphore, #tpu.memory_space<semaphore_mem>> -> memref<!tpu.dma_semaphore, #tpu.memory_space<semaphore_mem>>
      tpu.enqueue_dma source(%125 : memref<20x32x128xbf16, #tpu.memory_space<any>>) target(%127 : memref<20x32x128xbf16, #tpu.memory_space<vmem>>) target_semaphore(%129 : memref<!tpu.dma_semaphore, #tpu.memory_space<semaphore_mem>>)
    } else {
    }
    %c1_i32_5 = arith.constant 1 : i32
    %15 = arith.addi %arg1, %c1_i32_5 : i32
    %c1_i32_6 = arith.constant 1 : i32
    %16 = arith.cmpi slt, %15, %c1_i32_6 : i32
    %17 = arith.extui %16 : i1 to i32
    %c0_i32_7 = arith.constant 0 : i32
    %18 = arith.cmpi ne, %17, %c0_i32_7 : i32
    scf.if %18 {
      %c1_i32_44 = arith.constant 1 : i32
      %124 = arith.addi %arg1, %c1_i32_44 : i32
      %c16_i32_45 = arith.constant 16 : i32
      %125 = arith.muli %124, %c16_i32_45 : i32
      %126 = tpu.assume_multiple %125, 8 : i32
      %c1_i32_46 = arith.constant 1 : i32
      %127 = arith.subi %c1_i32_46, %9 : i32
      %c0_i32_47 = arith.constant 0 : i32
      %c0_i32_48 = arith.constant 0 : i32
      %128 = tpu.memref_slice %arg2[%arg0, %126, %c0_i32_47, %c0_i32_48] : memref<2x20x32x128xbf16, #tpu.memory_space<any>> -> memref<1x20x32x128xbf16, #tpu.memory_space<any>>
      %129 = tpu.memref_squeeze %128 : memref<1x20x32x128xbf16, #tpu.memory_space<any>> -> memref<20x32x128xbf16, #tpu.memory_space<any>>
      %c0_i32_49 = arith.constant 0 : i32
      %c0_i32_50 = arith.constant 0 : i32
      %c0_i32_51 = arith.constant 0 : i32
      %130 = tpu.memref_slice %arg8[%127, %c0_i32_49, %c0_i32_50, %c0_i32_51] : memref<2x20x32x128xbf16, #tpu.memory_space<vmem>> -> memref<1x20x32x128xbf16, #tpu.memory_space<vmem>>
      %131 = tpu.memref_squeeze %130 : memref<1x20x32x128xbf16, #tpu.memory_space<vmem>> -> memref<20x32x128xbf16, #tpu.memory_space<vmem>>
      %132 = tpu.memref_slice %arg9[%127] : memref<2x!tpu.dma_semaphore, #tpu.memory_space<semaphore_mem>> -> memref<1x!tpu.dma_semaphore, #tpu.memory_space<semaphore_mem>>
      %133 = tpu.memref_squeeze %132 : memref<1x!tpu.dma_semaphore, #tpu.memory_space<semaphore_mem>> -> memref<!tpu.dma_semaphore, #tpu.memory_space<semaphore_mem>>
      tpu.enqueue_dma source(%129 : memref<20x32x128xbf16, #tpu.memory_space<any>>) target(%131 : memref<20x32x128xbf16, #tpu.memory_space<vmem>>) target_semaphore(%133 : memref<!tpu.dma_semaphore, #tpu.memory_space<semaphore_mem>>)
    } else {
    }
    %c0_i32_8 = arith.constant 0 : i32
    %c0_i32_9 = arith.constant 0 : i32
    %19 = tpu.memref_slice %arg2[%arg0, %11, %c0_i32_8, %c0_i32_9] : memref<2x20x32x128xbf16, #tpu.memory_space<any>> -> memref<1x20x32x128xbf16, #tpu.memory_space<any>>
    %20 = tpu.memref_squeeze %19 : memref<1x20x32x128xbf16, #tpu.memory_space<any>> -> memref<20x32x128xbf16, #tpu.memory_space<any>>
    %c0_i32_10 = arith.constant 0 : i32
    %c0_i32_11 = arith.constant 0 : i32
    %c0_i32_12 = arith.constant 0 : i32
    %21 = tpu.memref_slice %arg8[%9, %c0_i32_10, %c0_i32_11, %c0_i32_12] : memref<2x20x32x128xbf16, #tpu.memory_space<vmem>> -> memref<1x20x32x128xbf16, #tpu.memory_space<vmem>>
    %22 = tpu.memref_squeeze %21 : memref<1x20x32x128xbf16, #tpu.memory_space<vmem>> -> memref<20x32x128xbf16, #tpu.memory_space<vmem>>
    %23 = tpu.memref_slice %arg9[%9] : memref<2x!tpu.dma_semaphore, #tpu.memory_space<semaphore_mem>> -> memref<1x!tpu.dma_semaphore, #tpu.memory_space<semaphore_mem>>
    %24 = tpu.memref_squeeze %23 : memref<1x!tpu.dma_semaphore, #tpu.memory_space<semaphore_mem>> -> memref<!tpu.dma_semaphore, #tpu.memory_space<semaphore_mem>>
    tpu.wait_dma2 semaphore(%24 : memref<!tpu.dma_semaphore, #tpu.memory_space<semaphore_mem>>) src(%20 : memref<20x32x128xbf16, #tpu.memory_space<any>>) dst(%22 : memref<20x32x128xbf16, #tpu.memory_space<vmem>>)
    %25 = arith.index_cast %9 : i32 to index
    %c0 = arith.constant 0 : index
    %c0_13 = arith.constant 0 : index
    %c0_14 = arith.constant 0 : index
    %26 = vector.load %arg8[%25, %c0, %c0_13, %c0_14] : memref<2x20x32x128xbf16, #tpu.memory_space<vmem>>, vector<1x20x32x128xbf16>
    %27 = vector.shape_cast %26 : vector<1x20x32x128xbf16> to vector<20x32x128xbf16>
    %28 = vector.extract_strided_slice %27 {offsets = [0, 0, 0], sizes = [18, 32, 128], strides = [1, 1, 1]} : vector<20x32x128xbf16> to vector<18x32x128xbf16>
    %29 = vector.shape_cast %28 : vector<18x32x128xbf16> to vector<576x128xbf16>
    %c0_15 = arith.constant 0 : index
    %c0_16 = arith.constant 0 : index
    %30 = vector.load %arg3[%c0_15, %c0_16] : memref<384x384xbf16, #tpu.memory_space<vmem>>, vector<128x384xbf16>
    %cst = arith.constant dense<0.000000e+00> : vector<576x384xf32>
    %31 = tpu.matmul %29, %30, %cst {dimension_numbers = #tpu.dot_dimension_numbers<[1], [0], [0], [1], [0, 0, 1, 1], [], []>} : vector<576x128xbf16>, vector<128x384xbf16>, vector<576x384xf32> -> vector<576x384xf32>
    %32 = vector.extract_strided_slice %27 {offsets = [1, 0, 0], sizes = [18, 32, 128], strides = [1, 1, 1]} : vector<20x32x128xbf16> to vector<18x32x128xbf16>
    %33 = vector.shape_cast %32 : vector<18x32x128xbf16> to vector<576x128xbf16>
    %c128 = arith.constant 128 : index
    %c0_17 = arith.constant 0 : index
    %34 = vector.load %arg3[%c128, %c0_17] : memref<384x384xbf16, #tpu.memory_space<vmem>>, vector<128x384xbf16>
    %cst_18 = arith.constant dense<0.000000e+00> : vector<576x384xf32>
    %35 = tpu.matmul %33, %34, %cst_18 {dimension_numbers = #tpu.dot_dimension_numbers<[1], [0], [0], [1], [0, 0, 1, 1], [], []>} : vector<576x128xbf16>, vector<128x384xbf16>, vector<576x384xf32> -> vector<576x384xf32>
    %36 = arith.addf %31, %35 : vector<576x384xf32>
    %37 = vector.extract_strided_slice %27 {offsets = [2, 0, 0], sizes = [18, 32, 128], strides = [1, 1, 1]} : vector<20x32x128xbf16> to vector<18x32x128xbf16>
    %38 = vector.shape_cast %37 : vector<18x32x128xbf16> to vector<576x128xbf16>
    %c256 = arith.constant 256 : index
    %c0_19 = arith.constant 0 : index
    %39 = vector.load %arg3[%c256, %c0_19] : memref<384x384xbf16, #tpu.memory_space<vmem>>, vector<128x384xbf16>
    %cst_20 = arith.constant dense<0.000000e+00> : vector<576x384xf32>
    %40 = tpu.matmul %38, %39, %cst_20 {dimension_numbers = #tpu.dot_dimension_numbers<[1], [0], [0], [1], [0, 0, 1, 1], [], []>} : vector<576x128xbf16>, vector<128x384xbf16>, vector<576x384xf32> -> vector<576x384xf32>
    %41 = arith.addf %36, %40 : vector<576x384xf32>
    %42 = vector.extract_strided_slice %41 {offsets = [0, 0], sizes = [576, 128], strides = [1, 1]} : vector<576x384xf32> to vector<576x128xf32>
    %43 = vector.shape_cast %42 : vector<576x128xf32> to vector<18x32x128xf32>
    %44 = vector.extract_strided_slice %41 {offsets = [0, 128], sizes = [576, 128], strides = [1, 1]} : vector<576x384xf32> to vector<576x128xf32>
    %45 = vector.shape_cast %44 : vector<576x128xf32> to vector<18x32x128xf32>
    %46 = vector.extract_strided_slice %41 {offsets = [0, 256], sizes = [576, 128], strides = [1, 1]} : vector<576x384xf32> to vector<576x128xf32>
    %47 = vector.shape_cast %46 : vector<576x128xf32> to vector<18x32x128xf32>
    %48 = vector.extract_strided_slice %43 {offsets = [0, 31, 0], sizes = [18, 1, 128], strides = [1, 1, 1]} : vector<18x32x128xf32> to vector<18x1x128xf32>
    %49 = vector.extract_strided_slice %43 {offsets = [0, 0, 0], sizes = [18, 31, 128], strides = [1, 1, 1]} : vector<18x32x128xf32> to vector<18x31x128xf32>
    %50 = tpu.concatenate %48, %49 in 1 : vector<18x1x128xf32>, vector<18x31x128xf32> -> vector<18x32x128xf32>
    %51 = arith.addf %50, %45 : vector<18x32x128xf32>
    %52 = vector.extract_strided_slice %47 {offsets = [0, 1, 0], sizes = [18, 31, 128], strides = [1, 1, 1]} : vector<18x32x128xf32> to vector<18x31x128xf32>
    %53 = vector.extract_strided_slice %47 {offsets = [0, 0, 0], sizes = [18, 1, 128], strides = [1, 1, 1]} : vector<18x32x128xf32> to vector<18x1x128xf32>
    %54 = tpu.concatenate %52, %53 in 1 : vector<18x31x128xf32>, vector<18x1x128xf32> -> vector<18x32x128xf32>
    %55 = arith.addf %51, %54 : vector<18x32x128xf32>
    %c0_21 = arith.constant 0 : index
    %c0_22 = arith.constant 0 : index
    %56 = vector.load %arg4[%c0_21, %c0_22] : memref<1x128xf32, #tpu.memory_space<vmem>>, vector<1x128xf32>
    %57 = vector.shape_cast %56 : vector<1x128xf32> to vector<1x1x128xf32>
    %58 = vector.broadcast %57 : vector<1x1x128xf32> to vector<18x32x128xf32>
    %59 = arith.addf %55, %58 : vector<18x32x128xf32>
    %cst_23 = arith.constant 0.000000e+00 : f32
    %60 = vector.broadcast %cst_23 : f32 to vector<18x32x128xf32>
    %61 = arith.maximumf %59, %60 : vector<18x32x128xf32>
    %62 = tpu.iota {dimensions = array<i32: 1>} : vector<18x32x1xi32>
    %63 = tpu.iota {dimensions = array<i32: 0>} : vector<18x32x1xi32>
    %c1_i32_24 = arith.constant 1 : i32
    %64 = arith.subi %11, %c1_i32_24 : i32
    %65 = vector.broadcast %64 : i32 to vector<18x32x1xi32>
    %66 = arith.addi %63, %65 : vector<18x32x1xi32>
    %c8_i32 = arith.constant 8 : i32
    %67 = vector.broadcast %c8_i32 : i32 to vector<18x32x1xi32>
    %68 = arith.cmpi sge, %62, %67 : vector<18x32x1xi32>
    %c24_i32 = arith.constant 24 : i32
    %69 = vector.broadcast %c24_i32 : i32 to vector<18x32x1xi32>
    %70 = arith.cmpi slt, %62, %69 : vector<18x32x1xi32>
    %71 = arith.andi %68, %70 : vector<18x32x1xi1>
    %c0_i32_25 = arith.constant 0 : i32
    %72 = vector.broadcast %c0_i32_25 : i32 to vector<18x32x1xi32>
    %73 = arith.cmpi sge, %66, %72 : vector<18x32x1xi32>
    %74 = arith.andi %71, %73 : vector<18x32x1xi1>
    %c16_i32_26 = arith.constant 16 : i32
    %75 = vector.broadcast %c16_i32_26 : i32 to vector<18x32x1xi32>
    %76 = arith.cmpi slt, %66, %75 : vector<18x32x1xi32>
    %77 = arith.andi %74, %76 : vector<18x32x1xi1>
    %cst_27 = arith.constant 0.000000e+00 : f32
    %78 = vector.shape_cast %77 : vector<18x32x1xi1> to vector<18x32x1xi1>
    %79 = vector.broadcast %78 : vector<18x32x1xi1> to vector<18x32x128xi1>
    %80 = vector.broadcast %cst_27 : f32 to vector<18x32x128xf32>
    %81 = arith.select %79, %61, %80 : vector<18x32x128xi1>, vector<18x32x128xf32>
    %82 = arith.truncf %81 : vector<18x32x128xf32> to vector<18x32x128xbf16>
    %83 = vector.extract_strided_slice %82 {offsets = [0, 0, 0], sizes = [16, 32, 128], strides = [1, 1, 1]} : vector<18x32x128xbf16> to vector<16x32x128xbf16>
    %84 = vector.shape_cast %83 : vector<16x32x128xbf16> to vector<512x128xbf16>
    %c0_28 = arith.constant 0 : index
    %c0_29 = arith.constant 0 : index
    %85 = vector.load %arg5[%c0_28, %c0_29] : memref<384x384xbf16, #tpu.memory_space<vmem>>, vector<128x384xbf16>
    %cst_30 = arith.constant dense<0.000000e+00> : vector<512x384xf32>
    %86 = tpu.matmul %84, %85, %cst_30 {dimension_numbers = #tpu.dot_dimension_numbers<[1], [0], [0], [1], [0, 0, 1, 1], [], []>} : vector<512x128xbf16>, vector<128x384xbf16>, vector<512x384xf32> -> vector<512x384xf32>
    %87 = vector.extract_strided_slice %82 {offsets = [1, 0, 0], sizes = [16, 32, 128], strides = [1, 1, 1]} : vector<18x32x128xbf16> to vector<16x32x128xbf16>
    %88 = vector.shape_cast %87 : vector<16x32x128xbf16> to vector<512x128xbf16>
    %c128_31 = arith.constant 128 : index
    %c0_32 = arith.constant 0 : index
    %89 = vector.load %arg5[%c128_31, %c0_32] : memref<384x384xbf16, #tpu.memory_space<vmem>>, vector<128x384xbf16>
    %cst_33 = arith.constant dense<0.000000e+00> : vector<512x384xf32>
    %90 = tpu.matmul %88, %89, %cst_33 {dimension_numbers = #tpu.dot_dimension_numbers<[1], [0], [0], [1], [0, 0, 1, 1], [], []>} : vector<512x128xbf16>, vector<128x384xbf16>, vector<512x384xf32> -> vector<512x384xf32>
    %91 = arith.addf %86, %90 : vector<512x384xf32>
    %92 = vector.extract_strided_slice %82 {offsets = [2, 0, 0], sizes = [16, 32, 128], strides = [1, 1, 1]} : vector<18x32x128xbf16> to vector<16x32x128xbf16>
    %93 = vector.shape_cast %92 : vector<16x32x128xbf16> to vector<512x128xbf16>
    %c256_34 = arith.constant 256 : index
    %c0_35 = arith.constant 0 : index
    %94 = vector.load %arg5[%c256_34, %c0_35] : memref<384x384xbf16, #tpu.memory_space<vmem>>, vector<128x384xbf16>
    %cst_36 = arith.constant dense<0.000000e+00> : vector<512x384xf32>
    %95 = tpu.matmul %93, %94, %cst_36 {dimension_numbers = #tpu.dot_dimension_numbers<[1], [0], [0], [1], [0, 0, 1, 1], [], []>} : vector<512x128xbf16>, vector<128x384xbf16>, vector<512x384xf32> -> vector<512x384xf32>
    %96 = arith.addf %91, %95 : vector<512x384xf32>
    %97 = vector.extract_strided_slice %96 {offsets = [0, 0], sizes = [512, 128], strides = [1, 1]} : vector<512x384xf32> to vector<512x128xf32>
    %98 = vector.shape_cast %97 : vector<512x128xf32> to vector<16x32x128xf32>
    %99 = vector.extract_strided_slice %96 {offsets = [0, 128], sizes = [512, 128], strides = [1, 1]} : vector<512x384xf32> to vector<512x128xf32>
    %100 = vector.shape_cast %99 : vector<512x128xf32> to vector<16x32x128xf32>
    %101 = vector.extract_strided_slice %96 {offsets = [0, 256], sizes = [512, 128], strides = [1, 1]} : vector<512x384xf32> to vector<512x128xf32>
    %102 = vector.shape_cast %101 : vector<512x128xf32> to vector<16x32x128xf32>
    %103 = vector.extract_strided_slice %98 {offsets = [0, 31, 0], sizes = [16, 1, 128], strides = [1, 1, 1]} : vector<16x32x128xf32> to vector<16x1x128xf32>
    %104 = vector.extract_strided_slice %98 {offsets = [0, 0, 0], sizes = [16, 31, 128], strides = [1, 1, 1]} : vector<16x32x128xf32> to vector<16x31x128xf32>
    %105 = tpu.concatenate %103, %104 in 1 : vector<16x1x128xf32>, vector<16x31x128xf32> -> vector<16x32x128xf32>
    %106 = arith.addf %105, %100 : vector<16x32x128xf32>
    %107 = vector.extract_strided_slice %102 {offsets = [0, 1, 0], sizes = [16, 31, 128], strides = [1, 1, 1]} : vector<16x32x128xf32> to vector<16x31x128xf32>
    %108 = vector.extract_strided_slice %102 {offsets = [0, 0, 0], sizes = [16, 1, 128], strides = [1, 1, 1]} : vector<16x32x128xf32> to vector<16x1x128xf32>
    %109 = tpu.concatenate %107, %108 in 1 : vector<16x31x128xf32>, vector<16x1x128xf32> -> vector<16x32x128xf32>
    %110 = arith.addf %106, %109 : vector<16x32x128xf32>
    %111 = vector.extract_strided_slice %27 {offsets = [2, 8, 0], sizes = [16, 16, 128], strides = [1, 1, 1]} : vector<20x32x128xbf16> to vector<16x16x128xbf16>
    %112 = arith.extf %111 : vector<16x16x128xbf16> to vector<16x16x128xf32>
    %113 = vector.extract_strided_slice %110 {offsets = [0, 8, 0], sizes = [16, 16, 128], strides = [1, 1, 1]} : vector<16x32x128xf32> to vector<16x16x128xf32>
    %c0_37 = arith.constant 0 : index
    %c0_38 = arith.constant 0 : index
    %114 = vector.load %arg6[%c0_37, %c0_38] : memref<1x128xf32, #tpu.memory_space<vmem>>, vector<1x128xf32>
    %115 = vector.shape_cast %114 : vector<1x128xf32> to vector<1x1x128xf32>
    %116 = vector.broadcast %115 : vector<1x1x128xf32> to vector<16x16x128xf32>
    %117 = arith.addf %113, %116 : vector<16x16x128xf32>
    %118 = arith.addf %117, %112 : vector<16x16x128xf32>
    %cst_39 = arith.constant 0.000000e+00 : f32
    %119 = vector.broadcast %cst_39 : f32 to vector<16x16x128xf32>
    %120 = arith.maximumf %118, %119 : vector<16x16x128xf32>
    %c0_40 = arith.constant 0 : index
    %c0_41 = arith.constant 0 : index
    %c0_42 = arith.constant 0 : index
    %c0_43 = arith.constant 0 : index
    %121 = vector.load %arg7[%c0_40, %c0_41, %c0_42, %c0_43] : memref<1x16x16x128xf32, #tpu.memory_space<vmem>>, vector<1x16x16x128xf32>
    %122 = vector.shape_cast %121 : vector<1x16x16x128xf32> to vector<16x16x128xf32>
    %123 = vector.shape_cast %120 : vector<16x16x128xf32> to vector<1x16x16x128xf32>
    tpu.vector_store %arg7[%c0_40, %c0_41, %c0_42, %c0_43], %123 {strides = array<i32>} : memref<1x16x16x128xf32, #tpu.memory_space<vmem>>, vector<1x16x16x128xf32>,
    return
  }
  func.func @transform_1(%arg0: i32, %arg1: i32) -> (i32, i32) {
    %c0_i32 = arith.constant 0 : i32
    %c0_i32_0 = arith.constant 0 : i32
    %c0_i32_1 = arith.constant 0 : i32
    return %c0_i32, %c0_i32_0 : i32, i32
  }
  func.func @transform_2(%arg0: i32, %arg1: i32) -> (i32, i32) {
    %c0_i32 = arith.constant 0 : i32
    %c0_i32_0 = arith.constant 0 : i32
    %c0_i32_1 = arith.constant 0 : i32
    return %c0_i32, %c0_i32_0 : i32, i32
  }
  func.func @transform_3(%arg0: i32, %arg1: i32) -> (i32, i32) {
    %c0_i32 = arith.constant 0 : i32
    %c0_i32_0 = arith.constant 0 : i32
    %c0_i32_1 = arith.constant 0 : i32
    return %c0_i32, %c0_i32_0 : i32, i32
  }
  func.func @transform_4(%arg0: i32, %arg1: i32) -> (i32, i32) {
    %c0_i32 = arith.constant 0 : i32
    %c0_i32_0 = arith.constant 0 : i32
    %c0_i32_1 = arith.constant 0 : i32
    return %c0_i32, %c0_i32_0 : i32, i32
  }
  func.func @transform_5(%arg0: i32, %arg1: i32) -> (i32, i32, i32, i32) {
    %c0_i32 = arith.constant 0 : i32
    %c0_i32_0 = arith.constant 0 : i32
    %c0_i32_1 = arith.constant 0 : i32
    return %arg0, %arg1, %c0_i32, %c0_i32_0 : i32, i32, i32, i32
  }
}

</mosaic_0001>

<bundles_post_ra>
// kernel: tpu_custom_call.1
= control target key start
LH: loop header
LB: loop body
LE: loop exit
PB: predicated region body
PF: predicated region fallthrough
CT: control target
= control target key end

     0   :  { %10 = vsyncpa [#allocation5], 0  ;;  %s11695_s0 = inlined_call_operand.hbm [shape: bf16[2,20,32,128], index: 0, kind: input, shape index: {}]   ;;  %s11696_s1 = inlined_call_operand.hbm [shape: bf16[384,384], index: 1, kind: input, shape index: {}]   ;;  %s11697_s2 = inlined_call_operand.vmem [shape: f32[1,128], index: 2, kind: input, shape index: {}]   ;;  %s11698_s3 = inlined_call_operand.hbm [shape: bf16[384,384], index: 3, kind: input, shape index: {}]   ;;  %s11699_s4 = inlined_call_operand.vmem [shape: f32[1,128], index: 4, kind: input, shape index: {}]   ;;  %s11700_s5 = inlined_call_operand.hbm [shape: f32[2,16,16,128], index: 5, kind: output, shape index: {}]  }
   0x1   :  { %11 = vsyncpa [#allocation8], 0 }
   0x2   :  { %12 = vsyncpa [#allocation6], 0 }
   0x3   :  { %14 = vsyncpa [#allocation6 + $0x1], 0  ;;  %s9412_s18 = smov 0   ;;  %s9414_s19 = smov 0  }
   0x4   :  { %s9416_s20 = smov 0   ;;  %s9418_s21 = smov 0  }
   0x5   :  { %s9420_s22 = smov 0   ;;  %s9422_s23 = smov 0  }
   0x6 LB: > { %s7662_s24 = sadd.s32 4294967295, %s9369_s23   ;;  %s7663_s25 = sadd.s32 4294967294, %s9369_s23   ;;  %s9369_s23 = sphi %s9422_s23, %s20_s23   ;;  %s9365_s22 = sphi %s9420_s22, %s11999_s22   ;;  %s9361_s21 = sphi %s9418_s21, %s11998_s21   ;;  %s9357_s20 = sphi %s9416_s20, %s11997_s20   ;;  %s9353_s19 = sphi %s9414_s19, %s11996_s19   ;;  %s9349_s18 = sphi %s9412_s18, %s11995_s18  }
   0x7   : > { %s32_s26 = sadd.s32 1, %s9365_s22  ;;  %s125_s27 = sadd.s32 1, %s9357_s20 }
   0x8   : > { %p34_p0 = scmp.ge.s32.totalorder %s32_s26, 2  ;;  %p135_p1 = scmp.ne.s32.totalorder %s9357_s20, %s9353_s19 }
   0x9   : > { %p136_p2 = scmp.eq.s32.totalorder %s7662_s24, 1  ;;  %p141_p3 = scmp.ne.s32.totalorder %s9353_s19, %s9349_s18 }
   0xa   : > { %s12001_s26 = smov (%p34_p0, %s32_s26), 0  ;;  %p142_p5 = scmp.eq.s32.totalorder %s7663_s25, 1 }
   0xb   : > { %11724 = sst [smem:[#allocation20_spill]] %s12001_s26  ;;  %p9452_p4 = por %p136_p2, %p135_p1 }
   0xc   : > { %s120_s29 = ssub.s32 %s9365_s22, %s12001_s26  ;;  %p7664_p6 = scmp.ge.s32.totalorder %s9369_s23, 1 }
   0xd   : > { %s11725_s28 = scalar_select %p9452_p4, 1, 0 }
   0xe   : > { %p123_p7 = scmp.eq.s32.totalorder %s120_s29, 0  ;;  %p9459_p8 = por %p142_p5, %p141_p3 }
   0xf   : > { %p149_p9 = scmp.lt.s32.totalorder %s9369_s23, 3  ;;  %p9471_p11 = scmp.eq.s32.totalorder %s7662_s24, 0 }
  0x10   : > { %s11726_s30 = scalar_select %p9459_p8, 1, 0 }
  0x11   : > { %s9465_s6 = scalar_select %p123_p7, %s9357_s20, %s125_s27  }
  0x12   : > { %p9467_p10 = pnand %p7664_p6, %p149_p9  ;;  %s9371_s9 = smov [#allocation4]  }
  0x13   : > { %s11728_s8 = scalar_select %p9471_p11, 1, 0 }
  0x14   : > { %s11727_s7 = scalar_select %p9467_p10, 1, 0 }
  0x15   : > { %p8866_p12 = pneg %p9467_p10  ;;  %s161_s10 = sshll.u32 %s9371_s9, 4  ;;  %s162_s10 = int_to_ptr.vmem [resolvable:$true] %s161_s10 }
  0x16   : > { %s9372_s12 = smov [#allocation7]   ;;  %s9201_s16 = scalar_lea.hbm %s11696_s1, 9216 }
  0x17   : > { %p9479_p13 = pnand %p9471_p11, %p8866_p12  ;;  %s177_s13 = sshll.u32 %s9372_s12, 4  ;;  %s9483_s13 = int_to_ptr.vmem [resolvable:$true] %s177_s13 }
  0x18   : > { %p9202_p0 = scmp.ne.s32.totalorder %s11696_s1, %s9201_s16  ;;  %p9208_p5 = scmp.lt.u32.totalorder %s9201_s16, %s11696_s1 }
  0x19   : > { %p9203_p1 = pneg %p9479_p13 }
  0x1b   : > { %p9204_p2 = pnand %p9203_p1, %p9202_p0 }
  0x1d   : > { %p9205_p3 = pneg %p9204_p2 }
  0x1f   : > { %p9210_p6 = pnand %p9208_p5, %p9205_p3 }
  0x21   : > { %9213 = shalt.err (!%p9210_p6)
}
  0x22   : > { %s9214_s29 = scalar_lea.vmem %s162_s10, 9216  ;;  %p9222_p8 = scmp.lt.s32.totalorder %s162_s10, %s162_s10 }
  0x23   : > { %p9215_p7 = scmp.ne.s32.totalorder %s162_s10, %s9214_s29  ;;  %p9223_p4 = scmp.lt.s32.totalorder %s9214_s29, %s9214_s29 }
  0x25   : > { %p9217_p9 = pnand %p9215_p7, %p9203_p1  ;;  %p9224_p11 = por %p9223_p4, %p9222_p8 }
  0x27   : > { %p9218_p12 = pneg %p9217_p9 }
  0x29   : > { %p9225_p10 = pnand %p9224_p11, %p9218_p12 }
  0x2b   : > { %9228 = shalt.err (!%p9225_p10)
}
  0x2c   : > { %s9373_s9 = smov 192   ;;  %s9374_s12 = smov 12  }
  0x2d   : > { %8869 = dma.hbm_to_vmem [thread:$0]  (!%p9479_p13), %s11696_s1, 9216, %s162_s10, [#allocation5], %s9373_s9, %s9373_s9, %s9374_s12  }
  0x2e   : > { %s9229_s24 = scalar_lea.hbm %s11698_s3, 9216 }
  0x2f   : > { %p9230_p0 = scmp.ne.s32.totalorder %s11698_s3, %s9229_s24  ;;  %p9236_p10 = scmp.lt.u32.totalorder %s9229_s24, %s11698_s3 }
  0x31   : > { %p9232_p4 = pnand %p9230_p0, %p9203_p1 }
  0x33   : > { %p9233_p8 = pneg %p9232_p4 }
  0x35   : > { %p9238_p11 = pnand %p9236_p10, %p9233_p8 }
  0x37   : > { %9241 = shalt.err (!%p9238_p11)
}
  0x38   : > { %s9242_s10 = scalar_lea.vmem %s9483_s13, 9216  ;;  %p9250_p6 = scmp.lt.s32.totalorder %s9483_s13, %s9483_s13 }
  0x39   : > { %p9243_p2 = scmp.ne.s32.totalorder %s9483_s13, %s9242_s10  ;;  %p9251_p7 = scmp.lt.s32.totalorder %s9242_s10, %s9242_s10 }
  0x3b   : > { %p9245_p3 = pnand %p9243_p2, %p9203_p1  ;;  %p9252_p9 = por %p9251_p7, %p9250_p6 }
  0x3d   : > { %p9246_p5 = pneg %p9245_p3 }
  0x3f   : > { %p9253_p12 = pnand %p9252_p9, %p9246_p5 }
  0x41   : > { %9256 = shalt.err (!%p9253_p12)
}
  0x42   : > { %8872 = dma.hbm_to_vmem [thread:$0]  (!%p9479_p13), %s11698_s3, 9216, %s9483_s13, [#allocation8], %s9373_s9, %s9373_s9, %s9374_s12  }
  0x43   : > { %p11730_p0 = scmp.ne.s32.totalorder %s11727_s7, 0 }
  0x45   : > { %196 = sbr.rel (%p11730_p0) target bundleno = 1808 (0x710), region = 36 }
  0x4c   : > { %p11731_p4 = scmp.ne.s32.totalorder %s11728_s8, 0 }
  0x4e   : > { %9334 = dma.done.wait (%p11731_p4), [#allocation5], 9216  }
  0x4f   : > { %9336 = vsyncadd (%p11731_p4), [#allocation5], 4294958080 }
  0x50   : > { %9338 = dma.done.wait (%p11731_p4), [#allocation8], 9216  }
  0x51   : > { %9340 = vsyncadd (%p11731_p4), [#allocation8], 4294958080  ;;  %s218_s11 = sand.u32 1, %s9353_s19   ;;  %s7826_s13 = smul.u32 5120, %s9361_s21 }
  0x52   : > { %s7670_s7 = sshll.u32 %s218_s11, 8  ;;  %s9375_s16 = smov [#allocation2]  }
  0x53   : > { %s242_s15 = scalar_lea.hbm %s11695_s0, %s7826_s13  ;;  %s250_s17 = sshll.u32 %s9375_s16, 4  ;;  %s251_s17 = int_to_ptr.vmem [resolvable:$true] %s250_s17 }
  0x54   : > { %s9257_s24 = scalar_lea.hbm %s242_s15, 5120  ;;  %s9259_s8 = scalar_lea.hbm %s11695_s0, 10240 }
  0x55   : > { %p9258_p13 = scmp.ne.s32.totalorder %s242_s15, %s9257_s24  ;;  %p9260_p1 = scmp.lt.u32.totalorder %s242_s15, %s11695_s0 }
  0x56   : > { %p9261_p8 = scmp.lt.u32.totalorder %s9259_s8, %s9257_s24  ;;  %p9263_p11 = scmp.lt.u32.totalorder %s9257_s24, %s242_s15 }
  0x58   : > { %p9262_p10 = por %p9261_p8, %p9260_p1 }
  0x5a   : > { %p9264_p2 = por %p9263_p11, %p9262_p10 }
  0x5c   : > { %p9265_p3 = pnand %p9264_p2, %p9258_p13 }
  0x5e   : > { %9268 = shalt.err (!%p9265_p3)  }
  0x5f   : > { %s9269_s26 = scalar_lea.vmem %s251_s17, 5120  ;;  %s9273_s14 = scalar_lea.vmem %s251_s17, 10240 }
  0x60   : > { %p9270_p5 = scmp.ne.s32.totalorder %s251_s17, %s9269_s26  ;;  %p9274_p6 = scmp.lt.s32.totalorder %s251_s17, %s251_s17 }
  0x61   : > { %p9275_p7 = scmp.lt.s32.totalorder %s9273_s14, %s9269_s26 }
  0x63   : > { %p9276_p9 = por %p9275_p7, %p9274_p6 }
  0x65   : > { %p9277_p12 = pnand %p9276_p9, %p9270_p5 }
  0x67   : > { %9280 = shalt.err (!%p9277_p12)  }
  0x68   : > { %253 = dma.hbm_to_vmem [thread:$0]  %s242_s15, 5120, %s251_s17, [#allocation3] }
  0x69   : > { %s9555_s13 = scalar_lea.vmem [#allocation9], %s7670_s7 }
  0x6a   : > { %9341 = dma.done.wait [#allocation3], 5120 }
  0x6b   : > { %9342 = vsyncadd [#allocation3], 4294962176  ;;  %v11706_v0 = vmov 0   ;;  %v8940_v1 = vld [vmem:[#allocation4 + $0xc4] ss:$12 sps:$4 sm:$0xff]   ;;  %v9561_v27 = vld [vmem:[#allocation2 + $0x18] sm:$0xff] }
  0x6c   : > { %554 = vmatprep.mubr.bf16.mxu0 %v11706_v0  ;;  %v8942_v2 = vld [vmem:[#allocation4 + $0xc8] ss:$12 sps:$4 sm:$0xff]   ;;  %522 = vmatprep.subr.bf16.mxu0 %v8940_v1  ;;  %v8943_v3 = vld [vmem:[#allocation4 + $0xc0] ss:$12 sps:$4 sm:$0xff]   ;;  %v8947_v6 = vld [vmem:[#allocation4 + $0xd8] ss:$12 sps:$4 sm:$0xff]  }
  0x6d   : > { %8080 = vmatprep.subr.bf16.mxu1 %v8942_v2  ;;  %v8944_v4 = vld [vmem:[#allocation4 + $0xdc] ss:$12 sps:$4 sm:$0xff]   ;;  %523 = vmatpush1.bf16.msra.mxu0 %v8943_v3  ;;  %v8946_v5 = vld [vmem:[#allocation4 + $0xe0] ss:$12 sps:$4 sm:$0xff]   ;;  %v8950_v8 = vld [vmem:[#allocation4 + $0xf8] ss:$12 sps:$4 sm:$0xff]  }
  0x6e   : > { %8081 = vmatpush3.bf16.msra.mxu1 %v8942_v2  ;;  %524 = vmatprep.subr.bf16.mxu0 %v8944_v4  ;;  %v8948_v7 = vld [vmem:[#allocation4 + $0xf4] ss:$12 sps:$4 sm:$0xff]   ;;  %v8951_v9 = vld [vmem:[#allocation4 + $0xf0] ss:$12 sps:$4 sm:$0xff]   ;;  %v8952_v10 = vld [vmem:[#allocation4 + $0x10c] ss:$12 sps:$4 sm:$0xff]  }
  0x6f   : > { %8082 = vmatprep.subr.bf16.mxu1 %v8946_v5  ;;  %v8954_v11 = vld [vmem:[#allocation4 + $0x110] ss:$12 sps:$4 sm:$0xff]   ;;  %v8955_v12 = vld [vmem:[#allocation4 + $0x108] ss:$12 sps:$4 sm:$0xff]   ;;  %v8959_v15 = vld [vmem:[#allocation4 + $0x120] ss:$12 sps:$4 sm:$0xff]  }
  0x70   : > { %v8956_v13 = vld [vmem:[#allocation4 + $0x124] ss:$12 sps:$4 sm:$0xff]   ;;  %v8958_v14 = vld [vmem:[#allocation4 + $0x128] ss:$12 sps:$4 sm:$0xff]   ;;  %v8962_v17 = vld [vmem:[#allocation4 + $0x140] ss:$12 sps:$4 sm:$0xff]  }
  0x71   : > { %525 = vmatpush1.bf16.msra.mxu0 %v8947_v6  ;;  %v8960_v16 = vld [vmem:[#allocation4 + $0x13c] ss:$12 sps:$4 sm:$0xff]   ;;  %v9558_v18 = vld [vmem:[#allocation2 + $0x10] sm:$0xff]  ;;  %v8963_v19 = vld [vmem:[#allocation4 + $0x138] ss:$12 sps:$4 sm:$0xff]   ;;  %vm3276_vm0 = vcmask 1040384  }
  0x72   : > { %8083 = vmatpush3.bf16.msra.mxu1 %v8946_v5  ;;  %526 = vmatprep.subr.bf16.mxu0 %v8948_v7  ;;  %v8964_v20 = vld [vmem:[#allocation4 + $0x154] ss:$12 sps:$4 sm:$0xff]   ;;  %v8966_v21 = vld [vmem:[#allocation4 + $0x158] ss:$12 sps:$4 sm:$0xff]   ;;  %v8967_v22 = vld [vmem:[#allocation4 + $0x150] ss:$12 sps:$4 sm:$0xff]  }
  0x73   : > { %8084 = vmatprep.subr.bf16.mxu1 %v8950_v8  ;;  %8096 = vmatprep.mubr.bf16.mxu1 %v9558_v18  ;;  %v8968_v23 = vld [vmem:[#allocation4 + $0x16c] ss:$12 sps:$4 sm:$0xff]   ;;  %v8970_v24 = vld [vmem:[#allocation4 + $0x170] ss:$12 sps:$4 sm:$0xff]   ;;  %v8971_v25 = vld [vmem:[#allocation4 + $0x168] ss:$12 sps:$4 sm:$0xff]  }
  0x74   : > { %v8974_v26 = vld [vmem:[#allocation4 + $0x4] ss:$12 sps:$4 sm:$0xff]   ;;  %v8972_v28 = vld [vmem:[#allocation4] ss:$12 sps:$4 sm:$0xff]   ;;  %v8977_v30 = vld [vmem:[#allocation4 + $0x1c] ss:$12 sps:$4 sm:$0xff]  }
  0x75   : > { %527 = vmatpush1.bf16.msra.mxu0 %v8951_v9  ;;  %v9563_v29 = vld [vmem:[#allocation2 + $0x20] sm:$0xff]  ;;  %v9569_v32 = vld [vmem:[#allocation2 + $0x28] sm:$0xff]  ;;  %v9571_v34 = vld [vmem:[#allocation2 + $0x30] sm:$0xff]  ;;  %vm3619_vm1 = vcmask 1046528   ;;  %vm7303_vm2 = vcmask 1043456   ;;  %s7827_s24 = sshll.u32 %s9361_s21, 12 }
  0x76   : > { %8085 = vmatpush3.bf16.msra.mxu1 %v8950_v8  ;;  %528 = vmatprep.subr.bf16.mxu0 %v8952_v10  ;;  %v8975_v31 = vld [vmem:[#allocation4 + $0x18] ss:$12 sps:$4 sm:$0xff]   ;;  %v8980_v33 = vld [vmem:[#allocation4 + $0x34] ss:$12 sps:$4 sm:$0xff]   ;;  %v8978_v35 = vld [vmem:[#allocation4 + $0x30] ss:$12 sps:$4 sm:$0xff]   ;;  %s11641_s29 = scalar_lea.hbm %s11700_s5, %s7827_s24 }
  0x77   : > { %8086 = vmatprep.subr.bf16.mxu1 %v8954_v11  ;;  %v8983_v36 = vld [vmem:[#allocation4 + $0x4c] ss:$12 sps:$4 sm:$0xff]   ;;  %v8981_v37 = vld [vmem:[#allocation4 + $0x48] ss:$12 sps:$4 sm:$0xff]   ;;  %v8986_v39 = vld [vmem:[#allocation4 + $0x64] ss:$12 sps:$4 sm:$0xff]  }
  0x78   : > { %v9577_v38 = vld [vmem:[#allocation2 + $0x38] sm:$0xff]  ;;  %v9579_v40 = vld [vmem:[#allocation2 + $0x40] sm:$0xff]  ;;  %v9585_v44 = vld [vmem:[#allocation2 + $0x48] sm:$0xff]  ;;  %s7552_s25 = sshll.u32 %s9555_s13, 4  ;;  %s11649_s10 = scalar_lea.sflag [#allocation6], %s218_s11  ;;  %s11643_s25 = int_to_ptr.vmem [resolvable:$true] %s7552_s25 }
  0x79   : > { %529 = vmatpush1.bf16.msra.mxu0 %v8955_v12  ;;  %v8984_v41 = vld [vmem:[#allocation4 + $0x60] ss:$12 sps:$4 sm:$0xff]   ;;  %v8989_v42 = vld [vmem:[#allocation4 + $0x7c] ss:$12 sps:$4 sm:$0xff]   ;;  %v8987_v43 = vld [vmem:[#allocation4 + $0x78] ss:$12 sps:$4 sm:$0xff]  }
  0x7a   : > { %8087 = vmatpush3.bf16.msra.mxu1 %v8954_v11  ;;  %530 = vmatprep.subr.bf16.mxu0 %v8956_v13  ;;  %v8992_v45 = vld [vmem:[#allocation4 + $0x94] ss:$12 sps:$4 sm:$0xff]   ;;  %v8990_v47 = vld [vmem:[#allocation4 + $0x90] ss:$12 sps:$4 sm:$0xff]   ;;  %v8995_v48 = vld [vmem:[#allocation4 + $0xac] ss:$12 sps:$4 sm:$0xff]  }
  0x7b   : > { %8088 = vmatprep.subr.bf16.mxu1 %v8958_v14  ;;  %v9587_v46 = vld [vmem:[#allocation2 + $0x50] sm:$0xff]  ;;  %v9593_v50 = vld [vmem:[#allocation2 + $0x58] sm:$0xff]  ;;  %v9595_v51 = vld [vmem:[#allocation2 + $0x60] sm:$0xff]  ;;  %s9281_s21 = scalar_lea.vmem %s11643_s25, 4096  ;;  %p11992_p4 = scmp.ne.s32.totalorder %s11725_s28, 0 }
  0x7c   : > { %v8993_v49 = vld [vmem:[#allocation4 + $0xa8] ss:$12 sps:$4 sm:$0xff]   ;;  %v9609_v54 = vld [vmem:[#allocation2 + $0x78] sm:$0xff]  ;;  %v9611_v55 = vld [vmem:[#allocation2 + $0x80] sm:$0xff]  ;;  %p9282_p0 = scmp.ne.s32.totalorder %s11643_s25, %s9281_s21  ;;  %s9379_s26 = smov [#allocation9]  }
  0x7d   : > { %531 = vmatpush1.bf16.msra.mxu0 %v8959_v15  ;;  %v9601_v52 = vld [vmem:[#allocation2 + $0x68] sm:$0xff]  ;;  %v9603_v53 = vld [vmem:[#allocation2 + $0x70] sm:$0xff]  ;;  %v9625_v58 = vld [vmem:[#allocation2 + $0x98] sm:$0xff]  ;;  %s9285_s14 = sshll.u32 %s9379_s26, 4  ;;  %s9286_s14 = int_to_ptr.vmem [resolvable:$false] %s9285_s14 }
  0x7e   : > { %8089 = vmatpush3.bf16.msra.mxu1 %v8958_v14  ;;  %532 = vmatprep.subr.bf16.mxu0 %v8960_v16  ;;  %v9617_v56 = vld [vmem:[#allocation2 + $0x88] sm:$0xff]  ;;  %v9619_v57 = vld [vmem:[#allocation2 + $0x90] sm:$0xff]  ;;  %v9627_v59 = vld [vmem:[#allocation2 + $0xa0] sm:$0xff]  ;;  %p9283_p13 = pnand %p9282_p0, %p11992_p4  ;;  %s9287_s7 = scalar_lea.vmem %s9286_s14, 8192 }
  0x7f   : > { %8090 = vmatprep.subr.bf16.mxu1 %v8962_v17  ;;  %v9633_v60 = vld [vmem:[#allocation2 + $0xa8] sm:$0xff]  ;;  %v9635_v61 = vld [vmem:[#allocation2 + $0xb0] sm:$0xff]  ;;  %v9641_v62 = vld [vmem:[#allocation2 + $0xb8] sm:$0xff]  ;;  %p9288_p8 = scmp.lt.s32.totalorder %s11643_s25, %s9286_s14  ;;  %p9289_p10 = scmp.lt.s32.totalorder %s9287_s7, %s9281_s21 }
  0x80   : > { %v9643_v63 = vld [vmem:[#allocation2 + $0xc0] sm:$0xff]  ;;  %v9649_v1 = vld [vmem:[#allocation2 + $0xc8] sm:$0xff]  ;;  %v9651_v2 = vld [vmem:[#allocation2 + $0xd0] sm:$0xff]  ;;  %p9284_p1 = pneg %p9283_p13 }
  0x81   : > { %533 = vmatpush1.bf16.msra.mxu0 %v8963_v19  ;;  %v9657_v3 = vld [vmem:[#allocation2 + $0xd8] sm:$0xff]  ;;  %v9659_v4 = vld [vmem:[#allocation2 + $0xe0] sm:$0xff]  ;;  %v9665_v5 = vld [vmem:[#allocation2 + $0xe8] sm:$0xff]  ;;  %p9290_p11 = por %p9289_p10, %p9288_p8 }
  0x82   : > { %8091 = vmatpush3.bf16.msra.mxu1 %v8962_v17  ;;  %534 = vmatprep.subr.bf16.mxu0 %v8964_v20  ;;  %v9667_v6 = vld [vmem:[#allocation2 + $0xf0] sm:$0xff]  ;;  %v9673_v7 = vld [vmem:[#allocation2 + $0xf8] sm:$0xff]  ;;  %v9675_v8 = vld [vmem:[#allocation2 + $0x100] sm:$0xff] }
  0x83   : > { %8092 = vmatprep.subr.bf16.mxu1 %v8966_v21  ;;  %v9681_v9 = vld [vmem:[#allocation2 + $0x108] sm:$0xff]  ;;  %v9683_v10 = vld [vmem:[#allocation2 + $0x110] sm:$0xff]  ;;  %v9689_v11 = vld [vmem:[#allocation2 + $0x118] sm:$0xff]  ;;  %p9291_p2 = pnand %p9290_p11, %p9284_p1 }
  0x84   : > { %v9691_v12 = vld [vmem:[#allocation2 + $0x120] sm:$0xff]  ;;  %v9697_v13 = vld [vmem:[#allocation2 + $0x128] sm:$0xff]  ;;  %v8999_v17 = vld [vmem:[#allocation4 + $0x50] ss:$12 sps:$4 sm:$0xff]  }
  0x85   : > { %535 = vmatpush1.bf16.msra.mxu0 %v8967_v22  ;;  %v8996_v14 = vld [vmem:[#allocation4 + $0x8] ss:$12 sps:$4 sm:$0xff]   ;;  %v8997_v15 = vld [vmem:[#allocation4 + $0x20] ss:$12 sps:$4 sm:$0xff]   ;;  %v8998_v16 = vld [vmem:[#allocation4 + $0x38] ss:$12 sps:$4 sm:$0xff]  }
  0x86   : > { %8093 = vmatpush3.bf16.msra.mxu1 %v8966_v21  ;;  %536 = vmatprep.subr.bf16.mxu0 %v8968_v23  ;;  %v9000_v19 = vld [vmem:[#allocation4 + $0x68] ss:$12 sps:$4 sm:$0xff]   ;;  %v9001_v20 = vld [vmem:[#allocation4 + $0x80] ss:$12 sps:$4 sm:$0xff]   ;;  %v9005_v21 = vld [vmem:[#allocation4 + $0x184] ss:$12 sps:$4 sm:$0xff]  }
  0x87   : > { %8094 = vmatprep.subr.bf16.mxu1 %v8970_v24  ;;  %v9002_v22 = vld [vmem:[#allocation4 + $0x98] ss:$12 sps:$4 sm:$0xff]   ;;  %v9006_v23 = vld [vmem:[#allocation4 + $0xb0] ss:$12 sps:$4 sm:$0xff]  }
  0x89   : > { %537 = vmatpush1.bf16.msra.mxu0 %v8971_v25 }
  0x8a   : > { %8095 = vmatpush3.bf16.msra.mxu1 %v8970_v24  ;;  %1364 = vmatprep.subr.bf16.mxu0 %v8974_v26 }
  0x8b   : > { %8584 = vmatprep.subr.bf16.mxu1 %v8974_v26 }
  0x8c   : > { %555 = vmatmul.mubr.bf16.vlgmr.msra.gmra.mrb[0].mxu0 %v9558_v18 }
  0x8d   : > { %8097 = vmatmul.mubr.bf16.vlgmr.msra.gmra.mrb[0].mxu1 %v9561_v27  ;;  %1365 = vmatpush1.bf16.msra.mxu0 %v8972_v28 }
  0x8e   : > { %564 = vmatprep.mubr.bf16.mxu0 %v11706_v0  ;;  %8100 = vmatprep.mubr.bf16.mxu1 %v9563_v29 }
  0x8f   : > { %1366 = vmatprep.subr.bf16.mxu0 %v8977_v30  ;;  %8592 = vmatpush1.bf16.msra.mxu1 %v8972_v28 }
  0x90   : > { %8585 = vmatprep.subr.bf16.mxu1 %v8977_v30 }
  0x91   : > { %1367 = vmatpush1.bf16.msra.mxu0 %v8975_v31 }
  0x92   : > { %1368 = vmatprep.subr.bf16.mxu0 %v8980_v33 }
  0x93   : > { %8593 = vmatpush1.bf16.msra.mxu1 %v8975_v31 }
  0x94   : > { %565 = vmatmul.mubr.bf16.gmra.mrb[4].mxu0 %v9561_v27  ;;  %8586 = vmatprep.subr.bf16.mxu1 %v8980_v33 }
  0x95   : > { %8101 = vmatmul.mubr.bf16.gmra.mrb[4].mxu1 %v9569_v32  ;;  %574 = vmatprep.mubr.bf16.mxu0 %v11706_v0 }
  0x96   : > { %8104 = vmatprep.mubr.bf16.mxu1 %v9571_v34  ;;  %1369 = vmatpush1.bf16.msra.mxu0 %v8978_v35 }
  0x97   : > { %1370 = vmatprep.subr.bf16.mxu0 %v8983_v36  ;;  %8594 = vmatpush1.bf16.msra.mxu1 %v8978_v35 }
  0x98   : > { %8587 = vmatprep.subr.bf16.mxu1 %v8983_v36 }
  0x9a   : > { %1371 = vmatpush1.bf16.msra.mxu0 %v8981_v37 }
  0x9b   : > { %8595 = vmatpush1.bf16.msra.mxu1 %v8981_v37  ;;  %1372 = vmatprep.subr.bf16.mxu0 %v8986_v39 }
  0x9c   : > { %575 = vmatmul.mubr.bf16.gmra.mrb[8].mxu0 %v9563_v29  ;;  %8588 = vmatprep.subr.bf16.mxu1 %v8986_v39 }
  0x9d   : > { %8105 = vmatmul.mubr.bf16.gmra.mrb[8].mxu1 %v9577_v38  ;;  %584 = vmatprep.mubr.bf16.mxu0 %v11706_v0 }
  0x9e   : > { %8108 = vmatprep.mubr.bf16.mxu1 %v9579_v40  ;;  %1373 = vmatpush1.bf16.msra.mxu0 %v8984_v41 }
  0x9f   : > { %8596 = vmatpush1.bf16.msra.mxu1 %v8984_v41  ;;  %1374 = vmatprep.subr.bf16.mxu0 %v8989_v42 }
  0xa0   : > { %8589 = vmatprep.subr.bf16.mxu1 %v8989_v42 }
  0xa2   : > { %1375 = vmatpush1.bf16.msra.mxu0 %v8987_v43 }
  0xa3   : > { %8597 = vmatpush1.bf16.msra.mxu1 %v8987_v43  ;;  %1376 = vmatprep.subr.bf16.mxu0 %v8992_v45 }
  0xa4   : > { %585 = vmatmul.mubr.bf16.gmra.mrb[12].mxu0 %v9569_v32  ;;  %8590 = vmatprep.subr.bf16.mxu1 %v8992_v45 }
  0xa5   : > { %8109 = vmatmul.mubr.bf16.gmra.mrb[12].mxu1 %v9585_v44  ;;  %594 = vmatprep.mubr.bf16.mxu0 %v11706_v0 }
  0xa6   : > { %8112 = vmatprep.mubr.bf16.mxu1 %v9587_v46  ;;  %1377 = vmatpush1.bf16.msra.mxu0 %v8990_v47 }
  0xa7   : > { %8598 = vmatpush1.bf16.msra.mxu1 %v8990_v47  ;;  %1378 = vmatprep.subr.bf16.mxu0 %v8995_v48 }
  0xa8   : > { %8591 = vmatprep.subr.bf16.mxu1 %v8995_v48 }
  0xaa   : > { %1379 = vmatpush1.bf16.msra.mxu0 %v8993_v49 }
  0xab   : > { %8599 = vmatpush1.bf16.msra.mxu1 %v8993_v49  ;;  %2238 = vmatprep.subr.bf16.mxu0 %v9005_v21 }
  0xac   : > { %595 = vmatmul.mubr.bf16.gmra.mrb[16].mxu0 %v9571_v34  ;;  %8168 = vmatprep.subr.bf16.mxu1 %v8996_v14 }
  0xad   : > { %8113 = vmatmul.mubr.bf16.gmra.mrb[16].mxu1 %v9593_v50  ;;  %604 = vmatprep.mubr.bf16.mxu0 %v11706_v0 }
  0xae   : > { %8116 = vmatprep.mubr.bf16.mxu1 %v9595_v51 }
  0xb4   : > { %605 = vmatmul.mubr.bf16.gmra.mrb[20].mxu0 %v9577_v38 }
  0xb5   : > { %8117 = vmatmul.mubr.bf16.gmra.mrb[20].mxu1 %v9601_v52  ;;  %614 = vmatprep.mubr.bf16.mxu0 %v11706_v0 }
  0xb6   : > { %8120 = vmatprep.mubr.bf16.mxu1 %v9603_v53 }
  0xbc   : > { %615 = vmatmul.mubr.bf16.gmra.mrb[24].mxu0 %v9579_v40 }
  0xbd   : > { %8121 = vmatmul.mubr.bf16.gmra.mrb[24].mxu1 %v9609_v54  ;;  %624 = vmatprep.mubr.bf16.mxu0 %v11706_v0 }
  0xbe   : > { %8124 = vmatprep.mubr.bf16.mxu1 %v9611_v55 }
  0xc4   : > { %625 = vmatmul.mubr.bf16.gmra.mrb[28].mxu0 %v9585_v44 }
  0xc5   : > { %8125 = vmatmul.mubr.bf16.gmra.mrb[28].mxu1 %v9617_v56  ;;  %634 = vmatprep.mubr.bf16.mxu0 %v11706_v0 }
  0xc6   : > { %8128 = vmatprep.mubr.bf16.mxu1 %v9619_v57 }
  0xcc   : > { %635 = vmatmul.mubr.bf16.gmra.mrb[32].mxu0 %v9587_v46 }
  0xcd   : > { %8129 = vmatmul.mubr.bf16.gmra.mrb[32].mxu1 %v9625_v58  ;;  %644 = vmatprep.mubr.bf16.mxu0 %v11706_v0 }
  0xce   : > { %8132 = vmatprep.mubr.bf16.mxu1 %v9627_v59 }
  0xd4   : > { %645 = vmatmul.mubr.bf16.gmra.mrb[36].mxu0 %v9593_v50 }
  0xd5   : > { %8133 = vmatmul.mubr.bf16.gmra.mrb[36].mxu1 %v9633_v60  ;;  %654 = vmatprep.mubr.bf16.mxu0 %v11706_v0 }
  0xd6   : > { %8136 = vmatprep.mubr.bf16.mxu1 %v9635_v61 }
  0xdc   : > { %655 = vmatmul.mubr.bf16.gmra.mrb[40].mxu0 %v9595_v51 }
  0xdd   : > { %8137 = vmatmul.mubr.bf16.gmra.mrb[40].mxu1 %v9641_v62  ;;  %664 = vmatprep.mubr.bf16.mxu0 %v11706_v0 }
  0xde   : > { %8140 = vmatprep.mubr.bf16.mxu1 %v9643_v63 }
  0xe4   : > { %665 = vmatmul.mubr.bf16.gmra.mrb[44].mxu0 %v9601_v52 }
  0xe5   : > { %8141 = vmatmul.mubr.bf16.gmra.mrb[44].mxu1 %v9649_v1  ;;  %674 = vmatprep.mubr.bf16.mxu0 %v11706_v0 }
  0xe6   : > { %8144 = vmatprep.mubr.bf16.mxu1 %v9651_v2 }
  0xec   : > { %675 = vmatmul.mubr.bf16.gmra.mrb[48].mxu0 %v9603_v53 }
  0xed   : > { %8145 = vmatmul.mubr.bf16.gmra.mrb[48].mxu1 %v9657_v3  ;;  %684 = vmatprep.mubr.bf16.mxu0 %v11706_v0 }
  0xee   : > { %8148 = vmatprep.mubr.bf16.mxu1 %v9659_v4 }
  0xf4   : > { %685 = vmatmul.mubr.bf16.gmra.mrb[52].mxu0 %v9609_v54 }
  0xf5   : > { %8149 = vmatmul.mubr.bf16.gmra.mrb[52].mxu1 %v9665_v5  ;;  %694 = vmatprep.mubr.bf16.mxu0 %v11706_v0 }
  0xf6   : > { %8152 = vmatprep.mubr.bf16.mxu1 %v9667_v6 }
  0xfc   : > { %695 = vmatmul.mubr.bf16.gmra.mrb[56].mxu0 %v9611_v55 }
  0xfd   : > { %8153 = vmatmul.mubr.bf16.gmra.mrb[56].mxu1 %v9673_v7  ;;  %704 = vmatprep.mubr.bf16.mxu0 %v11706_v0 }
  0xfe   : > { %8156 = vmatprep.mubr.bf16.mxu1 %v9675_v8 }
 0x104   : > { %705 = vmatmul.mubr.bf16.gmra.mrb[60].mxu0 %v9617_v56 }
 0x105   : > { %8157 = vmatmul.mubr.bf16.gmra.mrb[60].mxu1 %v9681_v9  ;;  %714 = vmatprep.mubr.bf16.mxu0 %v11706_v0 }
 0x106   : > { %8160 = vmatprep.mubr.bf16.mxu1 %v9683_v10 }
 0x10c   : > { %715 = vmatmul.mubr.bf16.gmra.mrb[64].mxu0 %v9619_v57 }
 0x10d   : > { %8161 = vmatmul.mubr.bf16.gmra.mrb[64].mxu1 %v9689_v11  ;;  %724 = vmatprep.mubr.bf16.mxu0 %v11706_v0 }
 0x10e   : > { %8164 = vmatprep.mubr.bf16.mxu1 %v9691_v12 }
 0x114   : > { %725 = vmatmul.mubr.bf16.gmra.mrb[68].mxu0 %v9625_v58 }
 0x115   : > { %8165 = vmatmul.mubr.bf16.gmra.mrb[68].mxu1 %v9697_v13  ;;  %734 = vmatprep.mubr.bf16.mxu0 %v11706_v0 }
 0x116   : > { %1566 = vmatprep.mubr.bf16.mxu1 %v11706_v0 }
 0x11c   : > { %735 = vmatmul.mubr.bf16.gmra.mrb[72].mxu0 %v9627_v59 }
 0x11d   : > { %1567 = vmatmul.mubr.bf16.vlgmr.msra.gmra.mrb[72].mxu1 %v9617_v56  ;;  %744 = vmatprep.mubr.bf16.mxu0 %v11706_v0 }
 0x11e   : > { %1576 = vmatprep.mubr.bf16.mxu1 %v11706_v0  ;;  %8169 = vmatpush3.bf16.msra.mxu1 %v8996_v14 }
 0x11f   : > { %8170 = vmatprep.subr.bf16.mxu1 %v8997_v15 }
 0x122   : > { %8171 = vmatpush3.bf16.msra.mxu1 %v8997_v15 }
 0x123   : > { %8172 = vmatprep.subr.bf16.mxu1 %v8998_v16 }
 0x124   : > { %745 = vmatmul.mubr.bf16.gmra.mrb[76].mxu0 %v9633_v60 }
 0x125   : > { %1577 = vmatmul.mubr.bf16.gmra.mrb[76].mxu1 %v9619_v57  ;;  %754 = vmatprep.mubr.bf16.mxu0 %v11706_v0 }
 0x126   : > { %1586 = vmatprep.mubr.bf16.mxu1 %v11706_v0  ;;  %8173 = vmatpush3.bf16.msra.mxu1 %v8998_v16 }
 0x127   : > { %8174 = vmatprep.subr.bf16.mxu1 %v8999_v17 }
 0x12a   : > { %8175 = vmatpush3.bf16.msra.mxu1 %v8999_v17 }
 0x12b   : > { %8176 = vmatprep.subr.bf16.mxu1 %v9000_v19 }
 0x12c   : > { %755 = vmatmul.mubr.bf16.gmra.mrb[80].mxu0 %v9635_v61 }
 0x12d   : > { %1587 = vmatmul.mubr.bf16.gmra.mrb[80].mxu1 %v9625_v58  ;;  %764 = vmatprep.mubr.bf16.mxu0 %v11706_v0 }
 0x12e   : > { %1596 = vmatprep.mubr.bf16.mxu1 %v11706_v0  ;;  %8177 = vmatpush3.bf16.msra.mxu1 %v9000_v19 }
 0x12f   : > { %8178 = vmatprep.subr.bf16.mxu1 %v9001_v20 }
 0x132   : > { %8179 = vmatpush3.bf16.msra.mxu1 %v9001_v20 }
 0x133   : > { %8180 = vmatprep.subr.bf16.mxu1 %v9002_v22 }
 0x134   : > { %765 = vmatmul.mubr.bf16.gmra.mrb[84].mxu0 %v9641_v62 }
 0x135   : > { %1597 = vmatmul.mubr.bf16.gmra.mrb[84].mxu1 %v9627_v59  ;;  %774 = vmatprep.mubr.bf16.mxu0 %v11706_v0 }
 0x136   : > { %1606 = vmatprep.mubr.bf16.mxu1 %v11706_v0  ;;  %8181 = vmatpush3.bf16.msra.mxu1 %v9002_v22 }
 0x137   : > { %8182 = vmatprep.subr.bf16.mxu1 %v9006_v23 }
 0x13a   : > { %8183 = vmatpush3.bf16.msra.mxu1 %v9006_v23 }
 0x13c   : > { %775 = vmatmul.mubr.bf16.gmra.mrb[88].mxu0 %v9643_v63 }
 0x13d   : > { %1607 = vmatmul.mubr.bf16.gmra.mrb[88].mxu1 %v9633_v60  ;;  %784 = vmatprep.mubr.bf16.mxu0 %v11706_v0 }
 0x13e   : > { %1616 = vmatprep.mubr.bf16.mxu1 %v11706_v0 }
 0x144   : > { %785 = vmatmul.mubr.bf16.gmra.mrb[92].mxu0 %v9649_v1 }
 0x145   : > { %1617 = vmatmul.mubr.bf16.gmra.mrb[92].mxu1 %v9635_v61  ;;  %794 = vmatprep.mubr.bf16.mxu0 %v11706_v0 }
 0x146   : > { %1626 = vmatprep.mubr.bf16.mxu1 %v11706_v0 }
 0x14c   : > { %795 = vmatmul.mubr.bf16.gmra.mrb[96].mxu0 %v9651_v2 }
 0x14d   : > { %1627 = vmatmul.mubr.bf16.gmra.mrb[96].mxu1 %v9641_v62  ;;  %804 = vmatprep.mubr.bf16.mxu0 %v11706_v0 }
 0x14e   : > { %1636 = vmatprep.mubr.bf16.mxu1 %v11706_v0 }
 0x154   : > { %805 = vmatmul.mubr.bf16.gmra.mrb[100].mxu0 %v9657_v3 }
 0x155   : > { %1637 = vmatmul.mubr.bf16.gmra.mrb[100].mxu1 %v9643_v63  ;;  %814 = vmatprep.mubr.bf16.mxu0 %v11706_v0 }
 0x156   : > { %1646 = vmatprep.mubr.bf16.mxu1 %v11706_v0 }
 0x15c   : > { %815 = vmatmul.mubr.bf16.gmra.mrb[104].mxu0 %v9659_v4 }
 0x15d   : > { %1647 = vmatmul.mubr.bf16.gmra.mrb[104].mxu1 %v9649_v1  ;;  %824 = vmatprep.mubr.bf16.mxu0 %v11706_v0 }
 0x15e   : > { %1656 = vmatprep.mubr.bf16.mxu1 %v11706_v0 }
 0x15f   : > { %v556_v24 = vpop.f32.mrb[0].mxu0 }
 0x160   : > { %v8098_v25 = vpop.f32.mrb[0].mxu1  ;;  %v558_v26 = vpop.f32.mrb[1].mxu0 }
 0x161   : > { %v949_v28 = vpop.f32.mrb[1].mxu1  ;;  %v560_v30 = vpop.f32.mrb[2].mxu0 }
 0x162   : > { %v8099_v31 = vpop.f32.mrb[2].mxu1  ;;  %v562_v33 = vpop.f32.mrb[3].mxu0 }
 0x163   : > { %v952_v35 = vpop.f32.mrb[3].mxu1 }
 0x164   : > { %825 = vmatmul.mubr.bf16.gmra.mrb[108].mxu0 %v9665_v5 }
 0x165   : > { %1657 = vmatmul.mubr.bf16.gmra.mrb[108].mxu1 %v9651_v2  ;;  %834 = vmatprep.mubr.bf16.mxu0 %v11706_v0 }
 0x166   : > { %1666 = vmatprep.mubr.bf16.mxu1 %v11706_v0 }
 0x167   : > { %v566_v36 = vpop.f32.mrb[4].mxu0 }
 0x168   : > { %v568_v37 = vpop.f32.mrb[5].mxu0 }
 0x169   : > { %v570_v39 = vpop.f32.mrb[6].mxu0 }
 0x16a   : > { %v572_v41 = vpop.f32.mrb[7].mxu0 }
 0x16c   : > { %835 = vmatmul.mubr.bf16.gmra.mrb[112].mxu0 %v9667_v6 }
 0x16d   : > { %1667 = vmatmul.mubr.bf16.gmra.mrb[112].mxu1 %v9657_v3  ;;  %844 = vmatprep.mubr.bf16.mxu0 %v11706_v0 }
 0x16e   : > { %1676 = vmatprep.mubr.bf16.mxu1 %v11706_v0 }
 0x16f   : > { %v9747_v42 = vpop.f32.mrb[8].mxu0 }
 0x170   : > { %v578_v43 = vpop.f32.mrb[9].mxu0 }
 0x171   : > { %v9749_v45 = vpop.f32.mrb[10].mxu0 }
 0x172   : > { %v9751_v47 = vpop.f32.mrb[11].mxu0 }
 0x174   : > { %845 = vmatmul.mubr.bf16.gmra.mrb[116].mxu0 %v9673_v7 }
 0x175   : > { %1677 = vmatmul.mubr.bf16.gmra.mrb[116].mxu1 %v9659_v4  ;;  %854 = vmatprep.mubr.bf16.mxu0 %v11706_v0 }
 0x176   : > { %1686 = vmatprep.mubr.bf16.mxu1 %v11706_v0 }
 0x177   : > { %v9757_v48 = vpop.f32.mrb[12].mxu0 }
 0x178   : > { %v9759_v49 = vpop.f32.mrb[13].mxu0 }
 0x179   : > { %v590_v14 = vpop.f32.mrb[14].mxu0 }
 0x17a   : > { %v592_v15 = vpop.f32.mrb[15].mxu0  ;;  %v9028_v14 = vld [vmem:[#allocation4 + $0x188] ss:$12 sps:$4 sm:$0xff]  }
 0x17b   : > { %8256 = vmatprep.subr.bf16.mxu1 %v9028_v14 }
 0x17c   : > { %855 = vmatmul.mubr.bf16.gmra.mrb[120].mxu0 %v9675_v8 }
 0x17d   : > { %1687 = vmatmul.mubr.bf16.gmra.mrb[120].mxu1 %v9665_v5  ;;  %864 = vmatprep.mubr.bf16.mxu0 %v11706_v0 }
 0x17e   : > { %1696 = vmatprep.mubr.bf16.mxu1 %v11706_v0 }
 0x17f   : > { %v9765_v16 = vpop.f32.mrb[16].mxu0 }
 0x180   : > { %v598_v17 = vpop.f32.mrb[17].mxu0 }
 0x181   : > { %v9767_v19 = vpop.f32.mrb[18].mxu0 }
 0x182   : > { %v9769_v20 = vpop.f32.mrb[19].mxu0 }
 0x184   : > { %865 = vmatmul.mubr.bf16.gmra.mrb[124].mxu0 %v9681_v9 }
 0x185   : > { %1697 = vmatmul.mubr.bf16.gmra.mrb[124].mxu1 %v9667_v6  ;;  %874 = vmatprep.mubr.bf16.mxu0 %v11706_v0 }
 0x186   : > { %1706 = vmatprep.mubr.bf16.mxu1 %v11706_v0 }
 0x187   : > { %v9775_v21 = vpop.f32.mrb[20].mxu0 }
 0x188   : > { %v9777_v22 = vpop.f32.mrb[21].mxu0 }
 0x189   : > { %v610_v23 = vpop.f32.mrb[22].mxu0 }
 0x18a   : > { %v612_v24 = vpop.f32.mrb[23].mxu0  ;;  %v290_v23 = vld [vmem:[#allocation2] sm:$0xff] }
 0x18b   : > { %v9003_v24 = vld [vmem:[#allocation4 + $0x180] ss:$12 sps:$4 sm:$0xff]  }
 0x18c   : > { %875 = vmatmul.mubr.bf16.gmra.mrb[128].mxu0 %v9683_v10 }
 0x18d   : > { %1707 = vmatmul.mubr.bf16.gmra.mrb[128].mxu1 %v9673_v7  ;;  %884 = vmatprep.mubr.bf16.mxu0 %v11706_v0 }
 0x18e   : > { %1716 = vmatprep.mubr.bf16.mxu1 %v11706_v0 }
 0x18f   : > { %v9783_v25 = vpop.f32.mrb[24].mxu0 }
 0x190   : > { %v618_v26 = vpop.f32.mrb[25].mxu0 }
 0x191   : > { %v9785_v28 = vpop.f32.mrb[26].mxu0 }
 0x192   : > { %v9787_v30 = vpop.f32.mrb[27].mxu0 }
 0x194   : > { %885 = vmatmul.mubr.bf16.gmra.mrb[132].mxu0 %v9689_v11 }
 0x195   : > { %1717 = vmatmul.mubr.bf16.gmra.mrb[132].mxu1 %v9675_v8  ;;  %894 = vmatprep.mubr.bf16.mxu0 %v11706_v0 }
 0x196   : > { %1726 = vmatprep.mubr.bf16.mxu1 %v11706_v0 }
 0x197   : > { %v9793_v31 = vpop.f32.mrb[28].mxu0 }
 0x198   : > { %v9795_v33 = vpop.f32.mrb[29].mxu0 }
 0x199   : > { %v630_v35 = vpop.f32.mrb[30].mxu0 }
 0x19a   : > { %v632_v36 = vpop.f32.mrb[31].mxu0  ;;  %v9009_v35 = vld [vmem:[#allocation4 + $0x19c] ss:$12 sps:$4 sm:$0xff]  }
 0x19b   : > { %v9012_v36 = vld [vmem:[#allocation4 + $0x1b4] ss:$12 sps:$4 sm:$0xff]  }
 0x19c   : > { %895 = vmatmul.mubr.bf16.gmra.mrb[136].mxu0 %v9691_v12 }
 0x19d   : > { %1727 = vmatmul.mubr.bf16.gmra.mrb[136].mxu1 %v9681_v9  ;;  %904 = vmatprep.mubr.bf16.mxu0 %v11706_v0 }
 0x19e   : > { %1736 = vmatprep.mubr.bf16.mxu1 %v11706_v0 }
 0x19f   : > { %v9801_v37 = vpop.f32.mrb[32].mxu0 }
 0x1a0   : > { %11732 = vst [vmem:[#allocation21_spill] sm:$0xff] %v9801_v37  ;;  %v638_v39 = vpop.f32.mrb[33].mxu0  ;;  %v9029_v37 = vld [vmem:[#allocation4 + $0x1a0] ss:$12 sps:$4 sm:$0xff]  }
 0x1a1   : > { %v9803_v41 = vpop.f32.mrb[34].mxu0 }
 0x1a2   : > { %11733 = vst [vmem:[#allocation22_spill] sm:$0xff] %v9803_v41  ;;  %v9805_v43 = vpop.f32.mrb[35].mxu0  ;;  %v9015_v41 = vld [vmem:[#allocation4 + $0x1cc] ss:$12 sps:$4 sm:$0xff]  }
 0x1a3   : > { %11734 = vst [vmem:[#allocation23_spill] sm:$0xff] %v9805_v43 }
 0x1a4   : > { %905 = vmatmul.mubr.bf16.gmra.mrb[140].mxu0 %v9697_v13  ;;  %v9007_v13 = vld [vmem:[#allocation4 + $0x198] ss:$12 sps:$4 sm:$0xff]  }
 0x1a5   : > { %1737 = vmatmul.mubr.bf16.gmra.mrb[140].mxu1 %v9683_v10  ;;  %1396 = vmatprep.mubr.bf16.mxu0 %v11706_v0 }
 0x1a6   : > { %1746 = vmatprep.mubr.bf16.mxu1 %v11706_v0 }
 0x1a7   : > { %v9811_v12 = vpop.f32.mrb[36].mxu0 }
 0x1a8   : > { %11735 = vst [vmem:[#allocation24_spill] sm:$0xff] %v9811_v12  ;;  %v9813_v15 = vpop.f32.mrb[37].mxu0 }
 0x1a9   : > { %11736 = vst [vmem:[#allocation25_spill] sm:$0xff] %v9813_v15  ;;  %v650_v17 = vpop.f32.mrb[38].mxu0 }
 0x1aa   : > { %v652_v26 = vpop.f32.mrb[39].mxu0  ;;  %v291_v17 = vld [vmem:[#allocation2 + $0x8] sm:$0xff] }
 0x1ab   : > { %v9010_v26 = vld [vmem:[#allocation4 + $0x1b0] ss:$12 sps:$4 sm:$0xff]  }
 0x1ac   : > { %1397 = vmatmul.mubr.bf16.vlgmr.msra.gmra.mrb[144].mxu0 %v290_v23 }
 0x1ad   : > { %1747 = vmatmul.mubr.bf16.gmra.mrb[144].mxu1 %v9689_v11  ;;  %2239 = vmatpush1.bf16.msra.mxu0 %v9003_v24  ;;  %v9018_v24 = vld [vmem:[#allocation4 + $0x1e4] ss:$12 sps:$4 sm:$0xff]  }
 0x1ae   : > { %1406 = vmatprep.mubr.bf16.mxu0 %v11706_v0  ;;  %8184 = vmatprep.mubr.bf16.mxu1 %v290_v23  ;;  %v9013_v23 = vld [vmem:[#allocation4 + $0x1c8] ss:$12 sps:$4 sm:$0xff]  }
 0x1af   : > { %2240 = vmatprep.subr.bf16.mxu0 %v9009_v35  ;;  %v9817_v39 = vpop.f32.mrb[40].mxu0  ;;  %v9030_v35 = vld [vmem:[#allocation4 + $0x1b8] ss:$12 sps:$4 sm:$0xff]  }
 0x1b0   : > { %v658_v12 = vpop.f32.mrb[41].mxu0 }
 0x1b1   : > { %v9819_v43 = vpop.f32.mrb[42].mxu0  ;;  %2241 = vmatpush1.bf16.msra.mxu0 %v9007_v13 }
 0x1b2   : > { %11737 = vst [vmem:[#allocation26_spill] sm:$0xff] %v9819_v43  ;;  %v9821_v15 = vpop.f32.mrb[43].mxu0  ;;  %2242 = vmatprep.subr.bf16.mxu0 %v9012_v36  ;;  %v9016_v43 = vld [vmem:[#allocation4 + $0x1e0] ss:$12 sps:$4 sm:$0xff]  }
 0x1b3   : > { %11738 = vst [vmem:[#allocation27_spill] sm:$0xff] %v9821_v15 }
 0x1b4   : > { %1407 = vmatmul.mubr.bf16.gmra.mrb[148].mxu0 %v291_v17 }
 0x1b5   : > { %8185 = vmatmul.mubr.bf16.vlgmr.msra.gmra.mrb[148].mxu1 %v291_v17  ;;  %1416 = vmatprep.mubr.bf16.mxu0 %v11706_v0  ;;  %v9021_v17 = vld [vmem:[#allocation4 + $0x1fc] ss:$12 sps:$4 sm:$0xff]  }
 0x1b6   : > { %8188 = vmatprep.mubr.bf16.mxu1 %v9558_v18  ;;  %2243 = vmatpush1.bf16.msra.mxu0 %v9010_v26  ;;  %v9031_v18 = vld [vmem:[#allocation4 + $0x1d0] ss:$12 sps:$4 sm:$0xff]  }
 0x1b7   : > { %8257 = vmatpush3.bf16.msra.mxu1 %v9028_v14  ;;  %v9825_v12 = vpop.f32.mrb[44].mxu0  ;;  %2244 = vmatprep.subr.bf16.mxu0 %v9015_v41  ;;  %v9132_v26 = vld [vmem:[#allocation2 + $0x10] sm:$0xff]  ;;  %v9019_v41 = vld [vmem:[#allocation4 + $0x1f8] ss:$12 sps:$4 sm:$0xff]  }
 0x1b8   : > { %8258 = vmatprep.subr.bf16.mxu1 %v9029_v37  ;;  %v9827_v13 = vpop.f32.mrb[45].mxu0 }
 0x1b9   : > { %v670_v36 = vpop.f32.mrb[46].mxu0 }
 0x1ba   : > { %v672_v15 = vpop.f32.mrb[47].mxu0  ;;  %2245 = vmatpush1.bf16.msra.mxu0 %v9013_v23 }
 0x1bb   : > { %8259 = vmatpush3.bf16.msra.mxu1 %v9029_v37  ;;  %2246 = vmatprep.subr.bf16.mxu0 %v9018_v24  ;;  %v9024_v15 = vld [vmem:[#allocation4 + $0x214] ss:$12 sps:$4 sm:$0xff]  }
 0x1bc   : > { %8260 = vmatprep.subr.bf16.mxu1 %v9030_v35  ;;  %1417 = vmatmul.mubr.bf16.gmra.mrb[152].mxu0 %v9132_v26  ;;  %v9032_v37 = vld [vmem:[#allocation4 + $0x1e8] ss:$12 sps:$4 sm:$0xff]   ;;  %v9027_v26 = vld [vmem:[#allocation4 + $0x22c] ss:$12 sps:$4 sm:$0xff]  }
 0x1bd   : > { %8189 = vmatmul.mubr.bf16.gmra.mrb[4].mxu1 %v9561_v27  ;;  %1426 = vmatprep.mubr.bf16.mxu0 %v11706_v0  ;;  %v9022_v27 = vld [vmem:[#allocation4 + $0x210] ss:$12 sps:$4 sm:$0xff]  }
 0x1be   : > { %8192 = vmatprep.mubr.bf16.mxu1 %v9563_v29  ;;  %2247 = vmatpush1.bf16.msra.mxu0 %v9016_v43  ;;  %v9033_v29 = vld [vmem:[#allocation4 + $0x200] ss:$12 sps:$4 sm:$0xff]   ;;  %v9133_v43 = vld [vmem:[#allocation2 + $0x18] sm:$0xff] }
 0x1bf   : > { %8261 = vmatpush3.bf16.msra.mxu1 %v9030_v35  ;;  %v9832_v14 = vpop.f32.mrb[48].mxu0  ;;  %2248 = vmatprep.subr.bf16.mxu0 %v9021_v17  ;;  %v9025_v35 = vld [vmem:[#allocation4 + $0x228] ss:$12 sps:$4 sm:$0xff]  }
 0x1c0   : > { %11739 = vst [vmem:[#allocation28_spill] sm:$0xff] %v9832_v14  ;;  %8262 = vmatprep.subr.bf16.mxu1 %v9031_v18  ;;  %v678_v23 = vpop.f32.mrb[49].mxu0 }
 0x1c1   : > { %v9834_v24 = vpop.f32.mrb[50].mxu0 }
 0x1c2   : > { %11740 = vst [vmem:[#allocation29_spill] sm:$0xff] %v9834_v24  ;;  %v9836_v36 = vpop.f32.mrb[51].mxu0  ;;  %2249 = vmatpush1.bf16.msra.mxu0 %v9019_v41 }
 0x1c3   : > { %11741 = vst [vmem:[#allocation30_spill] sm:$0xff] %v9836_v36  ;;  %8263 = vmatpush3.bf16.msra.mxu1 %v9031_v18  ;;  %2250 = vmatprep.subr.bf16.mxu0 %v9024_v15  ;;  %v9034_v18 = vld [vmem:[#allocation4 + $0x218] ss:$12 sps:$4 sm:$0xff]  }
 0x1c4   : > { %8264 = vmatprep.subr.bf16.mxu1 %v9032_v37  ;;  %1427 = vmatmul.mubr.bf16.gmra.mrb[156].mxu0 %v9133_v43  ;;  %v9845_v43 = vld [vmem:[#allocation2 + $0x20] sm:$0xff] }
 0x1c5   : > { %8193 = vmatmul.mubr.bf16.gmra.mrb[8].mxu1 %v9569_v32  ;;  %1436 = vmatprep.mubr.bf16.mxu0 %v11706_v0  ;;  %v9035_v32 = vld [vmem:[#allocation4 + $0x230] ss:$12 sps:$4 sm:$0xff]  }
 0x1c6   : > { %8196 = vmatprep.mubr.bf16.mxu1 %v9571_v34  ;;  %2251 = vmatpush1.bf16.msra.mxu0 %v9022_v27 }
 0x1c7   : > { %8265 = vmatpush3.bf16.msra.mxu1 %v9032_v37  ;;  %v9841_v17 = vpop.f32.mrb[52].mxu0  ;;  %2252 = vmatprep.subr.bf16.mxu0 %v9027_v26 }
 0x1c8   : > { %11742 = vst [vmem:[#allocation31_spill] sm:$0xff] %v9841_v17  ;;  %8266 = vmatprep.subr.bf16.mxu1 %v9033_v29  ;;  %v9843_v41 = vpop.f32.mrb[53].mxu0  ;;  %v9883_v17 = vld [vmem:[#allocation2 + $0x40] sm:$0xff] }
 0x1c9   : > { %11743 = vst [vmem:[#allocation32_spill] sm:$0xff] %v9843_v41  ;;  %v690_v15 = vpop.f32.mrb[54].mxu0 }
 0x1ca   : > { %v692_v23 = vpop.f32.mrb[55].mxu0  ;;  %2253 = vmatpush1.bf16.msra.mxu0 %v9025_v35 }
 0x1cb   : > { %8267 = vmatpush3.bf16.msra.mxu1 %v9033_v29  ;;  %v9857_v29 = vld [vmem:[#allocation2 + $0x28] sm:$0xff]  ;;  %v9867_v23 = vld [vmem:[#allocation2 + $0x30] sm:$0xff] }
 0x1cc   : > { %8268 = vmatprep.subr.bf16.mxu1 %v9034_v18  ;;  %1437 = vmatmul.mubr.bf16.gmra.mrb[160].mxu0 %v9845_v43 }
 0x1cd   : > { %8197 = vmatmul.mubr.bf16.gmra.mrb[12].mxu1 %v9577_v38  ;;  %1446 = vmatprep.mubr.bf16.mxu0 %v11706_v0 }
 0x1ce   : > { %8200 = vmatprep.mubr.bf16.mxu1 %v9579_v40 }
 0x1cf   : > { %8269 = vmatpush3.bf16.msra.mxu1 %v9034_v18  ;;  %v9851_v34 = vpop.f32.mrb[56].mxu0 }
 0x1d0   : > { %11744 = vst [vmem:[#allocation33_spill] sm:$0xff] %v9851_v34  ;;  %8270 = vmatprep.subr.bf16.mxu1 %v9035_v32  ;;  %v698_v37 = vpop.f32.mrb[57].mxu0 }
 0x1d1   : > { %v9853_v27 = vpop.f32.mrb[58].mxu0 }
 0x1d2   : > { %11745 = vst [vmem:[#allocation34_spill] sm:$0xff] %v9853_v27  ;;  %v9855_v26 = vpop.f32.mrb[59].mxu0 }
 0x1d3   : > { %11746 = vst [vmem:[#allocation35_spill] sm:$0xff] %v9855_v26  ;;  %8271 = vmatpush3.bf16.msra.mxu1 %v9035_v32 }
 0x1d4   : > { %1447 = vmatmul.mubr.bf16.gmra.mrb[164].mxu0 %v9857_v29 }
 0x1d5   : > { %8201 = vmatmul.mubr.bf16.gmra.mrb[16].mxu1 %v9585_v44  ;;  %1456 = vmatprep.mubr.bf16.mxu0 %v11706_v0 }
 0x1d6   : > { %8204 = vmatprep.mubr.bf16.mxu1 %v9587_v46 }
 0x1d7   : > { %v9863_v40 = vpop.f32.mrb[60].mxu0 }
 0x1d8   : > { %11747 = vst [vmem:[#allocation36_spill] sm:$0xff] %v9863_v40  ;;  %v9865_v35 = vpop.f32.mrb[61].mxu0 }
 0x1d9   : > { %11748 = vst [vmem:[#allocation37_spill] sm:$0xff] %v9865_v35  ;;  %v710_v18 = vpop.f32.mrb[62].mxu0 }
 0x1da   : > { %v712_v15 = vpop.f32.mrb[63].mxu0 }
 0x1dc   : > { %1457 = vmatmul.mubr.bf16.gmra.mrb[168].mxu0 %v9867_v23 }
 0x1dd   : > { %8205 = vmatmul.mubr.bf16.gmra.mrb[20].mxu1 %v9593_v50  ;;  %1466 = vmatprep.mubr.bf16.mxu0 %v11706_v0 }
 0x1de   : > { %8208 = vmatprep.mubr.bf16.mxu1 %v9595_v51 }
 0x1df   : > { %v9873_v32 = vpop.f32.mrb[64].mxu0 }
 0x1e0   : > { %11749 = vst [vmem:[#allocation38_spill] sm:$0xff] %v9873_v32  ;;  %v718_v37 = vpop.f32.mrb[65].mxu0 }
 0x1e1   : > { %v9875_v26 = vpop.f32.mrb[66].mxu0 }
 0x1e2   : > { %11750 = vst [vmem:[#allocation39_spill] sm:$0xff] %v9875_v26  ;;  %v9877_v40 = vpop.f32.mrb[67].mxu0 }
 0x1e3   : > { %11751 = vst [vmem:[#allocation40_spill] sm:$0xff] %v9877_v40 }
 0x1e4   : > { %1467 = vmatmul.mubr.bf16.gmra.mrb[172].mxu0 %v9577_v38 }
 0x1e5   : > { %8209 = vmatmul.mubr.bf16.gmra.mrb[24].mxu1 %v9601_v52  ;;  %1476 = vmatprep.mubr.bf16.mxu0 %v11706_v0 }
 0x1e6   : > { %8212 = vmatprep.mubr.bf16.mxu1 %v9603_v53 }
 0x1e7   : > { %v726_v18 = vpop.f32.mrb[68].mxu0 }
 0x1e8   : > { %v8166_v15 = vpop.f32.mrb[68].mxu1  ;;  %v728_v35 = vpop.f32.mrb[69].mxu0 }
 0x1e9   : > { %v1221_v27 = vpop.f32.mrb[69].mxu1  ;;  %v730_v34 = vpop.f32.mrb[70].mxu0 }
 0x1ea   : > { %v8167_v41 = vpop.f32.mrb[70].mxu1  ;;  %v732_v32 = vpop.f32.mrb[71].mxu0 }
 0x1eb   : > { %v1224_v37 = vpop.f32.mrb[71].mxu1 }
 0x1ec   : > { %1477 = vmatmul.mubr.bf16.gmra.mrb[176].mxu0 %v9883_v17 }
 0x1ed   : > { %8213 = vmatmul.mubr.bf16.gmra.mrb[28].mxu1 %v9609_v54  ;;  %1486 = vmatprep.mubr.bf16.mxu0 %v11706_v0 }
 0x1ee   : > { %8216 = vmatprep.mubr.bf16.mxu1 %v9611_v55 }
 0x1ef   : > { %v736_v38 = vpop.f32.mrb[72].mxu0 }
 0x1f0   : > { %v1568_v40 = vpop.f32.mrb[72].mxu1  ;;  %v738_v15 = vpop.f32.mrb[73].mxu0 }
 0x1f1   : > { %v9889_v26 = vadd.f32 %v1568_v40, %v726_v18  ;;  %v1570_v27 = vpop.f32.mrb[73].mxu1  ;;  %v740_v41 = vpop.f32.mrb[74].mxu0 }
 0x1f2   : > { %v9891_v34 = vadd.f32 %v1570_v27, %v728_v35  ;;  %v1572_v32 = vpop.f32.mrb[74].mxu1  ;;  %v742_v37 = vpop.f32.mrb[75].mxu0 }
 0x1f3   : > { %11752 = vst [vmem:[#allocation41_spill] sm:$0xff] %v9889_v26  ;;  %v1574_v36 = vpop.f32.mrb[75].mxu1 }
 0x1f4   : > { %11753 = vst [vmem:[#allocation42_spill] sm:$0xff] %v9891_v34  ;;  %1487 = vmatmul.mubr.bf16.gmra.mrb[180].mxu0 %v9585_v44 }
 0x1f5   : > { %8217 = vmatmul.mubr.bf16.gmra.mrb[32].mxu1 %v9617_v56  ;;  %1496 = vmatprep.mubr.bf16.mxu0 %v11706_v0 }
 0x1f6   : > { %8220 = vmatprep.mubr.bf16.mxu1 %v9619_v57 }
 0x1f7   : > { %v746_v24 = vpop.f32.mrb[76].mxu0 }
 0x1f8   : > { %v1578_v14 = vpop.f32.mrb[76].mxu1  ;;  %v748_v18 = vpop.f32.mrb[77].mxu0 }
 0x1f9   : > { %v9897_v40 = vadd.f32 %v1578_v14, %v736_v38  ;;  %v1580_v15 = vpop.f32.mrb[77].mxu1  ;;  %v750_v35 = vpop.f32.mrb[78].mxu0 }
 0x1fa   : > { %v1582_v27 = vpop.f32.mrb[78].mxu1  ;;  %v752_v32 = vpop.f32.mrb[79].mxu0 }
 0x1fb   : > { %v9899_v34 = vadd.f32 %v1582_v27, %v740_v41  ;;  %v1584_v36 = vpop.f32.mrb[79].mxu1 }
 0x1fc   : > { %v9901_v26 = vadd.f32 %v1584_v36, %v742_v37  ;;  %1497 = vmatmul.mubr.bf16.gmra.mrb[184].mxu0 %v9587_v46 }
 0x1fd   : > { %8221 = vmatmul.mubr.bf16.gmra.mrb[36].mxu1 %v9625_v58  ;;  %1506 = vmatprep.mubr.bf16.mxu0 %v11706_v0 }
 0x1fe   : > { %11754 = vst [vmem:[#allocation43_spill] sm:$0xff] %v9901_v26  ;;  %8224 = vmatprep.mubr.bf16.mxu1 %v9627_v59 }
 0x1ff   : > { %v756_v44 = vpop.f32.mrb[80].mxu0 }
 0x200   : > { %v1588_v56 = vpop.f32.mrb[80].mxu1  ;;  %v758_v14 = vpop.f32.mrb[81].mxu0 }
 0x201   : > { %v9907_v57 = vadd.f32 %v1588_v56, %v746_v24  ;;  %v1590_v38 = vpop.f32.mrb[81].mxu1  ;;  %v760_v15 = vpop.f32.mrb[82].mxu0 }
 0x202   : > { %v9909_v41 = vadd.f32 %v1590_v38, %v748_v18  ;;  %v1592_v35 = vpop.f32.mrb[82].mxu1  ;;  %v762_v37 = vpop.f32.mrb[83].mxu0 }
 0x203   : > { %11755 = vst [vmem:[#allocation44_spill] sm:$0xff] %v9907_v57  ;;  %v1594_v27 = vpop.f32.mrb[83].mxu1 }
 0x204   : > { %11756 = vst [vmem:[#allocation45_spill] sm:$0xff] %v9909_v41  ;;  %1507 = vmatmul.mubr.bf16.gmra.mrb[188].mxu0 %v9593_v50 }
 0x205   : > { %8225 = vmatmul.mubr.bf16.gmra.mrb[40].mxu1 %v9633_v60  ;;  %1516 = vmatprep.mubr.bf16.mxu0 %v11706_v0 }
 0x206   : > { %8228 = vmatprep.mubr.bf16.mxu1 %v9635_v61 }
 0x207   : > { %v766_v46 = vpop.f32.mrb[84].mxu0 }
 0x208   : > { %v1598_v58 = vpop.f32.mrb[84].mxu1  ;;  %v768_v24 = vpop.f32.mrb[85].mxu0 }
 0x209   : > { %v9915_v59 = vadd.f32 %v1598_v58, %v756_v44  ;;  %v1600_v32 = vpop.f32.mrb[85].mxu1  ;;  %v770_v18 = vpop.f32.mrb[86].mxu0 }
 0x20a   : > { %v1602_v36 = vpop.f32.mrb[86].mxu1  ;;  %v772_v14 = vpop.f32.mrb[87].mxu0 }
 0x20b   : > { %11757 = vst [vmem:[#allocation46_spill] sm:$0xff] %v9915_v59  ;;  %v9917_v56 = vadd.f32 %v1602_v36, %v760_v15  ;;  %v1604_v38 = vpop.f32.mrb[87].mxu1  ;;  %v11811_v59 = vld [vmem:[#allocation39_spill] sm:$0xff] }
 0x20c   : > { %v9919_v35 = vadd.f32 %v1604_v38, %v762_v37  ;;  %1517 = vmatmul.mubr.bf16.gmra.mrb[192].mxu0 %v9595_v51 }
 0x20d   : > { %11758 = vst [vmem:[#allocation47_spill] sm:$0xff] %v9917_v56  ;;  %8229 = vmatmul.mubr.bf16.gmra.mrb[44].mxu1 %v9641_v62  ;;  %1526 = vmatprep.mubr.bf16.mxu0 %v11706_v0 }
 0x20e   : > { %11759 = vst [vmem:[#allocation48_spill] sm:$0xff] %v9919_v35  ;;  %8232 = vmatprep.mubr.bf16.mxu1 %v9643_v63 }
 0x20f   : > { %v776_v50 = vpop.f32.mrb[88].mxu0 }
 0x210   : > { %v1608_v60 = vpop.f32.mrb[88].mxu1  ;;  %v778_v44 = vpop.f32.mrb[89].mxu0 }
 0x211   : > { %v9925_v61 = vadd.f32 %v1608_v60, %v766_v46  ;;  %v1610_v27 = vpop.f32.mrb[89].mxu1  ;;  %v780_v58 = vpop.f32.mrb[90].mxu0 }
 0x212   : > { %v9927_v15 = vadd.f32 %v1610_v27, %v768_v24  ;;  %v1612_v32 = vpop.f32.mrb[90].mxu1  ;;  %v782_v37 = vpop.f32.mrb[91].mxu0 }
 0x213   : > { %11760 = vst [vmem:[#allocation49_spill] sm:$0xff] %v9925_v61  ;;  %v1614_v18 = vpop.f32.mrb[91].mxu1  ;;  %v11806_v61 = vld [vmem:[#allocation34_spill] sm:$0xff] }
 0x214   : > { %11761 = vst [vmem:[#allocation50_spill] sm:$0xff] %v9927_v15  ;;  %1527 = vmatmul.mubr.bf16.gmra.mrb[196].mxu0 %v9601_v52 }
 0x215   : > { %8233 = vmatmul.mubr.bf16.gmra.mrb[48].mxu1 %v9649_v1  ;;  %1536 = vmatprep.mubr.bf16.mxu0 %v11706_v0 }
 0x216   : > { %8236 = vmatprep.mubr.bf16.mxu1 %v9651_v2 }
 0x217   : > { %v786_v51 = vpop.f32.mrb[92].mxu0 }
 0x218   : > { %v1618_v62 = vpop.f32.mrb[92].mxu1  ;;  %v788_v46 = vpop.f32.mrb[93].mxu0 }
 0x219   : > { %v9933_v63 = vadd.f32 %v1618_v62, %v776_v50  ;;  %v1620_v36 = vpop.f32.mrb[93].mxu1  ;;  %v790_v24 = vpop.f32.mrb[94].mxu0 }
 0x21a   : > { %v1622_v14 = vpop.f32.mrb[94].mxu1  ;;  %v792_v60 = vpop.f32.mrb[95].mxu0 }
 0x21b   : > { %11762 = vst [vmem:[#allocation51_spill] sm:$0xff] %v9933_v63  ;;  %v9935_v38 = vadd.f32 %v1622_v14, %v780_v58  ;;  %v1624_v44 = vpop.f32.mrb[95].mxu1 }
 0x21c   : > { %v9937_v27 = vadd.f32 %v1624_v44, %v782_v37  ;;  %1537 = vmatmul.mubr.bf16.gmra.mrb[200].mxu0 %v9603_v53 }
 0x21d   : > { %11763 = vst [vmem:[#allocation52_spill] sm:$0xff] %v9935_v38  ;;  %8237 = vmatmul.mubr.bf16.gmra.mrb[52].mxu1 %v9657_v3  ;;  %1546 = vmatprep.mubr.bf16.mxu0 %v11706_v0  ;;  %v9062_v38 = vld [vmem:[#allocation7 + $0x150] ss:$12 sps:$4 sm:$0xff]  }
 0x21e   : > { %11764 = vst [vmem:[#allocation53_spill] sm:$0xff] %v9937_v27  ;;  %8240 = vmatprep.mubr.bf16.mxu1 %v9659_v4  ;;  %v9064_v27 = vld [vmem:[#allocation7 + $0x154] ss:$12 sps:$4 sm:$0xff]  }
 0x21f   : > { %v796_v52 = vpop.f32.mrb[96].mxu0 }
 0x220   : > { %v1628_v1 = vpop.f32.mrb[96].mxu1  ;;  %v798_v50 = vpop.f32.mrb[97].mxu0 }
 0x221   : > { %v9943_v2 = vadd.f32 %v1628_v1, %v786_v51  ;;  %v1630_v32 = vpop.f32.mrb[97].mxu1  ;;  %v800_v18 = vpop.f32.mrb[98].mxu0 }
 0x222   : > { %v9945_v58 = vadd.f32 %v1630_v32, %v788_v46  ;;  %v1632_v62 = vpop.f32.mrb[98].mxu1  ;;  %v802_v37 = vpop.f32.mrb[99].mxu0 }
 0x223   : > { %11765 = vst [vmem:[#allocation54_spill] sm:$0xff] %v9943_v2  ;;  %v1634_v36 = vpop.f32.mrb[99].mxu1 }
 0x224   : > { %11766 = vst [vmem:[#allocation55_spill] sm:$0xff] %v9945_v58  ;;  %1547 = vmatmul.mubr.bf16.gmra.mrb[204].mxu0 %v9609_v54 }
 0x225   : > { %8241 = vmatmul.mubr.bf16.gmra.mrb[56].mxu1 %v9665_v5  ;;  %1556 = vmatprep.mubr.bf16.mxu0 %v11706_v0 }
 0x226   : > { %8244 = vmatprep.mubr.bf16.mxu1 %v9667_v6 }
 0x227   : > { %v806_v53 = vpop.f32.mrb[100].mxu0 }
 0x228   : > { %v1638_v3 = vpop.f32.mrb[100].mxu1  ;;  %v808_v51 = vpop.f32.mrb[101].mxu0 }
 0x229   : > { %v9951_v4 = vadd.f32 %v1638_v3, %v796_v52  ;;  %v1640_v24 = vpop.f32.mrb[101].mxu1  ;;  %v810_v46 = vpop.f32.mrb[102].mxu0 }
 0x22a   : > { %v1642_v14 = vpop.f32.mrb[102].mxu1  ;;  %v812_v44 = vpop.f32.mrb[103].mxu0 }
 0x22b   : > { %11767 = vst [vmem:[#allocation56_spill] sm:$0xff] %v9951_v4  ;;  %v9953_v60 = vadd.f32 %v1642_v14, %v800_v18  ;;  %v1644_v1 = vpop.f32.mrb[103].mxu1  ;;  %v11795_v4 = vld [vmem:[#allocation23_spill] sm:$0xff] }
 0x22c   : > { %v9955_v50 = vadd.f32 %v1644_v1, %v802_v37  ;;  %1557 = vmatmul.mubr.bf16.gmra.mrb[208].mxu0 %v9611_v55 }
 0x22d   : > { %11768 = vst [vmem:[#allocation57_spill] sm:$0xff] %v9953_v60  ;;  %8245 = vmatmul.mubr.bf16.gmra.mrb[60].mxu1 %v9673_v7  ;;  %2270 = vmatprep.mubr.bf16.mxu0 %v11706_v0  ;;  %v9058_v60 = vld [vmem:[#allocation7 + $0x124] ss:$12 sps:$4 sm:$0xff]  }
 0x22e   : > { %11769 = vst [vmem:[#allocation58_spill] sm:$0xff] %v9955_v50  ;;  %8248 = vmatprep.mubr.bf16.mxu1 %v9675_v8  ;;  %v10154_v50 = vld [vmem:[#allocation2 + $0x130] sm:$0xff] }
 0x22f   : > { %v816_v54 = vpop.f32.mrb[104].mxu0 }
 0x230   : > { %v1648_v5 = vpop.f32.mrb[104].mxu1  ;;  %v818_v52 = vpop.f32.mrb[105].mxu0 }
 0x231   : > { %v9961_v6 = vadd.f32 %v1648_v5, %v806_v53  ;;  %v1650_v32 = vpop.f32.mrb[105].mxu1  ;;  %v820_v62 = vpop.f32.mrb[106].mxu0 }
 0x232   : > { %v9963_v18 = vadd.f32 %v1650_v32, %v808_v51  ;;  %v1652_v36 = vpop.f32.mrb[106].mxu1  ;;  %v822_v37 = vpop.f32.mrb[107].mxu0 }
 0x233   : > { %11770 = vst [vmem:[#allocation59_spill] sm:$0xff] %v9961_v6  ;;  %v1654_v3 = vpop.f32.mrb[107].mxu1 }
 0x234   : > { %11771 = vst [vmem:[#allocation60_spill] sm:$0xff] %v9963_v18  ;;  %2271 = vmatmul.mubr.bf16.vlgmr.msra.gmra.mrb[212].mxu0 %v9845_v43 }
 0x235   : > { %8249 = vmatmul.mubr.bf16.gmra.mrb[64].mxu1 %v9681_v9  ;;  %2280 = vmatprep.mubr.bf16.mxu0 %v11706_v0 }
 0x236   : > { %8252 = vmatprep.mubr.bf16.mxu1 %v9683_v10 }
 0x237   : > { %v826_v55 = vpop.f32.mrb[108].mxu0 }
 0x238   : > { %v1658_v7 = vpop.f32.mrb[108].mxu1  ;;  %v828_v53 = vpop.f32.mrb[109].mxu0 }
 0x239   : > { %v9969_v8 = vadd.f32 %v1658_v7, %v816_v54  ;;  %v1660_v24 = vpop.f32.mrb[109].mxu1  ;;  %v830_v51 = vpop.f32.mrb[110].mxu0 }
 0x23a   : > { %v1662_v46 = vpop.f32.mrb[110].mxu1  ;;  %v832_v44 = vpop.f32.mrb[111].mxu0 }
 0x23b   : > { %11772 = vst [vmem:[#allocation61_spill] sm:$0xff] %v9969_v8  ;;  %v9971_v14 = vadd.f32 %v1662_v46, %v820_v62  ;;  %v1664_v1 = vpop.f32.mrb[111].mxu1  ;;  %v11794_v8 = vld [vmem:[#allocation22_spill] sm:$0xff] }
 0x23c   : > { %v9973_v5 = vadd.f32 %v1664_v1, %v822_v37  ;;  %2281 = vmatmul.mubr.bf16.gmra.mrb[216].mxu0 %v9857_v29 }
 0x23d   : > { %11773 = vst [vmem:[#allocation62_spill] sm:$0xff] %v9971_v14  ;;  %8253 = vmatmul.mubr.bf16.gmra.mrb[152].mxu1 %v9689_v11  ;;  %2290 = vmatprep.mubr.bf16.mxu0 %v11706_v0  ;;  %v10110_v14 = vld [vmem:[#allocation2 + $0xf8] sm:$0xff] }
 0x23e   : > { %11774 = vst [vmem:[#allocation63_spill] sm:$0xff] %v9973_v5  ;;  %8272 = vmatprep.mubr.bf16.mxu1 %v9845_v43  ;;  %v9048_v5 = vld [vmem:[#allocation7 + $0xdc] ss:$12 sps:$4 sm:$0xff]  }
 0x23f   : > { %v836_v9 = vpop.f32.mrb[112].mxu0 }
 0x240   : > { %v1668_v10 = vpop.f32.mrb[112].mxu1  ;;  %v838_v52 = vpop.f32.mrb[113].mxu0 }
 0x241   : > { %v9979_v54 = vadd.f32 %v1668_v10, %v826_v55  ;;  %v1670_v32 = vpop.f32.mrb[113].mxu1  ;;  %v840_v36 = vpop.f32.mrb[114].mxu0 }
 0x242   : > { %v9981_v62 = vadd.f32 %v1670_v32, %v828_v53  ;;  %v1672_v3 = vpop.f32.mrb[114].mxu1  ;;  %v842_v37 = vpop.f32.mrb[115].mxu0  ;;  %v9138_v32 = vld [vmem:[#allocation2 + $0x38] sm:$0xff] }
 0x243   : > { %11775 = vst [vmem:[#allocation64_spill] sm:$0xff] %v9979_v54  ;;  %v1674_v7 = vpop.f32.mrb[115].mxu1  ;;  %v9046_v54 = vld [vmem:[#allocation7 + $0xd8] ss:$12 sps:$4 sm:$0xff]  }
 0x244   : > { %11776 = vst [vmem:[#allocation65_spill] sm:$0xff] %v9981_v62  ;;  %2291 = vmatmul.mubr.bf16.gmra.mrb[220].mxu0 %v9867_v23 }
 0x245   : > { %8273 = vmatmul.mubr.bf16.vlgmr.msra.gmra.mrb[156].mxu1 %v9857_v29  ;;  %2300 = vmatprep.mubr.bf16.mxu0 %v11706_v0 }
 0x246   : > { %8276 = vmatprep.mubr.bf16.mxu1 %v9867_v23 }
 0x247   : > { %v846_v11 = vpop.f32.mrb[116].mxu0 }
 0x248   : > { %v1678_v43 = vpop.f32.mrb[116].mxu1  ;;  %v848_v24 = vpop.f32.mrb[117].mxu0 }
 0x249   : > { %v9987_v55 = vadd.f32 %v1678_v43, %v836_v9  ;;  %v1680_v51 = vpop.f32.mrb[117].mxu1  ;;  %v850_v53 = vpop.f32.mrb[118].mxu0 }
 0x24a   : > { %v1682_v46 = vpop.f32.mrb[118].mxu1  ;;  %v852_v1 = vpop.f32.mrb[119].mxu0 }
 0x24b   : > { %11777 = vst [vmem:[#allocation66_spill] sm:$0xff] %v9987_v55  ;;  %v9989_v44 = vadd.f32 %v1682_v46, %v840_v36  ;;  %v1684_v10 = vpop.f32.mrb[119].mxu1  ;;  %v9139_v46 = vld [vmem:[#allocation2 + $0x48] sm:$0xff]  ;;  %v9140_v1 = vld [vmem:[#allocation2 + $0x50] sm:$0xff] }
 0x24c   : > { %v9991_v52 = vadd.f32 %v1684_v10, %v842_v37  ;;  %2301 = vmatmul.mubr.bf16.gmra.mrb[224].mxu0 %v9138_v32 }
 0x24d   : > { %11778 = vst [vmem:[#allocation67_spill] sm:$0xff] %v9989_v44  ;;  %8277 = vmatmul.mubr.bf16.gmra.mrb[4].mxu1 %v9138_v32  ;;  %2310 = vmatprep.mubr.bf16.mxu0 %v11706_v0 }
 0x24e   : > { %11779 = vst [vmem:[#allocation68_spill] sm:$0xff] %v9991_v52  ;;  %8280 = vmatprep.mubr.bf16.mxu1 %v9883_v17  ;;  %v9142_v52 = vld [vmem:[#allocation2 + $0x60] sm:$0xff] }
 0x24f   : > { %v856_v29 = vpop.f32.mrb[120].mxu0 }
 0x250   : > { %v1688_v23 = vpop.f32.mrb[120].mxu1  ;;  %v858_v3 = vpop.f32.mrb[121].mxu0 }
 0x251   : > { %v9995_v9 = vadd.f32 %v1688_v23, %v846_v11  ;;  %v1690_v7 = vpop.f32.mrb[121].mxu1  ;;  %v860_v36 = vpop.f32.mrb[122].mxu0 }
 0x252   : > { %v9997_v43 = vadd.f32 %v1690_v7, %v848_v24  ;;  %v1692_v51 = vpop.f32.mrb[122].mxu1  ;;  %v862_v53 = vpop.f32.mrb[123].mxu0 }
 0x253   : > { %11780 = vst [vmem:[#allocation69_spill] sm:$0xff] %v9995_v9  ;;  %v1694_v37 = vpop.f32.mrb[123].mxu1 }
 0x254   : > { %11781 = vst [vmem:[#allocation70_spill] sm:$0xff] %v9997_v43  ;;  %2311 = vmatmul.mubr.bf16.gmra.mrb[228].mxu0 %v9883_v17  ;;  %v9141_v17 = vld [vmem:[#allocation2 + $0x58] sm:$0xff] }
 0x255   : > { %8281 = vmatmul.mubr.bf16.gmra.mrb[8].mxu1 %v9139_v46  ;;  %2320 = vmatprep.mubr.bf16.mxu0 %v11706_v0 }
 0x256   : > { %8284 = vmatprep.mubr.bf16.mxu1 %v9140_v1 }
 0x257   : > { %v866_v10 = vpop.f32.mrb[124].mxu0 }
 0x258   : > { %v1698_v32 = vpop.f32.mrb[124].mxu1  ;;  %v868_v23 = vpop.f32.mrb[125].mxu0 }
 0x259   : > { %v10001_v11 = vadd.f32 %v1698_v32, %v856_v29  ;;  %v1700_v3 = vpop.f32.mrb[125].mxu1  ;;  %v870_v24 = vpop.f32.mrb[126].mxu0 }
 0x25a   : > { %v1702_v7 = vpop.f32.mrb[126].mxu1  ;;  %v872_v51 = vpop.f32.mrb[127].mxu0 }
 0x25b   : > { %11782 = vst [vmem:[#allocation71_spill] sm:$0xff] %v10001_v11  ;;  %v10003_v43 = vadd.f32 %v1702_v7, %v860_v36  ;;  %v1704_v37 = vpop.f32.mrb[127].mxu1 }
 0x25c   : > { %v10005_v9 = vadd.f32 %v1704_v37, %v862_v53  ;;  %2321 = vmatmul.mubr.bf16.gmra.mrb[232].mxu0 %v9139_v46  ;;  %v9143_v46 = vld [vmem:[#allocation2 + $0x68] sm:$0xff]  ;;  %v9144_v37 = vld [vmem:[#allocation2 + $0x70] sm:$0xff] }
 0x25d   : > { %11783 = vst [vmem:[#allocation72_spill] sm:$0xff] %v10003_v43  ;;  %8285 = vmatmul.mubr.bf16.gmra.mrb[12].mxu1 %v9141_v17  ;;  %2330 = vmatprep.mubr.bf16.mxu0 %v11706_v0 }
 0x25e   : > { %11784 = vst [vmem:[#allocation73_spill] sm:$0xff] %v10005_v9  ;;  %8288 = vmatprep.mubr.bf16.mxu1 %v9142_v52 }
 0x25f   : > { %v876_v44 = vpop.f32.mrb[128].mxu0 }
 0x260   : > { %v1708_v29 = vpop.f32.mrb[128].mxu1  ;;  %v878_v3 = vpop.f32.mrb[129].mxu0 }
 0x261   : > { %v10008_v32 = vadd.f32 %v1708_v29, %v866_v10  ;;  %v1710_v24 = vpop.f32.mrb[129].mxu1  ;;  %v880_v36 = vpop.f32.mrb[130].mxu0 }
 0x262   : > { %v10010_v11 = vadd.f32 %v1710_v24, %v868_v23  ;;  %v1712_v7 = vpop.f32.mrb[130].mxu1  ;;  %v882_v51 = vpop.f32.mrb[131].mxu0 }
 0x263   : > { %11785 = vst [vmem:[#allocation74_spill] sm:$0xff] %v10008_v32  ;;  %v1714_v53 = vpop.f32.mrb[131].mxu1  ;;  %v10020_v32 = vld [vmem:[#allocation2 + $0x80] sm:$0xff] }
 0x264   : > { %11786 = vst [vmem:[#allocation75_spill] sm:$0xff] %v10010_v11  ;;  %2331 = vmatmul.mubr.bf16.gmra.mrb[236].mxu0 %v9140_v1  ;;  %v9145_v1 = vld [vmem:[#allocation2 + $0x78] sm:$0xff] }
 0x265   : > { %8289 = vmatmul.mubr.bf16.gmra.mrb[16].mxu1 %v9143_v46  ;;  %2340 = vmatprep.mubr.bf16.mxu0 %v11706_v0 }
 0x266   : > { %8292 = vmatprep.mubr.bf16.mxu1 %v9144_v37 }
 0x267   : > { %v886_v9 = vpop.f32.mrb[132].mxu0 }
 0x268   : > { %v1718_v43 = vpop.f32.mrb[132].mxu1  ;;  %v888_v10 = vpop.f32.mrb[133].mxu0 }
 0x269   : > { %v10013_v55 = vadd.f32 %v1718_v43, %v876_v44  ;;  %v1720_v29 = vpop.f32.mrb[133].mxu1  ;;  %v890_v3 = vpop.f32.mrb[134].mxu0 }
 0x26a   : > { %v1722_v23 = vpop.f32.mrb[134].mxu1  ;;  %v892_v7 = vpop.f32.mrb[135].mxu0 }
 0x26b   : > { %11787 = vst [vmem:[#allocation76_spill] sm:$0xff] %v10013_v55  ;;  %v10015_v24 = vadd.f32 %v1722_v23, %v880_v36  ;;  %v1724_v11 = vpop.f32.mrb[135].mxu1  ;;  %v10052_v55 = vld [vmem:[#allocation2 + $0xc0] sm:$0xff] }
 0x26c   : > { %v10017_v53 = vadd.f32 %v1724_v11, %v882_v51  ;;  %2341 = vmatmul.mubr.bf16.gmra.mrb[240].mxu0 %v9141_v17 }
 0x26d   : > { %11788 = vst [vmem:[#allocation77_spill] sm:$0xff] %v10015_v24  ;;  %8293 = vmatmul.mubr.bf16.gmra.mrb[20].mxu1 %v9145_v1  ;;  %2350 = vmatprep.mubr.bf16.mxu0 %v11706_v0  ;;  %v10031_v24 = vld [vmem:[#allocation2 + $0x90] sm:$0xff] }
 0x26e   : > { %11789 = vst [vmem:[#allocation78_spill] sm:$0xff] %v10017_v53  ;;  %8296 = vmatprep.mubr.bf16.mxu1 %v10020_v32  ;;  %v10027_v53 = vld [vmem:[#allocation2 + $0x88] sm:$0xff] }
 0x26f   : > { %v896_v44 = vpop.f32.mrb[136].mxu0 }
 0x270   : > { %v1728_v43 = vpop.f32.mrb[136].mxu1  ;;  %v898_v3 = vpop.f32.mrb[137].mxu0 }
 0x271   : > { %v10023_v29 = vadd.f32 %v1728_v43, %v886_v9  ;;  %v1730_v36 = vpop.f32.mrb[137].mxu1  ;;  %v900_v7 = vpop.f32.mrb[138].mxu0 }
 0x272   : > { %v10025_v23 = vadd.f32 %v1730_v36, %v888_v10  ;;  %v1732_v11 = vpop.f32.mrb[138].mxu1  ;;  %v902_v51 = vpop.f32.mrb[139].mxu0 }
 0x273   : > { %11790 = vst [vmem:[#allocation79_spill] sm:$0xff] %v10023_v29  ;;  %v1734_v17 = vpop.f32.mrb[139].mxu1  ;;  %v10038_v51 = vld [vmem:[#allocation2 + $0xa0] sm:$0xff]  ;;  %v10045_v29 = vld [vmem:[#allocation2 + $0xb0] sm:$0xff] }
 0x274   : > { %11791 = vst [vmem:[#allocation80_spill] sm:$0xff] %v10025_v23  ;;  %2351 = vmatmul.mubr.bf16.gmra.mrb[244].mxu0 %v9142_v52  ;;  %v10034_v52 = vld [vmem:[#allocation2 + $0x98] sm:$0xff]  ;;  %v9038_v23 = vld [vmem:[#allocation7 + $0xc4] ss:$12 sps:$4 sm:$0xff]  }
 0x275   : > { %8297 = vmatmul.mubr.bf16.gmra.mrb[24].mxu1 %v10027_v53  ;;  %2360 = vmatprep.mubr.bf16.mxu0 %v11706_v0 }
 0x276   : > { %8300 = vmatprep.mubr.bf16.mxu1 %v10031_v24  ;;  %4737 = vmatprep.subr.bf16.mxu0 %v9038_v23  ;;  %v9039_v23 = vld [vmem:[#allocation7 + $0xc8] ss:$12 sps:$4 sm:$0xff]  }
 0x277   : > { %v906_v9 = vpop.f32.mrb[140].mxu0  ;;  %8344 = vmatprep.subr.bf16.mxu1 %v9039_v23 }
 0x278   : > { %v1738_v44 = vpop.f32.mrb[140].mxu1  ;;  %v908_v43 = vpop.f32.mrb[141].mxu0  ;;  %8345 = vmatpush3.bf16.msra.mxu1 %v9039_v23 }
 0x279   : > { %v1740_v10 = vpop.f32.mrb[141].mxu1  ;;  %v910_v3 = vpop.f32.mrb[142].mxu0 }
 0x27a   : > { %v1742_v36 = vpop.f32.mrb[142].mxu1  ;;  %v912_v7 = vpop.f32.mrb[143].mxu0 }
 0x27b   : > { %v1744_v11 = vpop.f32.mrb[143].mxu1 }
 0x27c   : > { %2361 = vmatmul.mubr.bf16.gmra.mrb[248].mxu0 %v9143_v46  ;;  %v10041_v46 = vld [vmem:[#allocation2 + $0xa8] sm:$0xff] }
 0x27d   : > { %8301 = vmatmul.mubr.bf16.gmra.mrb[28].mxu1 %v10034_v52  ;;  %2370 = vmatprep.mubr.bf16.mxu0 %v11706_v0  ;;  %v9036_v11 = vld [vmem:[#allocation7 + $0xc0] ss:$12 sps:$4 sm:$0xff]  }
 0x27e   : > { %8304 = vmatprep.mubr.bf16.mxu1 %v10038_v51  ;;  %4738 = vmatpush1.bf16.msra.mxu0 %v9036_v11 }
 0x27f   : > { %v1398_v17 = vpop.f32.mrb[144].mxu0  ;;  %4739 = vmatprep.subr.bf16.mxu0 %v9048_v5  ;;  %v10131_v5 = vld [vmem:[#allocation2 + $0x110] sm:$0xff] }
 0x280   : > { %v1748_v9 = vpop.f32.mrb[144].mxu1  ;;  %v1400_v44 = vpop.f32.mrb[145].mxu0 }
 0x281   : > { %v1750_v43 = vpop.f32.mrb[145].mxu1  ;;  %v1402_v10 = vpop.f32.mrb[146].mxu0 }
 0x282   : > { %v1752_v3 = vpop.f32.mrb[146].mxu1  ;;  %v1404_v36 = vpop.f32.mrb[147].mxu0  ;;  %4740 = vmatpush1.bf16.msra.mxu0 %v9046_v54 }
 0x283   : > { %v1754_v7 = vpop.f32.mrb[147].mxu1 }
 0x284   : > { %2371 = vmatmul.mubr.bf16.gmra.mrb[252].mxu0 %v9144_v37  ;;  %v10048_v7 = vld [vmem:[#allocation2 + $0xb8] sm:$0xff] }
 0x285   : > { %8305 = vmatmul.mubr.bf16.gmra.mrb[32].mxu1 %v10041_v46  ;;  %2380 = vmatprep.mubr.bf16.mxu0 %v11706_v0 }
 0x286   : > { %8308 = vmatprep.mubr.bf16.mxu1 %v10045_v29 }
 0x287   : > { %v1408_v17 = vpop.f32.mrb[148].mxu0 }
 0x288   : > { %v8186_v9 = vpop.f32.mrb[148].mxu1  ;;  %v1410_v44 = vpop.f32.mrb[149].mxu0 }
 0x289   : > { %v1791_v43 = vpop.f32.mrb[149].mxu1  ;;  %v1412_v10 = vpop.f32.mrb[150].mxu0 }
 0x28a   : > { %v8187_v37 = vpop.f32.mrb[150].mxu1  ;;  %v1414_v3 = vpop.f32.mrb[151].mxu0 }
 0x28b   : > { %v1794_v36 = vpop.f32.mrb[151].mxu1  ;;  %v10065_v3 = vld [vmem:[#allocation2 + $0xc8] sm:$0xff] }
 0x28c   : > { %2381 = vmatmul.mubr.bf16.gmra.mrb[0].mxu0 %v9145_v1  ;;  %v9040_v1 = vld [vmem:[#allocation7 + $0xe0] ss:$12 sps:$4 sm:$0xff]   ;;  %v9041_v36 = vld [vmem:[#allocation7 + $0xf8] ss:$12 sps:$4 sm:$0xff]  }
 0x28d   : > { %8309 = vmatmul.mubr.bf16.gmra.mrb[36].mxu1 %v10048_v7  ;;  %2390 = vmatprep.mubr.bf16.mxu0 %v11706_v0 }
 0x28e   : > { %8312 = vmatprep.mubr.bf16.mxu1 %v10052_v55  ;;  %8346 = vmatprep.subr.bf16.mxu1 %v9040_v1 }
 0x28f   : > { %v1418_v17 = vpop.f32.mrb[152].mxu0  ;;  %8347 = vmatpush3.bf16.msra.mxu1 %v9040_v1  ;;  %v10083_v1 = vld [vmem:[#allocation2 + $0xe0] sm:$0xff] }
 0x290   : > { %v10056_v11 = vadd.f32 %v1418_v17, %v9747_v42  ;;  %v1420_v9 = vpop.f32.mrb[153].mxu0  ;;  %v10069_v42 = vld [vmem:[#allocation2 + $0xd0] sm:$0xff]  ;;  %8348 = vmatprep.subr.bf16.mxu1 %v9041_v36 }
 0x291   : > { %v1422_v44 = vpop.f32.mrb[154].mxu0  ;;  %v9042_v9 = vld [vmem:[#allocation7 + $0x110] ss:$12 sps:$4 sm:$0xff]  }
 0x292   : > { %v10059_v43 = vadd.f32 %v1422_v44, %v9749_v45  ;;  %v1424_v10 = vpop.f32.mrb[155].mxu0 }
 0x293   : > { %v10062_v37 = vadd.f32 %v1424_v10, %v9751_v47  ;;  %8349 = vmatpush3.bf16.msra.mxu1 %v9041_v36  ;;  %v10079_v10 = vld [vmem:[#allocation2 + $0xd8] sm:$0xff] }
 0x294   : > { %2391 = vmatmul.mubr.bf16.gmra.mrb[4].mxu0 %v10020_v32  ;;  %8350 = vmatprep.subr.bf16.mxu1 %v9042_v9 }
 0x295   : > { %8313 = vmatmul.mubr.bf16.gmra.mrb[40].mxu1 %v10065_v3  ;;  %2400 = vmatprep.mubr.bf16.mxu0 %v11706_v0 }
 0x296   : > { %8316 = vmatprep.mubr.bf16.mxu1 %v10069_v42 }
 0x297   : > { %v1428_v45 = vpop.f32.mrb[156].mxu0  ;;  %8351 = vmatpush3.bf16.msra.mxu1 %v9042_v9  ;;  %v10096_v9 = vld [vmem:[#allocation2 + $0xe8] sm:$0xff] }
 0x298   : > { %v10073_v47 = vadd.f32 %v1428_v45, %v9757_v48  ;;  %v1430_v23 = vpop.f32.mrb[157].mxu0  ;;  %v9043_v48 = vld [vmem:[#allocation7 + $0x128] ss:$12 sps:$4 sm:$0xff]  }
 0x299   : > { %v10076_v32 = vadd.f32 %v1430_v23, %v9759_v49  ;;  %v1432_v17 = vpop.f32.mrb[158].mxu0  ;;  %8352 = vmatprep.subr.bf16.mxu1 %v9043_v48 }
 0x29a   : > { %v1434_v44 = vpop.f32.mrb[159].mxu0 }
 0x29b   : > { %8353 = vmatpush3.bf16.msra.mxu1 %v9043_v48 }
 0x29c   : > { %2401 = vmatmul.mubr.bf16.gmra.mrb[8].mxu0 %v10027_v53  ;;  %v9044_v53 = vld [vmem:[#allocation7 + $0x140] ss:$12 sps:$4 sm:$0xff]  }
 0x29d   : > { %8317 = vmatmul.mubr.bf16.gmra.mrb[44].mxu1 %v10079_v10  ;;  %2410 = vmatprep.mubr.bf16.mxu0 %v11706_v0 }
 0x29e   : > { %8320 = vmatprep.mubr.bf16.mxu1 %v10083_v1  ;;  %8354 = vmatprep.subr.bf16.mxu1 %v9044_v53 }
 0x29f   : > { %v1438_v49 = vpop.f32.mrb[160].mxu0  ;;  %8355 = vmatpush3.bf16.msra.mxu1 %v9044_v53 }
 0x2a0   : > { %v10087_v45 = vadd.f32 %v1438_v49, %v9765_v16  ;;  %v1440_v36 = vpop.f32.mrb[161].mxu0  ;;  %v11792_v16 = vmov 0   ;;  %v10100_v49 = vld [vmem:[#allocation2 + $0xf0] sm:$0xff] }
 0x2a1   : > { %v1442_v23 = vpop.f32.mrb[162].mxu0 }
 0x2a2   : > { %v10090_v17 = vadd.f32 %v1442_v23, %v9767_v19  ;;  %v1444_v44 = vpop.f32.mrb[163].mxu0  ;;  %v9045_v19 = vld [vmem:[#allocation7 + $0x158] ss:$12 sps:$4 sm:$0xff]  }
 0x2a3   : > { %v10093_v0 = vadd.f32 %v1444_v44, %v9769_v20  ;;  %8356 = vmatprep.subr.bf16.mxu1 %v9045_v19  ;;  %v9049_v44 = vld [vmem:[#allocation7 + $0x170] ss:$12 sps:$4 sm:$0xff]  }
 0x2a4   : > { %2411 = vmatmul.mubr.bf16.gmra.mrb[12].mxu0 %v10031_v24  ;;  %8357 = vmatpush3.bf16.msra.mxu1 %v9045_v19 }
 0x2a5   : > { %8321 = vmatmul.mubr.bf16.gmra.mrb[48].mxu1 %v10096_v9  ;;  %2420 = vmatprep.mubr.bf16.mxu0 %v11792_v16 }
 0x2a6   : > { %8324 = vmatprep.mubr.bf16.mxu1 %v10100_v49  ;;  %8358 = vmatprep.subr.bf16.mxu1 %v9049_v44 }
 0x2a7   : > { %v1448_v36 = vpop.f32.mrb[164].mxu0 }
 0x2a8   : > { %v10104_v20 = vadd.f32 %v1448_v36, %v9775_v21  ;;  %v1450_v48 = vpop.f32.mrb[165].mxu0  ;;  %v10114_v21 = vld [vmem:[#allocation2 + $0x100] sm:$0xff]  ;;  %8359 = vmatpush3.bf16.msra.mxu1 %v9049_v44 }
 0x2a9   : > { %v10107_v24 = vadd.f32 %v1450_v48, %v9777_v22  ;;  %v1452_v23 = vpop.f32.mrb[166].mxu0 }
 0x2aa   : > { %v1454_v62 = vpop.f32.mrb[167].mxu0  ;;  %v10127_v23 = vld [vmem:[#allocation2 + $0x108] sm:$0xff] }
 0x2ac   : > { %2421 = vmatmul.mubr.bf16.gmra.mrb[16].mxu0 %v10034_v52 }
 0x2ad   : > { %8325 = vmatmul.mubr.bf16.gmra.mrb[52].mxu1 %v10110_v14  ;;  %2430 = vmatprep.mubr.bf16.mxu0 %v11792_v16 }
 0x2ae   : > { %8328 = vmatprep.mubr.bf16.mxu1 %v10114_v21 }
 0x2af   : > { %v1458_v22 = vpop.f32.mrb[168].mxu0 }
 0x2b0   : > { %v10118_v62 = vadd.f32 %v1458_v22, %v9783_v25  ;;  %v1460_v53 = vpop.f32.mrb[169].mxu0  ;;  %v9052_v22 = vld [vmem:[#allocation7 + $0xf4] ss:$12 sps:$4 sm:$0xff]  }
 0x2b1   : > { %v1462_v19 = vpop.f32.mrb[170].mxu0  ;;  %v9050_v53 = vld [vmem:[#allocation7 + $0xf0] ss:$12 sps:$4 sm:$0xff]   ;;  %4741 = vmatprep.subr.bf16.mxu0 %v9052_v22  ;;  %v9056_v22 = vld [vmem:[#allocation7 + $0x120] ss:$12 sps:$4 sm:$0xff]  }
 0x2b2   : > { %v10121_v52 = vadd.f32 %v1462_v19, %v9785_v28  ;;  %v1464_v36 = vpop.f32.mrb[171].mxu0  ;;  %v10141_v19 = vld [vmem:[#allocation2 + $0x118] sm:$0xff]  ;;  %4742 = vmatpush1.bf16.msra.mxu0 %v9050_v53  ;;  %v10160_v53 = vld [vmem:[#allocation2 + $0x128] sm:$0xff] }
 0x2b3   : > { %v10124_v48 = vadd.f32 %v1464_v36, %v9787_v30  ;;  %v10145_v36 = vld [vmem:[#allocation2 + $0x120] sm:$0xff] }
 0x2b4   : > { %2431 = vmatmul.mubr.bf16.gmra.mrb[20].mxu0 %v10038_v51 }
 0x2b5   : > { %8329 = vmatmul.mubr.bf16.gmra.mrb[56].mxu1 %v10127_v23  ;;  %2440 = vmatprep.mubr.bf16.mxu0 %v11792_v16 }
 0x2b6   : > { %8332 = vmatprep.mubr.bf16.mxu1 %v10131_v5 }
 0x2b7   : > { %v1468_v25 = vpop.f32.mrb[172].mxu0 }
 0x2b8   : > { %v10135_v28 = vadd.f32 %v1468_v25, %v9793_v31  ;;  %v1470_v54 = vpop.f32.mrb[173].mxu0  ;;  %v9055_v31 = vld [vmem:[#allocation7 + $0x10c] ss:$12 sps:$4 sm:$0xff]   ;;  %v9053_v25 = vld [vmem:[#allocation7 + $0x108] ss:$12 sps:$4 sm:$0xff]  }
 0x2b9   : > { %v10138_v30 = vadd.f32 %v1470_v54, %v9795_v33  ;;  %v1472_v44 = vpop.f32.mrb[174].mxu0  ;;  %v11793_v54 = vld [vmem:[#allocation21_spill] sm:$0xff]  ;;  %4743 = vmatprep.subr.bf16.mxu0 %v9055_v31 }
 0x2ba   : > { %v1474_v51 = vpop.f32.mrb[175].mxu0  ;;  %4744 = vmatpush1.bf16.msra.mxu0 %v9053_v25  ;;  %v11797_v25 = vld [vmem:[#allocation25_spill] sm:$0xff] }
 0x2bb   : > { %4745 = vmatprep.subr.bf16.mxu0 %v9058_v60  ;;  %v9067_v60 = vld [vmem:[#allocation7 + $0x16c] ss:$12 sps:$4 sm:$0xff]  }
 0x2bc   : > { %2441 = vmatmul.mubr.bf16.gmra.mrb[24].mxu0 %v10041_v46 }
 0x2bd   : > { %8333 = vmatmul.mubr.bf16.gmra.mrb[60].mxu1 %v10141_v19  ;;  %2450 = vmatprep.mubr.bf16.mxu0 %v11792_v16 }
 0x2be   : > { %8336 = vmatprep.mubr.bf16.mxu1 %v10145_v36  ;;  %4746 = vmatpush1.bf16.msra.mxu0 %v9056_v22 }
 0x2bf   : > { %v1478_v33 = vpop.f32.mrb[176].mxu0 }
 0x2c0   : > { %v10149_v44 = vadd.f32 %v1478_v33, %v11793_v54  ;;  %v1480_v51 = vpop.f32.mrb[177].mxu0  ;;  %v9059_v33 = vld [vmem:[#allocation7 + $0x138] ss:$12 sps:$4 sm:$0xff]  }
 0x2c1   : > { %v1482_v46 = vpop.f32.mrb[178].mxu0  ;;  %v11796_v54 = vld [vmem:[#allocation24_spill] sm:$0xff] }
 0x2c2   : > { %v10152_v18 = vadd.f32 %v1482_v46, %v11794_v8  ;;  %v1484_v6 = vpop.f32.mrb[179].mxu0  ;;  %v9061_v8 = vld [vmem:[#allocation7 + $0x13c] ss:$12 sps:$4 sm:$0xff]  }
 0x2c3   : > { %v10157_v58 = vadd.f32 %v1484_v6, %v11795_v4  ;;  %4747 = vmatprep.subr.bf16.mxu0 %v9061_v8  ;;  %v10171_v46 = vld [vmem:[#allocation2 + $0x138] sm:$0xff]  ;;  %v9065_v8 = vld [vmem:[#allocation7 + $0x168] ss:$12 sps:$4 sm:$0xff]  }
 0x2c4   : > { %2451 = vmatmul.mubr.bf16.gmra.mrb[28].mxu0 %v10045_v29 }
 0x2c5   : > { %8337 = vmatmul.mubr.bf16.gmra.mrb[64].mxu1 %v10160_v53  ;;  %2460 = vmatprep.mubr.bf16.mxu0 %v11792_v16 }
 0x2c6   : > { %8340 = vmatprep.mubr.bf16.mxu1 %v10154_v50  ;;  %4748 = vmatpush1.bf16.msra.mxu0 %v9059_v33 }
 0x2c7   : > { %v1488_v31 = vpop.f32.mrb[180].mxu0  ;;  %4749 = vmatprep.subr.bf16.mxu0 %v9064_v27 }
 0x2c8   : > { %v10166_v4 = vadd.f32 %v1488_v31, %v11796_v54  ;;  %v1490_v6 = vpop.f32.mrb[181].mxu0 }
 0x2c9   : > { %v10169_v29 = vadd.f32 %v1490_v6, %v11797_v25  ;;  %v1492_v51 = vpop.f32.mrb[182].mxu0  ;;  %v11798_v6 = vld [vmem:[#allocation26_spill] sm:$0xff] }
 0x2ca   : > { %v1494_v2 = vpop.f32.mrb[183].mxu0  ;;  %4750 = vmatpush1.bf16.msra.mxu0 %v9062_v38 }
 0x2cb   : > { %4751 = vmatprep.subr.bf16.mxu0 %v9067_v60 }
 0x2cc   : > { %2461 = vmatmul.mubr.bf16.gmra.mrb[32].mxu0 %v10048_v7  ;;  %v11799_v7 = vld [vmem:[#allocation27_spill] sm:$0xff] }
 0x2cd   : > { %8341 = vmatmul.mubr.bf16.gmra.mrb[160].mxu1 %v10171_v46  ;;  %2470 = vmatprep.mubr.bf16.mxu0 %v11792_v16 }
 0x2ce   : > { %4752 = vmatpush1.bf16.msra.mxu0 %v9065_v8  ;;  %v11800_v8 = vld [vmem:[#allocation28_spill] sm:$0xff] }
 0x2cf   : > { %v1498_v22 = vpop.f32.mrb[184].mxu0 }
 0x2d0   : > { %v10177_v31 = vadd.f32 %v1498_v22, %v9817_v39  ;;  %v1500_v54 = vpop.f32.mrb[185].mxu0 }
 0x2d1   : > { %v1502_v2 = vpop.f32.mrb[186].mxu0 }
 0x2d2   : > { %v10180_v33 = vadd.f32 %v1502_v2, %v11798_v6  ;;  %v1504_v25 = vpop.f32.mrb[187].mxu0 }
 0x2d3   : > { %v10183_v51 = vadd.f32 %v1504_v25, %v11799_v7  ;;  %v11801_v7 = vld [vmem:[#allocation29_spill] sm:$0xff] }
 0x2d4   : > { %2471 = vmatmul.mubr.bf16.gmra.mrb[36].mxu0 %v10052_v55 }
 0x2d5   : > { %2480 = vmatprep.mubr.bf16.mxu0 %v11792_v16 }
 0x2d7   : > { %v1508_v38 = vpop.f32.mrb[188].mxu0 }
 0x2d8   : > { %v10188_v27 = vadd.f32 %v1508_v38, %v9825_v12  ;;  %v1510_v39 = vpop.f32.mrb[189].mxu0  ;;  %v11802_v38 = vld [vmem:[#allocation30_spill] sm:$0xff] }
 0x2d9   : > { %v10191_v60 = vadd.f32 %v1510_v39, %v9827_v13  ;;  %v1512_v22 = vpop.f32.mrb[190].mxu0 }
 0x2da   : > { %v1514_v54 = vpop.f32.mrb[191].mxu0 }
 0x2db   : > { %v11804_v54 = vld [vmem:[#allocation32_spill] sm:$0xff] }
 0x2dc   : > { %2481 = vmatmul.mubr.bf16.gmra.mrb[40].mxu0 %v10065_v3  ;;  %v11803_v3 = vld [vmem:[#allocation31_spill] sm:$0xff] }
 0x2dd   : > { %2490 = vmatprep.mubr.bf16.mxu0 %v11792_v16 }
 0x2df   : > { %v1518_v2 = vpop.f32.mrb[192].mxu0 }
 0x2e0   : > { %v10196_v6 = vadd.f32 %v1518_v2, %v11800_v8  ;;  %v1520_v55 = vpop.f32.mrb[193].mxu0 }
 0x2e1   : > { %v1522_v25 = vpop.f32.mrb[194].mxu0 }
 0x2e2   : > { %v10199_v63 = vadd.f32 %v1522_v25, %v11801_v7  ;;  %v1524_v12 = vpop.f32.mrb[195].mxu0  ;;  %v11805_v7 = vld [vmem:[#allocation33_spill] sm:$0xff] }
 0x2e3   : > { %v10202_v15 = vadd.f32 %v1524_v12, %v11802_v38 }
 0x2e4   : > { %2491 = vmatmul.mubr.bf16.gmra.mrb[44].mxu0 %v10069_v42 }
 0x2e5   : > { %2500 = vmatprep.mubr.bf16.mxu0 %v11792_v16 }
 0x2e7   : > { %v1528_v13 = vpop.f32.mrb[196].mxu0 }
 0x2e8   : > { %v10207_v39 = vadd.f32 %v1528_v13, %v11803_v3  ;;  %v1530_v22 = vpop.f32.mrb[197].mxu0  ;;  %v11807_v3 = vld [vmem:[#allocation35_spill] sm:$0xff] }
 0x2e9   : > { %v10210_v2 = vadd.f32 %v1530_v22, %v11804_v54  ;;  %v1532_v8 = vpop.f32.mrb[198].mxu0  ;;  %v11808_v22 = vld [vmem:[#allocation36_spill] sm:$0xff] }
 0x2ea   : > { %v1534_v55 = vpop.f32.mrb[199].mxu0 }
 0x2eb   : > { %v11809_v55 = vld [vmem:[#allocation37_spill] sm:$0xff] }
 0x2ec   : > { %2501 = vmatmul.mubr.bf16.gmra.mrb[48].mxu0 %v10079_v10 }
 0x2ed   : > { %2510 = vmatprep.mubr.bf16.mxu0 %v11792_v16 }
 0x2ef   : > { %v1538_v25 = vpop.f32.mrb[200].mxu0 }
 0x2f0   : > { %v10215_v12 = vadd.f32 %v1538_v25, %v11805_v7  ;;  %v1540_v42 = vpop.f32.mrb[201].mxu0 }
 0x2f1   : > { %v1542_v38 = vpop.f32.mrb[202].mxu0 }
 0x2f2   : > { %v10218_v35 = vadd.f32 %v1542_v38, %v11806_v61  ;;  %v1544_v13 = vpop.f32.mrb[203].mxu0  ;;  %v11810_v38 = vld [vmem:[#allocation38_spill] sm:$0xff] }
 0x2f3   : > { %v10221_v56 = vadd.f32 %v1544_v13, %v11807_v3 }
 0x2f4   : > { %2511 = vmatmul.mubr.bf16.gmra.mrb[52].mxu0 %v10083_v1 }
 0x2f5   : > { %2520 = vmatprep.mubr.bf16.mxu0 %v11792_v16 }
 0x2f7   : > { %v1548_v10 = vpop.f32.mrb[204].mxu0 }
 0x2f8   : > { %v10226_v54 = vadd.f32 %v1548_v10, %v11808_v22  ;;  %v1550_v8 = vpop.f32.mrb[205].mxu0  ;;  %v11812_v22 = vld [vmem:[#allocation40_spill] sm:$0xff] }
 0x2f9   : > { %v10229_v25 = vadd.f32 %v1550_v8, %v11809_v55  ;;  %v1552_v7 = vpop.f32.mrb[206].mxu0 }
 0x2fa   : > { %v1554_v42 = vpop.f32.mrb[207].mxu0 }
 0x2fc   : > { %2521 = vmatmul.mubr.bf16.gmra.mrb[56].mxu0 %v10096_v9 }
 0x2fd   : > { %2530 = vmatprep.mubr.bf16.mxu0 %v11792_v16 }
 0x2ff   : > { %v1558_v61 = vpop.f32.mrb[208].mxu0 }
 0x300   : > { %v10234_v13 = vadd.f32 %v1558_v61, %v11810_v38  ;;  %v1560_v1 = vpop.f32.mrb[209].mxu0 }
 0x301   : > { %v1562_v3 = vpop.f32.mrb[210].mxu0 }
 0x302   : > { %v10237_v41 = vadd.f32 %v1562_v3, %v11811_v59  ;;  %v1564_v10 = vpop.f32.mrb[211].mxu0 }
 0x303   : > { %v10240_v57 = vadd.f32 %v1564_v10, %v11812_v22 }
 0x304   : > { %2531 = vmatmul.mubr.bf16.gmra.mrb[60].mxu0 %v10100_v49 }
 0x305   : > { %2540 = vmatprep.mubr.bf16.mxu0 %v11792_v16 }
 0x307   : > { %v2272_v9 = vpop.f32.mrb[212].mxu0 }
 0x308   : > { %v2274_v8 = vpop.f32.mrb[213].mxu0 }
 0x309   : > { %v2276_v55 = vpop.f32.mrb[214].mxu0 }
 0x30a   : > { %v2278_v7 = vpop.f32.mrb[215].mxu0 }
 0x30c   : > { %2541 = vmatmul.mubr.bf16.gmra.mrb[64].mxu0 %v10110_v14 }
 0x30d   : > { %2550 = vmatprep.mubr.bf16.mxu0 %v11792_v16 }
 0x30f   : > { %v2282_v42 = vpop.f32.mrb[216].mxu0 }
 0x310   : > { %v8254_v61 = vpop.f32.mrb[152].mxu1  ;;  %v2284_v59 = vpop.f32.mrb[217].mxu0 }
 0x311   : > { %v2063_v38 = vpop.f32.mrb[153].mxu1  ;;  %v2286_v1 = vpop.f32.mrb[218].mxu0 }
 0x312   : > { %v8255_v3 = vpop.f32.mrb[154].mxu1  ;;  %v2288_v10 = vpop.f32.mrb[219].mxu0 }
 0x313   : > { %v2066_v22 = vpop.f32.mrb[155].mxu1 }
 0x314   : > { %2551 = vmatmul.mubr.bf16.gmra.mrb[68].mxu0 %v10114_v21 }
 0x315   : > { %2560 = vmatprep.mubr.bf16.mxu0 %v11792_v16 }
 0x317   : > { %v2292_v49 = vpop.f32.mrb[220].mxu0 }
 0x318   : > { %v8274_v9 = vpop.f32.mrb[156].mxu1  ;;  %v2964_v8 = vadd.f32 %v2292_v49, %v10056_v11  ;;  %v2294_v55 = vpop.f32.mrb[221].mxu0 }
 0x319   : > { %v2665_v14 = vpop.f32.mrb[157].mxu1  ;;  %v2296_v7 = vpop.f32.mrb[222].mxu0 }
 0x31a   : > { %v8275_v26 = vpop.f32.mrb[158].mxu1  ;;  %v2967_v42 = vadd.f32 %v2296_v7, %v10059_v43  ;;  %v2298_v61 = vpop.f32.mrb[223].mxu0  ;;  %v3283_v1 = vrot.slane %v2964_v8, 7 }
 0x31b   : > { %v2668_v59 = vpop.f32.mrb[159].mxu1  ;;  %v2968_v38 = vadd.f32 %v2298_v61, %v10062_v37 }
 0x31c   : > { %v3284_v3 = vrot.slane %v2967_v42, 7  ;;  %2561 = vmatmul.mubr.bf16.gmra.mrb[72].mxu0 %v10127_v23 }
 0x31d   : > { %2570 = vmatprep.mubr.bf16.mxu0 %v11792_v16 }
 0x31e   : > { %v3285_v21 = vsel %vm3276_vm0, %v3283_v1, %v3284_v3 }
 0x31f   : > { %v3480_v11 = vadd.f32 %v3285_v21, %v2968_v38  ;;  %v2302_v10 = vpop.f32.mrb[224].mxu0 }
 0x320   : > { %v8278_v22 = vpop.f32.mrb[4].mxu1  ;;  %v2970_v26 = vadd.f32 %v2302_v10, %v10073_v47  ;;  %v2304_v49 = vpop.f32.mrb[225].mxu0 }
 0x321   : > { %v2681_v43 = vpop.f32.mrb[5].mxu1  ;;  %v2971_v9 = vadd.f32 %v2304_v49, %v10076_v32  ;;  %v2306_v55 = vpop.f32.mrb[226].mxu0  ;;  %v3630_v14 = vrot.slane %v8278_v22, 1  ;;  %v10262_v32 = vld [vmem:[%s11697_s2] ss:$0 sm:$0xff] }
 0x322   : > { %v8279_v37 = vpop.f32.mrb[6].mxu1  ;;  %v3286_v8 = vrot.slane %v2970_v26, 7  ;;  %v2308_v23 = vpop.f32.mrb[227].mxu0 }
 0x323   : > { %v3632_v7 = vrot.slane %v8279_v37, 1  ;;  %v2684_v42 = vpop.f32.mrb[7].mxu1 }
 0x324   : > { %v3628_v61 = vrot.slane %v2684_v42, 1  ;;  %v3287_v59 = vsel %vm3276_vm0, %v3284_v3, %v3286_v8  ;;  %2571 = vmatmul.mubr.bf16.gmra.mrb[76].mxu0 %v10131_v5 }
 0x325   : > { %v3633_v38 = vsel %vm3619_vm1, %v3630_v14, %v3632_v7  ;;  %v3481_v47 = vadd.f32 %v3287_v59, %v2971_v9  ;;  %2580 = vmatprep.mubr.bf16.mxu0 %v11792_v16 }
 0x326   : > { %v3631_v1 = vsel %vm3619_vm1, %v3628_v61, %v3630_v14 }
 0x327   : > { %v3859_v21 = vadd.f32 %v3631_v1, %v3480_v11  ;;  %v3860_v10 = vadd.f32 %v3633_v38, %v3481_v47  ;;  %v2312_v22 = vpop.f32.mrb[228].mxu0 }
 0x328   : > { %v8282_v26 = vpop.f32.mrb[8].mxu1  ;;  %v2976_v3 = vadd.f32 %v2312_v22, %v10087_v45  ;;  %v2314_v49 = vpop.f32.mrb[229].mxu0 }
 0x329   : > { %v2697_v43 = vpop.f32.mrb[9].mxu1  ;;  %v3938_v5 = vadd.f32 %v10262_v32, %v3859_v21  ;;  %v3939_v9 = vadd.f32 %v10262_v32, %v3860_v10  ;;  %v2316_v55 = vpop.f32.mrb[230].mxu0  ;;  %v3637_v8 = vrot.slane %v8282_v26, 1  ;;  %v9377_v21 = vmov 0.0   ;;  %v9068_v26 = vld [vmem:[#allocation7 + $0x8] ss:$12 sps:$4 sm:$0xff]  }
 0x32a   : > { %v8283_v37 = vpop.f32.mrb[10].mxu1  ;;  %v2979_v7 = vadd.f32 %v2316_v55, %v10090_v17  ;;  %v2318_v23 = vpop.f32.mrb[231].mxu0  ;;  %v3289_v45 = vrot.slane %v2976_v3, 7  ;;  %8424 = vmatprep.subr.bf16.mxu1 %v9068_v26 }
 0x32b   : > { %v3639_v14 = vrot.slane %v8283_v37, 1  ;;  %v2700_v42 = vpop.f32.mrb[11].mxu1  ;;  %v4010_v11 = vmax.f32 %v3938_v5, 0.0  ;;  %v4011_v61 = vmax.f32 %v3939_v9, 0.0  ;;  %v2980_v59 = vadd.f32 %v2318_v23, %v10093_v0 }
 0x32c   : > { %v3635_v38 = vrot.slane %v2700_v42, 1  ;;  %v3290_v47 = vrot.slane %v2979_v7, 7  ;;  %2581 = vmatmul.mubr.bf16.gmra.mrb[80].mxu0 %v10141_v19 }
 0x32d   : > { %v3640_v1 = vsel %vm3619_vm1, %v3637_v8, %v3639_v14  ;;  %v10274_v10 = vpack.c.bf16 %v4010_v11, %v9377_v21  ;;  %v10278_v22 = vpack.c.bf16 %v9377_v21, %v4011_v61  ;;  %2590 = vmatprep.mubr.bf16.mxu0 %v11792_v16 }
 0x32e   : > { %v3638_v17 = vsel %vm3619_vm1, %v3635_v38, %v3637_v8  ;;  %v3291_v0 = vsel %vm3276_vm0, %v3289_v45, %v3290_v47 }
 0x32f   : > { %8360 = vmatprep.mubr.bf16.mxu1 %v10274_v10  ;;  %v3484_v3 = vadd.f32 %v3291_v0, %v2980_v59  ;;  %v2322_v49 = vpop.f32.mrb[232].mxu0 }
 0x330   : > { %v8286_v43 = vpop.f32.mrb[12].mxu1  ;;  %8361 = vmatmul.mubr.bf16.vlgmr.msra.gmra.mrb[164].mxu1 %v10278_v22  ;;  %v2982_v19 = vadd.f32 %v2322_v49, %v10104_v20  ;;  %v2324_v5 = vpop.f32.mrb[233].mxu0 }
 0x331   : > { %v2713_v9 = vpop.f32.mrb[13].mxu1  ;;  %8425 = vmatpush3.bf16.msra.mxu1 %v9068_v26  ;;  %v3863_v55 = vadd.f32 %v3638_v17, %v3484_v3  ;;  %v2983_v37 = vadd.f32 %v2324_v5, %v10107_v24  ;;  %v2326_v8 = vpop.f32.mrb[234].mxu0  ;;  %v3644_v23 = vrot.slane %v8286_v43, 1 }
 0x332   : > { %v8287_v7 = vpop.f32.mrb[14].mxu1  ;;  %v3292_v14 = vrot.slane %v2982_v19, 7  ;;  %v2328_v11 = vpop.f32.mrb[235].mxu0 }
 0x333   : > { %v3646_v42 = vrot.slane %v8287_v7, 1  ;;  %v2716_v61 = vpop.f32.mrb[15].mxu1  ;;  %v3942_v59 = vadd.f32 %v10262_v32, %v3863_v55 }
 0x334   : > { %v3642_v38 = vrot.slane %v2716_v61, 1  ;;  %v3293_v45 = vsel %vm3276_vm0, %v3290_v47, %v3292_v14  ;;  %2591 = vmatmul.mubr.bf16.gmra.mrb[84].mxu0 %v10145_v36 }
 0x335   : > { %v3647_v20 = vsel %vm3619_vm1, %v3644_v23, %v3646_v42  ;;  %v4014_v26 = vmax.f32 %v3942_v59, 0.0  ;;  %v3485_v17 = vadd.f32 %v3293_v45, %v2983_v37  ;;  %2600 = vmatprep.mubr.bf16.mxu0 %v11792_v16 }
 0x336   : > { %v3645_v24 = vsel %vm3619_vm1, %v3642_v38, %v3644_v23 }
 0x337   : > { %v10293_v0 = vpack.c.bf16 %v4014_v26, %v9377_v21  ;;  %v3864_v3 = vadd.f32 %v3640_v1, %v3485_v17  ;;  %v2332_v49 = vpop.f32.mrb[236].mxu0 }
 0x338   : > { %v8290_v43 = vpop.f32.mrb[16].mxu1  ;;  %v2988_v19 = vadd.f32 %v2332_v49, %v10118_v62  ;;  %v2334_v5 = vpop.f32.mrb[237].mxu0 }
 0x339   : > { %v2729_v47 = vpop.f32.mrb[17].mxu1  ;;  %v3943_v9 = vadd.f32 %v10262_v32, %v3864_v3  ;;  %v2336_v55 = vpop.f32.mrb[238].mxu0  ;;  %8364 = vmatprep.mubr.bf16.mxu1 %v10293_v0  ;;  %v3651_v37 = vrot.slane %v8290_v43, 1 }
 0x33a   : > { %v8291_v36 = vpop.f32.mrb[18].mxu1  ;;  %v2991_v8 = vadd.f32 %v2336_v55, %v10121_v52  ;;  %v2338_v14 = vpop.f32.mrb[239].mxu0  ;;  %v3295_v61 = vrot.slane %v2988_v19, 7  ;;  %v9069_v52 = vld [vmem:[#allocation7 + $0x20] ss:$12 sps:$4 sm:$0xff]  }
 0x33b   : > { %v3653_v7 = vrot.slane %v8291_v36, 1  ;;  %v2732_v23 = vpop.f32.mrb[19].mxu1  ;;  %v4015_v42 = vmax.f32 %v3943_v9, 0.0  ;;  %v2992_v1 = vadd.f32 %v2338_v14, %v10124_v48  ;;  %8426 = vmatprep.subr.bf16.mxu1 %v9069_v52 }
 0x33c   : > { %v3649_v11 = vrot.slane %v2732_v23, 1  ;;  %v3296_v62 = vrot.slane %v2991_v8, 7  ;;  %2601 = vmatmul.mubr.bf16.gmra.mrb[88].mxu0 %v10160_v53  ;;  %8427 = vmatpush3.bf16.msra.mxu1 %v9069_v52 }
 0x33d   : > { %v10301_v59 = vsel %vm3619_vm1, %v3651_v37, %v3653_v7  ;;  %v10305_v38 = vpack.c.bf16 %v9377_v21, %v4015_v42  ;;  %2610 = vmatprep.mubr.bf16.mxu0 %v11792_v16 }
 0x33e   : > { %v10308_v45 = vsel %vm3619_vm1, %v3649_v11, %v3651_v37  ;;  %v3297_v26 = vsel %vm3276_vm0, %v3295_v61, %v3296_v62 }
 0x33f   : > { %v3488_v48 = vadd.f32 %v3297_v26, %v2992_v1  ;;  %v2342_v17 = vpop.f32.mrb[240].mxu0  ;;  %8365 = vmatmul.mubr.bf16.gmra.mrb[168].mxu1 %v10305_v38 }
 0x340   : > { %v8294_v3 = vpop.f32.mrb[20].mxu1  ;;  %v2994_v49 = vadd.f32 %v2342_v17, %v10135_v28  ;;  %v2344_v53 = vpop.f32.mrb[241].mxu0 }
 0x341   : > { %v2745_v43 = vpop.f32.mrb[21].mxu1  ;;  %v3867_v19 = vadd.f32 %v3645_v24, %v3488_v48  ;;  %v2995_v5 = vadd.f32 %v2344_v53, %v10138_v30  ;;  %v2346_v47 = vpop.f32.mrb[242].mxu0  ;;  %v3658_v36 = vrot.slane %v8294_v3, 1 }
 0x342   : > { %v8295_v9 = vpop.f32.mrb[22].mxu1  ;;  %v3298_v55 = vrot.slane %v2994_v49, 7  ;;  %v2348_v8 = vpop.f32.mrb[243].mxu0 }
 0x343   : > { %v3660_v37 = vrot.slane %v8295_v9, 1  ;;  %v2748_v7 = vpop.f32.mrb[23].mxu1  ;;  %v3946_v14 = vadd.f32 %v10262_v32, %v3867_v19 }
 0x344   : > { %v3656_v23 = vrot.slane %v2748_v7, 1  ;;  %v3299_v42 = vsel %vm3276_vm0, %v3296_v62, %v3298_v55  ;;  %2611 = vmatmul.mubr.bf16.gmra.mrb[92].mxu0 %v10154_v50 }
 0x345   : > { %v10318_v28 = vsel %vm3619_vm1, %v3658_v36, %v3660_v37  ;;  %v4018_v24 = vmax.f32 %v3946_v14, 0.0  ;;  %v3489_v1 = vadd.f32 %v3299_v42, %v2995_v5  ;;  %2620 = vmatprep.mubr.bf16.mxu0 %v11792_v16 }
 0x346   : > { %v10322_v30 = vsel %vm3619_vm1, %v3656_v23, %v3658_v36 }
 0x347   : > { %v10326_v11 = vpack.c.bf16 %v4018_v24, %v9377_v21  ;;  %v3868_v61 = vadd.f32 %v3647_v20, %v3489_v1  ;;  %v2352_v52 = vpop.f32.mrb[244].mxu0 }
 0x348   : > { %v8298_v26 = vpop.f32.mrb[24].mxu1  ;;  %v3000_v62 = vadd.f32 %v2352_v52, %v10149_v44  ;;  %v2354_v48 = vpop.f32.mrb[245].mxu0 }
 0x349   : > { %v2761_v17 = vpop.f32.mrb[25].mxu1  ;;  %v3947_v3 = vadd.f32 %v10262_v32, %v3868_v61  ;;  %v2356_v50 = vpop.f32.mrb[246].mxu0  ;;  %8368 = vmatprep.mubr.bf16.mxu1 %v10326_v11  ;;  %v3665_v53 = vrot.slane %v8298_v26, 1 }
 0x34a   : > { %v8299_v49 = vpop.f32.mrb[26].mxu1  ;;  %v3003_v43 = vadd.f32 %v2356_v50, %v10152_v18  ;;  %v2358_v5 = vpop.f32.mrb[247].mxu0  ;;  %v3301_v36 = vrot.slane %v3000_v62, 7  ;;  %v9070_v18 = vld [vmem:[#allocation7 + $0x38] ss:$12 sps:$4 sm:$0xff]  }
 0x34b   : > { %v3667_v19 = vrot.slane %v8299_v49, 1  ;;  %v2764_v47 = vpop.f32.mrb[27].mxu1  ;;  %v4019_v9 = vmax.f32 %v3947_v3, 0.0  ;;  %v3004_v20 = vadd.f32 %v2358_v5, %v10157_v58  ;;  %8428 = vmatprep.subr.bf16.mxu1 %v9070_v18 }
 0x34c   : > { %v3663_v55 = vrot.slane %v2764_v47, 1  ;;  %v3302_v44 = vrot.slane %v3003_v43, 7  ;;  %2621 = vmatmul.mubr.bf16.gmra.mrb[96].mxu0 %v10171_v46  ;;  %8429 = vmatpush3.bf16.msra.mxu1 %v9070_v18 }
 0x34d   : > { %v10334_v37 = vsel %vm3619_vm1, %v3665_v53, %v3667_v19  ;;  %v10338_v8 = vpack.c.bf16 %v9377_v21, %v4019_v9  ;;  %4769 = vmatprep.mubr.bf16.mxu0 %v11792_v16 }
 0x34e   : > { %v10341_v7 = vsel %vm3619_vm1, %v3663_v55, %v3665_v53  ;;  %v3303_v14 = vsel %vm3276_vm0, %v3301_v36, %v3302_v44 }
 0x34f   : > { %v3492_v58 = vadd.f32 %v3303_v14, %v3004_v20  ;;  %v2362_v23 = vpop.f32.mrb[248].mxu0  ;;  %8369 = vmatmul.mubr.bf16.gmra.mrb[172].mxu1 %v10338_v8 }
 0x350   : > { %v8302_v42 = vpop.f32.mrb[28].mxu1  ;;  %v3006_v24 = vadd.f32 %v2362_v23, %v10166_v4  ;;  %v2364_v46 = vpop.f32.mrb[249].mxu0 }
 0x351   : > { %v2777_v1 = vpop.f32.mrb[29].mxu1  ;;  %v3871_v61 = vadd.f32 %v10308_v45, %v3492_v58  ;;  %v3007_v52 = vadd.f32 %v2364_v46, %v10169_v29  ;;  %v2366_v26 = vpop.f32.mrb[250].mxu0  ;;  %v3672_v17 = vrot.slane %v8302_v42, 1 }
 0x352   : > { %v8303_v62 = vpop.f32.mrb[30].mxu1  ;;  %v3304_v48 = vrot.slane %v3006_v24, 7  ;;  %v2368_v50 = vpop.f32.mrb[251].mxu0 }
 0x353   : > { %v3674_v3 = vrot.slane %v8303_v62, 1  ;;  %v2780_v49 = vpop.f32.mrb[31].mxu1  ;;  %v3950_v53 = vadd.f32 %v10262_v32, %v3871_v61 }
 0x354   : > { %v3670_v43 = vrot.slane %v2780_v49, 1  ;;  %v3305_v19 = vsel %vm3276_vm0, %v3302_v44, %v3304_v48  ;;  %4770 = vmatmul.mubr.bf16.vlgmr.msra.gmra.mrb[100].mxu0 %v10274_v10 }
 0x355   : > { %v10352_v4 = vsel %vm3619_vm1, %v3672_v17, %v3674_v3  ;;  %v4022_v45 = vmax.f32 %v3950_v53, 0.0  ;;  %v3493_v5 = vadd.f32 %v3305_v19, %v3007_v52  ;;  %4778 = vmatprep.mubr.bf16.mxu0 %v11792_v16 }
 0x356   : > { %v10356_v29 = vsel %vm3619_vm1, %v3670_v43, %v3672_v17 }
 0x357   : > { %v10360_v47 = vpack.c.bf16 %v4022_v45, %v9377_v21  ;;  %v3872_v9 = vadd.f32 %v10301_v59, %v3493_v5  ;;  %v2372_v20 = vpop.f32.mrb[252].mxu0 }
 0x358   : > { %v8306_v55 = vpop.f32.mrb[32].mxu1  ;;  %v3012_v36 = vadd.f32 %v2372_v20, %v10177_v31  ;;  %v2374_v44 = vpop.f32.mrb[253].mxu0 }
 0x359   : > { %v2793_v18 = vpop.f32.mrb[33].mxu1  ;;  %v3951_v14 = vadd.f32 %v10262_v32, %v3872_v9  ;;  %v2376_v58 = vpop.f32.mrb[254].mxu0  ;;  %8372 = vmatprep.mubr.bf16.mxu1 %v10360_v47  ;;  %v3679_v42 = vrot.slane %v8306_v55, 1 }
 0x35a   : > { %v8307_v23 = vpop.f32.mrb[34].mxu1  ;;  %v3015_v24 = vadd.f32 %v2376_v58, %v10180_v33  ;;  %v2378_v1 = vpop.f32.mrb[255].mxu0  ;;  %v3307_v62 = vrot.slane %v3012_v36, 7  ;;  %v9071_v33 = vld [vmem:[#allocation7 + $0x50] ss:$12 sps:$4 sm:$0xff]  }
 0x35b   : > { %v3681_v46 = vrot.slane %v8307_v23, 1  ;;  %v2796_v61 = vpop.f32.mrb[35].mxu1  ;;  %v4023_v52 = vmax.f32 %v3951_v14, 0.0  ;;  %v3016_v59 = vadd.f32 %v2378_v1, %v10183_v51  ;;  %8430 = vmatprep.subr.bf16.mxu1 %v9071_v33 }
 0x35c   : > { %v3677_v26 = vrot.slane %v2796_v61, 1  ;;  %v3308_v31 = vrot.slane %v3015_v24, 7  ;;  %4779 = vmatmul.mubr.bf16.gmra.mrb[104].mxu0 %v10278_v22  ;;  %8431 = vmatpush3.bf16.msra.mxu1 %v9071_v33 }
 0x35d   : > { %v10369_v48 = vsel %vm3619_vm1, %v3679_v42, %v3681_v46  ;;  %v10373_v17 = vpack.c.bf16 %v9377_v21, %v4023_v52  ;;  %4786 = vmatprep.mubr.bf16.mxu0 %v11792_v16 }
 0x35e   : > { %v10376_v3 = vsel %vm3619_vm1, %v3677_v26, %v3679_v42  ;;  %v3309_v50 = vsel %vm3276_vm0, %v3307_v62, %v3308_v31 }
 0x35f   : > { %v3496_v51 = vadd.f32 %v3309_v50, %v3016_v59  ;;  %v2382_v49 = vpop.f32.mrb[0].mxu0  ;;  %8373 = vmatmul.mubr.bf16.gmra.mrb[176].mxu1 %v10373_v17 }
 0x360   : > { %v8310_v53 = vpop.f32.mrb[36].mxu1  ;;  %v3018_v43 = vadd.f32 %v2382_v49, %v10188_v27  ;;  %v2384_v19 = vpop.f32.mrb[1].mxu0 }
 0x361   : > { %v2809_v45 = vpop.f32.mrb[37].mxu1  ;;  %v3875_v5 = vadd.f32 %v10322_v30, %v3496_v51  ;;  %v3019_v9 = vadd.f32 %v2384_v19, %v10191_v60  ;;  %v2386_v20 = vpop.f32.mrb[2].mxu0  ;;  %v3686_v44 = vrot.slane %v8310_v53, 1 }
 0x362   : > { %v8311_v55 = vpop.f32.mrb[38].mxu1  ;;  %v3310_v36 = vrot.slane %v3018_v43, 7  ;;  %v2388_v14 = vpop.f32.mrb[3].mxu0 }
 0x363   : > { %v3688_v18 = vrot.slane %v8311_v55, 1  ;;  %v2812_v58 = vpop.f32.mrb[39].mxu1  ;;  %v3954_v23 = vadd.f32 %v10262_v32, %v3875_v5 }
 0x364   : > { %v3684_v42 = vrot.slane %v2812_v58, 1  ;;  %v3311_v24 = vsel %vm3276_vm0, %v3308_v31, %v3310_v36  ;;  %4787 = vmatmul.mubr.bf16.gmra.mrb[108].mxu0 %v10293_v0 }
 0x365   : > { %v10387_v27 = vsel %vm3619_vm1, %v3686_v44, %v3688_v18  ;;  %v4026_v30 = vmax.f32 %v3954_v23, 0.0  ;;  %v3497_v46 = vadd.f32 %v3311_v24, %v3019_v9  ;;  %4795 = vmatprep.mubr.bf16.mxu0 %v11792_v16 }
 0x366   : > { %v10391_v60 = vsel %vm3619_vm1, %v3684_v42, %v3686_v44 }
 0x367   : > { %v10395_v1 = vpack.c.bf16 %v4026_v30, %v9377_v21  ;;  %v3876_v61 = vadd.f32 %v10318_v28, %v3497_v46  ;;  %v2392_v52 = vpop.f32.mrb[4].mxu0 }
 0x368   : > { %v8314_v59 = vpop.f32.mrb[40].mxu1  ;;  %v3024_v26 = vadd.f32 %v2392_v52, %v10196_v6  ;;  %v2394_v62 = vpop.f32.mrb[5].mxu0 }
 0x369   : > { %v2825_v31 = vpop.f32.mrb[41].mxu1  ;;  %v3955_v33 = vadd.f32 %v10262_v32, %v3876_v61  ;;  %v2396_v50 = vpop.f32.mrb[6].mxu0  ;;  %8376 = vmatprep.mubr.bf16.mxu1 %v10395_v1  ;;  %v3693_v49 = vrot.slane %v8314_v59, 1 }
 0x36a   : > { %v8315_v51 = vpop.f32.mrb[42].mxu1  ;;  %v3027_v53 = vadd.f32 %v2396_v50, %v10199_v63  ;;  %v2398_v19 = vpop.f32.mrb[7].mxu0  ;;  %v3313_v20 = vrot.slane %v3024_v26, 7  ;;  %v9072_v63 = vld [vmem:[#allocation7 + $0x68] ss:$12 sps:$4 sm:$0xff]  }
 0x36b   : > { %v3695_v43 = vrot.slane %v8315_v51, 1  ;;  %v2828_v45 = vpop.f32.mrb[43].mxu1  ;;  %v4027_v5 = vmax.f32 %v3955_v33, 0.0  ;;  %v3028_v28 = vadd.f32 %v2398_v19, %v10202_v15  ;;  %8432 = vmatprep.subr.bf16.mxu1 %v9072_v63 }
 0x36c   : > { %v3691_v9 = vrot.slane %v2828_v45, 1  ;;  %v3314_v6 = vrot.slane %v3027_v53, 7  ;;  %4796 = vmatmul.mubr.bf16.gmra.mrb[112].mxu0 %v10305_v38  ;;  %8433 = vmatpush3.bf16.msra.mxu1 %v9072_v63 }
 0x36d   : > { %v10404_v55 = vsel %vm3619_vm1, %v3693_v49, %v3695_v43  ;;  %v10408_v36 = vpack.c.bf16 %v9377_v21, %v4027_v5  ;;  %4803 = vmatprep.mubr.bf16.mxu0 %v11792_v16 }
 0x36e   : > { %v10411_v44 = vsel %vm3619_vm1, %v3691_v9, %v3693_v49  ;;  %v3315_v18 = vsel %vm3276_vm0, %v3313_v20, %v3314_v6 }
 0x36f   : > { %v3500_v15 = vadd.f32 %v3315_v18, %v3028_v28  ;;  %v2402_v14 = vpop.f32.mrb[8].mxu0  ;;  %8377 = vmatmul.mubr.bf16.gmra.mrb[180].mxu1 %v10408_v36 }
 0x370   : > { %v8318_v58 = vpop.f32.mrb[44].mxu1  ;;  %v3030_v23 = vadd.f32 %v2402_v14, %v10207_v39  ;;  %v2404_v42 = vpop.f32.mrb[9].mxu0 }
 0x371   : > { %v2841_v24 = vpop.f32.mrb[45].mxu1  ;;  %v3879_v30 = vadd.f32 %v10341_v7, %v3500_v15  ;;  %v3031_v46 = vadd.f32 %v2404_v42, %v10210_v2  ;;  %v2406_v61 = vpop.f32.mrb[10].mxu0  ;;  %v3700_v26 = vrot.slane %v8318_v58, 1 }
 0x372   : > { %v8319_v52 = vpop.f32.mrb[46].mxu1  ;;  %v3316_v59 = vrot.slane %v3030_v23, 7  ;;  %v2408_v31 = vpop.f32.mrb[11].mxu0 }
 0x373   : > { %v3702_v62 = vrot.slane %v8319_v52, 1  ;;  %v2844_v33 = vpop.f32.mrb[47].mxu1  ;;  %v3958_v50 = vadd.f32 %v10262_v32, %v3879_v30 }
 0x374   : > { %v3698_v51 = vrot.slane %v2844_v33, 1  ;;  %v3317_v49 = vsel %vm3276_vm0, %v3314_v6, %v3316_v59  ;;  %4804 = vmatmul.mubr.bf16.gmra.mrb[116].mxu0 %v10326_v11 }
 0x375   : > { %v10422_v39 = vsel %vm3619_vm1, %v3700_v26, %v3702_v62  ;;  %v4030_v7 = vmax.f32 %v3958_v50, 0.0  ;;  %v3501_v53 = vadd.f32 %v3317_v49, %v3031_v46  ;;  %4812 = vmatprep.mubr.bf16.mxu0 %v11792_v16 }
 0x376   : > { %v10426_v2 = vsel %vm3619_vm1, %v3698_v51, %v3700_v26 }
 0x377   : > { %v10430_v43 = vpack.c.bf16 %v4030_v7, %v9377_v21  ;;  %v3880_v19 = vadd.f32 %v10334_v37, %v3501_v53  ;;  %v2412_v45 = vpop.f32.mrb[12].mxu0 }
 0x378   : > { %v8322_v5 = vpop.f32.mrb[48].mxu1  ;;  %v3036_v28 = vadd.f32 %v2412_v45, %v10215_v12  ;;  %v2414_v9 = vpop.f32.mrb[13].mxu0 }
 0x379   : > { %v2857_v20 = vpop.f32.mrb[49].mxu1  ;;  %v3959_v6 = vadd.f32 %v10262_v32, %v3880_v19  ;;  %v2416_v63 = vpop.f32.mrb[14].mxu0  ;;  %8380 = vmatprep.mubr.bf16.mxu1 %v10430_v43  ;;  %v3707_v15 = vrot.slane %v8322_v5, 1 }
 0x37a   : > { %v8323_v18 = vpop.f32.mrb[50].mxu1  ;;  %v3039_v14 = vadd.f32 %v2416_v63, %v10218_v35  ;;  %v2418_v23 = vpop.f32.mrb[15].mxu0  ;;  %v3319_v46 = vrot.slane %v3036_v28, 7  ;;  %v9073_v35 = vld [vmem:[#allocation7 + $0x80] ss:$12 sps:$4 sm:$0xff]  }
 0x37b   : > { %v3709_v58 = vrot.slane %v8323_v18, 1  ;;  %v2860_v42 = vpop.f32.mrb[51].mxu1  ;;  %v4031_v24 = vmax.f32 %v3959_v6, 0.0  ;;  %v3040_v37 = vadd.f32 %v2418_v23, %v10221_v56  ;;  %8434 = vmatprep.subr.bf16.mxu1 %v9073_v35 }
 0x37c   : > { %v3705_v30 = vrot.slane %v2860_v42, 1  ;;  %v3320_v12 = vrot.slane %v3039_v14, 7  ;;  %4813 = vmatmul.mubr.bf16.gmra.mrb[120].mxu0 %v10338_v8  ;;  %8435 = vmatpush3.bf16.msra.mxu1 %v9073_v35 }
 0x37d   : > { %v10439_v61 = vsel %vm3619_vm1, %v3707_v15, %v3709_v58  ;;  %v10443_v52 = vpack.c.bf16 %v9377_v21, %v4031_v24  ;;  %4820 = vmatprep.mubr.bf16.mxu0 %v11792_v16 }
 0x37e   : > { %v10446_v59 = vsel %vm3619_vm1, %v3705_v30, %v3707_v15  ;;  %v3321_v26 = vsel %vm3276_vm0, %v3319_v46, %v3320_v12 }
 0x37f   : > { %v3504_v56 = vadd.f32 %v3321_v26, %v3040_v37  ;;  %v2422_v62 = vpop.f32.mrb[16].mxu0  ;;  %8381 = vmatmul.mubr.bf16.gmra.mrb[184].mxu1 %v10443_v52 }
 0x380   : > { %v8326_v31 = vpop.f32.mrb[52].mxu1  ;;  %v3042_v33 = vadd.f32 %v2422_v62, %v10226_v54  ;;  %v2424_v50 = vpop.f32.mrb[17].mxu0 }
 0x381   : > { %v2873_v51 = vpop.f32.mrb[53].mxu1  ;;  %v3883_v49 = vadd.f32 %v10356_v29, %v3504_v56  ;;  %v3043_v7 = vadd.f32 %v2424_v50, %v10229_v25  ;;  %v2426_v53 = vpop.f32.mrb[18].mxu0  ;;  %v3714_v5 = vrot.slane %v8326_v31, 1 }
 0x382   : > { %v8327_v19 = vpop.f32.mrb[54].mxu1  ;;  %v3322_v45 = vrot.slane %v3042_v33, 7  ;;  %v2428_v9 = vpop.f32.mrb[19].mxu0 }
 0x383   : > { %v3716_v28 = vrot.slane %v8327_v19, 1  ;;  %v2876_v20 = vpop.f32.mrb[55].mxu1  ;;  %v3962_v6 = vadd.f32 %v10262_v32, %v3883_v49  ;;  %v11813_v9 = vld [vmem:[#allocation41_spill] sm:$0xff] }
 0x384   : > { %v3712_v63 = vrot.slane %v2876_v20, 1  ;;  %v3323_v18 = vsel %vm3276_vm0, %v3320_v12, %v3322_v45  ;;  %4821 = vmatmul.mubr.bf16.gmra.mrb[124].mxu0 %v10360_v47 }
 0x385   : > { %v10457_v54 = vsel %vm3619_vm1, %v3714_v5, %v3716_v28  ;;  %v4034_v29 = vmax.f32 %v3962_v6, 0.0  ;;  %v3505_v15 = vadd.f32 %v3323_v18, %v3043_v7  ;;  %4829 = vmatprep.mubr.bf16.mxu0 %v11792_v16 }
 0x386   : > { %v10461_v25 = vsel %vm3619_vm1, %v3712_v63, %v3714_v5 }
 0x387   : > { %v10465_v14 = vpack.c.bf16 %v4034_v29, %v9377_v21  ;;  %v3884_v58 = vadd.f32 %v10352_v4, %v3505_v15  ;;  %v2432_v23 = vpop.f32.mrb[20].mxu0  ;;  %v11814_v29 = vld [vmem:[#allocation42_spill] sm:$0xff] }
 0x388   : > { %v8330_v42 = vpop.f32.mrb[56].mxu1  ;;  %v3048_v24 = vadd.f32 %v2432_v23, %v10234_v13  ;;  %v2434_v37 = vpop.f32.mrb[21].mxu0 }
 0x389   : > { %v2889_v30 = vpop.f32.mrb[57].mxu1  ;;  %v3963_v46 = vadd.f32 %v10262_v32, %v3884_v58  ;;  %v2436_v12 = vpop.f32.mrb[22].mxu0  ;;  %8384 = vmatprep.mubr.bf16.mxu1 %v10465_v14  ;;  %v3721_v26 = vrot.slane %v8330_v42, 1 }
 0x38a   : > { %v8331_v35 = vpop.f32.mrb[58].mxu1  ;;  %v3051_v56 = vadd.f32 %v2436_v12, %v10237_v41  ;;  %v2438_v31 = vpop.f32.mrb[23].mxu0  ;;  %v3325_v49 = vrot.slane %v3048_v24, 7  ;;  %v9074_v41 = vld [vmem:[#allocation7 + $0x98] ss:$12 sps:$4 sm:$0xff]  }
 0x38b   : > { %v3723_v62 = vrot.slane %v8331_v35, 1  ;;  %v2892_v33 = vpop.f32.mrb[59].mxu1  ;;  %v4035_v50 = vmax.f32 %v3963_v46, 0.0  ;;  %v3052_v4 = vadd.f32 %v2438_v31, %v10240_v57  ;;  %8436 = vmatprep.subr.bf16.mxu1 %v9074_v41 }
 0x38c   : > { %v3719_v51 = vrot.slane %v2892_v33, 1  ;;  %v3326_v13 = vrot.slane %v3051_v56, 7  ;;  %4830 = vmatmul.mubr.bf16.gmra.mrb[128].mxu0 %v10373_v17  ;;  %8437 = vmatpush3.bf16.msra.mxu1 %v9074_v41 }
 0x38d   : > { %v10474_v7 = vsel %vm3619_vm1, %v3721_v26, %v3723_v62  ;;  %v10478_v53 = vpack.c.bf16 %v9377_v21, %v4035_v50  ;;  %4837 = vmatprep.mubr.bf16.mxu0 %v11792_v16 }
 0x38e   : > { %v10481_v19 = vsel %vm3619_vm1, %v3719_v51, %v3721_v26  ;;  %v3327_v45 = vsel %vm3276_vm0, %v3325_v49, %v3326_v13 }
 0x38f   : > { %v3508_v57 = vadd.f32 %v3327_v45, %v3052_v4  ;;  %v2442_v5 = vpop.f32.mrb[24].mxu0  ;;  %8385 = vmatmul.mubr.bf16.gmra.mrb[188].mxu1 %v10478_v53 }
 0x390   : > { %v8334_v28 = vpop.f32.mrb[60].mxu1  ;;  %v3054_v20 = vadd.f32 %v2442_v5, %v11813_v9  ;;  %v2444_v6 = vpop.f32.mrb[25].mxu0 }
 0x391   : > { %v2905_v63 = vpop.f32.mrb[61].mxu1  ;;  %v3887_v18 = vadd.f32 %v10376_v3, %v3508_v57  ;;  %v3055_v15 = vadd.f32 %v2444_v6, %v11814_v29  ;;  %v2446_v58 = vpop.f32.mrb[26].mxu0  ;;  %v3728_v24 = vrot.slane %v8334_v28, 1  ;;  %v9075_v28 = vld [vmem:[#allocation7 + $0xb0] ss:$12 sps:$4 sm:$0xff]  }
 0x392   : > { %v8335_v23 = vpop.f32.mrb[62].mxu1  ;;  %v3328_v42 = vrot.slane %v3054_v20, 7  ;;  %v2448_v30 = vpop.f32.mrb[27].mxu0  ;;  %v11815_v29 = vld [vmem:[#allocation43_spill] sm:$0xff]  ;;  %8438 = vmatprep.subr.bf16.mxu1 %v9075_v28 }
 0x393   : > { %v3730_v37 = vrot.slane %v8335_v23, 1  ;;  %v2908_v46 = vpop.f32.mrb[63].mxu1  ;;  %v3966_v12 = vadd.f32 %v10262_v32, %v3887_v18  ;;  %8439 = vmatpush3.bf16.msra.mxu1 %v9075_v28 }
 0x394   : > { %v3726_v35 = vrot.slane %v2908_v46, 1  ;;  %v3329_v26 = vsel %vm3276_vm0, %v3326_v13, %v3328_v42  ;;  %4838 = vmatmul.mubr.bf16.gmra.mrb[132].mxu0 %v10395_v1 }
 0x395   : > { %v10492_v56 = vsel %vm3619_vm1, %v3728_v24, %v3730_v37  ;;  %v4038_v3 = vmax.f32 %v3966_v12, 0.0  ;;  %v3509_v62 = vadd.f32 %v3329_v26, %v3055_v15  ;;  %4846 = vmatprep.mubr.bf16.mxu0 %v11792_v16 }
 0x396   : > { %v10496_v31 = vsel %vm3619_vm1, %v3726_v35, %v3728_v24  ;;  %v11816_v35 = vld [vmem:[#allocation44_spill] sm:$0xff] }
 0x397   : > { %v10500_v33 = vpack.c.bf16 %v4038_v3, %v9377_v21  ;;  %v3888_v50 = vadd.f32 %v10369_v48, %v3509_v62  ;;  %v2452_v4 = vpop.f32.mrb[28].mxu0 }
 0x398   : > { %v8338_v51 = vpop.f32.mrb[64].mxu1  ;;  %v3060_v49 = vadd.f32 %v2452_v4, %v9897_v40  ;;  %v2454_v13 = vpop.f32.mrb[29].mxu0  ;;  %v11817_v4 = vld [vmem:[#allocation45_spill] sm:$0xff] }
 0x399   : > { %v2921_v41 = vpop.f32.mrb[65].mxu1  ;;  %v3967_v45 = vadd.f32 %v10262_v32, %v3888_v50  ;;  %v2456_v57 = vpop.f32.mrb[30].mxu0  ;;  %8388 = vmatprep.mubr.bf16.mxu1 %v10500_v33  ;;  %v3735_v9 = vrot.slane %v8338_v51, 1 }
 0x39a   : > { %v8339_v5 = vpop.f32.mrb[66].mxu1  ;;  %v3063_v20 = vadd.f32 %v2456_v57, %v9899_v34  ;;  %v2458_v63 = vpop.f32.mrb[31].mxu0  ;;  %v3331_v40 = vrot.slane %v3060_v49, 7 }
 0x39b   : > { %v3737_v6 = vrot.slane %v8339_v5, 1  ;;  %v2924_v18 = vpop.f32.mrb[67].mxu1  ;;  %v4039_v48 = vmax.f32 %v3967_v45, 0.0  ;;  %v3064_v15 = vadd.f32 %v2458_v63, %v11815_v29  ;;  %v9081_v29 = vld [vmem:[#allocation7 + $0x184] ss:$12 sps:$4 sm:$0xff]  }
 0x39c   : > { %v3733_v58 = vrot.slane %v2924_v18, 1  ;;  %v3332_v23 = vrot.slane %v3063_v20, 7  ;;  %4847 = vmatmul.mubr.bf16.gmra.mrb[136].mxu0 %v10408_v36  ;;  %v9078_v20 = vld [vmem:[#allocation7 + $0x4] ss:$12 sps:$4 sm:$0xff]   ;;  %6181 = vmatprep.subr.bf16.mxu1 %v9081_v29 }
 0x39d   : > { %v10509_v42 = vsel %vm3619_vm1, %v3735_v9, %v3737_v6  ;;  %v10513_v24 = vpack.c.bf16 %v9377_v21, %v4039_v48  ;;  %4854 = vmatprep.mubr.bf16.mxu0 %v11792_v16  ;;  %5443 = vmatprep.subr.bf16.mxu0 %v9078_v20 }
 0x39e   : > { %v10516_v34 = vsel %vm3619_vm1, %v3733_v58, %v3735_v9  ;;  %v3333_v37 = vsel %vm3276_vm0, %v3331_v40, %v3332_v23  ;;  %v9076_v9 = vld [vmem:[#allocation7] ss:$12 sps:$4 sm:$0xff]  }
 0x39f   : > { %v3512_v30 = vadd.f32 %v3333_v37, %v3064_v15  ;;  %v2462_v46 = vpop.f32.mrb[32].mxu0  ;;  %8389 = vmatmul.mubr.bf16.gmra.mrb[192].mxu1 %v10513_v24  ;;  %5444 = vmatpush1.bf16.msra.mxu0 %v9076_v9  ;;  %v11818_v15 = vld [vmem:[#allocation46_spill] sm:$0xff] }
 0x3a0   : > { %v8342_v12 = vpop.f32.mrb[160].mxu1  ;;  %v3066_v26 = vadd.f32 %v2462_v46, %v11816_v35  ;;  %v2464_v3 = vpop.f32.mrb[33].mxu0 }
 0x3a1   : > { %v2937_v62 = vpop.f32.mrb[161].mxu1  ;;  %v3891_v50 = vadd.f32 %v10391_v60, %v3512_v30  ;;  %v3067_v51 = vadd.f32 %v2464_v3, %v11817_v4  ;;  %v2466_v49 = vpop.f32.mrb[34].mxu0  ;;  %v11819_v30 = vld [vmem:[#allocation47_spill] sm:$0xff] }
 0x3a2   : > { %v8343_v13 = vpop.f32.mrb[162].mxu1  ;;  %v3334_v41 = vrot.slane %v3066_v26, 7  ;;  %v2468_v45 = vpop.f32.mrb[35].mxu0  ;;  %v11820_v26 = vld [vmem:[#allocation48_spill] sm:$0xff] }
 0x3a3   : > { %v2940_v57 = vpop.f32.mrb[163].mxu1  ;;  %v3970_v5 = vadd.f32 %v10262_v32, %v3891_v50  ;;  %v11821_v13 = vld [vmem:[#allocation49_spill] sm:$0xff] }
 0x3a4   : > { %v3335_v28 = vsel %vm3276_vm0, %v3332_v23, %v3334_v41  ;;  %4855 = vmatmul.mubr.bf16.gmra.mrb[140].mxu0 %v10430_v43 }
 0x3a5   : > { %v4042_v6 = vmax.f32 %v3970_v5, 0.0  ;;  %v3513_v63 = vadd.f32 %v3335_v28, %v3067_v51  ;;  %4863 = vmatprep.mubr.bf16.mxu0 %v11792_v16  ;;  %v11822_v5 = vld [vmem:[#allocation50_spill] sm:$0xff] }
 0x3a7   : > { %v10529_v60 = vpack.c.bf16 %v4042_v6, %v9377_v21  ;;  %v3892_v18 = vadd.f32 %v10387_v27, %v3513_v63  ;;  %v2472_v48 = vpop.f32.mrb[36].mxu0 }
 0x3a8   : > { %v3072_v58 = vadd.f32 %v2472_v48, %v11818_v15  ;;  %v2474_v40 = vpop.f32.mrb[37].mxu0  ;;  %v9087_v15 = vld [vmem:[#allocation7 + $0x1c] ss:$12 sps:$4 sm:$0xff]  }
 0x3a9   : > { %v3971_v23 = vadd.f32 %v10262_v32, %v3892_v18  ;;  %v2476_v37 = vpop.f32.mrb[38].mxu0  ;;  %8392 = vmatprep.mubr.bf16.mxu1 %v10529_v60  ;;  %5445 = vmatprep.subr.bf16.mxu0 %v9087_v15 }
 0x3aa   : > { %v3075_v46 = vadd.f32 %v2476_v37, %v11819_v30  ;;  %v2478_v12 = vpop.f32.mrb[39].mxu0  ;;  %v3337_v62 = vrot.slane %v3072_v58, 7 }
 0x3ab   : > { %v4043_v35 = vmax.f32 %v3971_v23, 0.0  ;;  %v3076_v3 = vadd.f32 %v2478_v12, %v11820_v26  ;;  %v11823_v23 = vld [vmem:[#allocation51_spill] sm:$0xff]  ;;  %v11824_v26 = vld [vmem:[#allocation52_spill] sm:$0xff] }
 0x3ac   : > { %v3338_v27 = vrot.slane %v3075_v46, 7  ;;  %4864 = vmatmul.mubr.bf16.gmra.mrb[144].mxu0 %v10443_v52  ;;  %v9085_v46 = vld [vmem:[#allocation7 + $0x18] ss:$12 sps:$4 sm:$0xff]  }
 0x3ad   : > { %v10539_v50 = vpack.c.bf16 %v9377_v21, %v4043_v35  ;;  %4871 = vmatprep.mubr.bf16.mxu0 %v11792_v16  ;;  %5446 = vmatpush1.bf16.msra.mxu0 %v9085_v46  ;;  %v9094_v46 = vld [vmem:[#allocation7 + $0x60] ss:$12 sps:$4 sm:$0xff]  }
 0x3ae   : > { %v3339_v4 = vsel %vm3276_vm0, %v3337_v62, %v3338_v27 }
 0x3af   : > { %v3516_v51 = vadd.f32 %v3339_v4, %v3076_v3  ;;  %v2482_v49 = vpop.f32.mrb[40].mxu0  ;;  %8393 = vmatmul.mubr.bf16.gmra.mrb[196].mxu1 %v10539_v50 }
 0x3b0   : > { %v3078_v41 = vadd.f32 %v2482_v49, %v11821_v13  ;;  %v2484_v45 = vpop.f32.mrb[41].mxu0 }
 0x3b1   : > { %v3895_v57 = vadd.f32 %v10411_v44, %v3516_v51  ;;  %v3079_v28 = vadd.f32 %v2484_v45, %v11822_v5  ;;  %v2486_v9 = vpop.f32.mrb[42].mxu0  ;;  %v11825_v51 = vld [vmem:[#allocation53_spill] sm:$0xff] }
 0x3b2   : > { %v3340_v20 = vrot.slane %v3078_v41, 7  ;;  %v2488_v6 = vpop.f32.mrb[43].mxu0  ;;  %v9091_v9 = vld [vmem:[#allocation7 + $0x48] ss:$12 sps:$4 sm:$0xff]  }
 0x3b3   : > { %v3974_v63 = vadd.f32 %v10262_v32, %v3895_v57  ;;  %v9093_v57 = vld [vmem:[#allocation7 + $0x4c] ss:$12 sps:$4 sm:$0xff]  }
 0x3b4   : > { %v3341_v18 = vsel %vm3276_vm0, %v3338_v27, %v3340_v20  ;;  %4872 = vmatmul.mubr.bf16.gmra.mrb[148].mxu0 %v10465_v14  ;;  %v9090_v27 = vld [vmem:[#allocation7 + $0x34] ss:$12 sps:$4 sm:$0xff]   ;;  %v11827_v20 = vld [vmem:[#allocation54_spill] sm:$0xff] }
 0x3b5   : > { %v4046_v48 = vmax.f32 %v3974_v63, 0.0  ;;  %v3517_v29 = vadd.f32 %v3341_v18, %v3079_v28  ;;  %4880 = vmatprep.mubr.bf16.mxu0 %v11792_v16  ;;  %5447 = vmatprep.subr.bf16.mxu0 %v9090_v27 }
 0x3b7   : > { %v10552_v58 = vpack.c.bf16 %v4046_v48, %v9377_v21  ;;  %v3896_v44 = vadd.f32 %v10404_v55, %v3517_v29  ;;  %v2492_v40 = vpop.f32.mrb[44].mxu0  ;;  %v9088_v55 = vld [vmem:[#allocation7 + $0x30] ss:$12 sps:$4 sm:$0xff]  }
 0x3b8   : > { %v3084_v37 = vadd.f32 %v2492_v40, %v11823_v23  ;;  %v2494_v30 = vpop.f32.mrb[45].mxu0  ;;  %5448 = vmatpush1.bf16.msra.mxu0 %v9088_v55  ;;  %v11828_v48 = vld [vmem:[#allocation55_spill] sm:$0xff]  ;;  %v9100_v55 = vld [vmem:[#allocation7 + $0x78] ss:$12 sps:$4 sm:$0xff]  }
 0x3b9   : > { %v3975_v12 = vadd.f32 %v10262_v32, %v3896_v44  ;;  %v2496_v35 = vpop.f32.mrb[46].mxu0  ;;  %8396 = vmatprep.mubr.bf16.mxu1 %v10552_v58  ;;  %5449 = vmatprep.subr.bf16.mxu0 %v9093_v57  ;;  %v9096_v23 = vld [vmem:[#allocation7 + $0x64] ss:$12 sps:$4 sm:$0xff]  }
 0x3ba   : > { %v3087_v3 = vadd.f32 %v2496_v35, %v11824_v26  ;;  %v2498_v62 = vpop.f32.mrb[47].mxu0  ;;  %v3343_v13 = vrot.slane %v3084_v37, 7  ;;  %v10573_v37 = vld [vmem:[%s11697_s2] ss:$0 sm:$0xff]  ;;  %v9102_v26 = vld [vmem:[#allocation7 + $0x7c] ss:$12 sps:$4 sm:$0xff]  }
 0x3bb   : > { %v4047_v4 = vmax.f32 %v3975_v12, 0.0  ;;  %v3088_v49 = vadd.f32 %v2498_v62, %v11825_v51 }
 0x3bc   : > { %v3344_v41 = vrot.slane %v3087_v3, 7  ;;  %4881 = vmatmul.mubr.bf16.gmra.mrb[152].mxu0 %v10478_v53 }
 0x3bd   : > { %v10562_v45 = vpack.c.bf16 %v9377_v21, %v4047_v4  ;;  %4888 = vmatprep.mubr.bf16.mxu0 %v11792_v16  ;;  %5450 = vmatpush1.bf16.msra.mxu0 %v9091_v9  ;;  %v11829_v4 = vld [vmem:[#allocation56_spill] sm:$0xff] }
 0x3be   : > { %v3345_v32 = vsel %vm3276_vm0, %v3343_v13, %v3344_v41  ;;  %5451 = vmatprep.subr.bf16.mxu0 %v9096_v23  ;;  %v9106_v23 = vld [vmem:[#allocation7 + $0xa8] ss:$12 sps:$4 sm:$0xff]  }
 0x3bf   : > { %11826 = vst [vmem:[#allocation21_spill] sm:$0xff] %v10562_v45  ;;  %v3520_v5 = vadd.f32 %v3345_v32, %v3088_v49  ;;  %v2502_v28 = vpop.f32.mrb[48].mxu0  ;;  %8397 = vmatmul.mubr.bf16.gmra.mrb[200].mxu1 %v10562_v45  ;;  %v11830_v32 = vld [vmem:[#allocation57_spill] sm:$0xff] }
 0x3c0   : > { %v3090_v6 = vadd.f32 %v2502_v28, %v11827_v20  ;;  %v2504_v63 = vpop.f32.mrb[49].mxu0  ;;  %v9105_v28 = vld [vmem:[#allocation7 + $0x94] ss:$12 sps:$4 sm:$0xff]   ;;  %v11831_v20 = vld [vmem:[#allocation58_spill] sm:$0xff] }
 0x3c1   : > { %v3899_v18 = vadd.f32 %v10426_v2, %v3520_v5  ;;  %v3091_v29 = vadd.f32 %v2504_v63, %v11828_v48  ;;  %v2506_v15 = vpop.f32.mrb[50].mxu0  ;;  %5452 = vmatpush1.bf16.msra.mxu0 %v9094_v46 }
 0x3c2   : > { %v3346_v44 = vrot.slane %v3090_v6, 7  ;;  %v2508_v40 = vpop.f32.mrb[51].mxu0  ;;  %5453 = vmatprep.subr.bf16.mxu0 %v9102_v26  ;;  %v9108_v15 = vld [vmem:[#allocation7 + $0xac] ss:$12 sps:$4 sm:$0xff]  }
 0x3c3   : > { %v3978_v30 = vadd.f32 %v10573_v37, %v3899_v18 }
 0x3c4   : > { %v3347_v12 = vsel %vm3276_vm0, %v3344_v41, %v3346_v44  ;;  %4889 = vmatmul.mubr.bf16.gmra.mrb[156].mxu0 %v10500_v33 }
 0x3c5   : > { %v4050_v2 = vmax.f32 %v3978_v30, 0.0  ;;  %v3521_v35 = vadd.f32 %v3347_v12, %v3091_v29  ;;  %4897 = vmatprep.mubr.bf16.mxu0 %v11792_v16  ;;  %5454 = vmatpush1.bf16.msra.mxu0 %v9100_v55  ;;  %v11833_v30 = vld [vmem:[#allocation59_spill] sm:$0xff] }
 0x3c6   : > { %5455 = vmatprep.subr.bf16.mxu0 %v9105_v28 }
 0x3c7   : > { %v10580_v3 = vpack.c.bf16 %v4050_v2, %v9377_v21  ;;  %v3900_v62 = vadd.f32 %v10422_v39, %v3521_v35  ;;  %v2512_v27 = vpop.f32.mrb[52].mxu0  ;;  %v9103_v39 = vld [vmem:[#allocation7 + $0x90] ss:$12 sps:$4 sm:$0xff]  }
 0x3c8   : > { %v3096_v51 = vadd.f32 %v2512_v27, %v11829_v4  ;;  %v2514_v49 = vpop.f32.mrb[53].mxu0  ;;  %v11834_v35 = vld [vmem:[#allocation60_spill] sm:$0xff] }
 0x3c9   : > { %v3979_v13 = vadd.f32 %v10573_v37, %v3900_v62  ;;  %v2516_v41 = vpop.f32.mrb[54].mxu0  ;;  %8400 = vmatprep.mubr.bf16.mxu1 %v10580_v3  ;;  %5456 = vmatpush1.bf16.msra.mxu0 %v9103_v39 }
 0x3ca   : > { %v3099_v57 = vadd.f32 %v2516_v41, %v11830_v32  ;;  %v2518_v5 = vpop.f32.mrb[55].mxu0  ;;  %v3349_v63 = vrot.slane %v3096_v51, 7  ;;  %5457 = vmatprep.subr.bf16.mxu0 %v9108_v15 }
 0x3cb   : > { %v4051_v9 = vmax.f32 %v3979_v13, 0.0  ;;  %v3100_v6 = vadd.f32 %v2518_v5, %v11831_v20 }
 0x3cc   : > { %v3350_v18 = vrot.slane %v3099_v57, 7  ;;  %4898 = vmatmul.mubr.bf16.gmra.mrb[160].mxu0 %v10513_v24  ;;  %v11836_v57 = vld [vmem:[#allocation61_spill] sm:$0xff] }
 0x3cd   : > { %v10590_v48 = vpack.c.bf16 %v9377_v21, %v4051_v9  ;;  %4905 = vmatprep.mubr.bf16.mxu0 %v11792_v16  ;;  %5458 = vmatpush1.bf16.msra.mxu0 %v9106_v23 }
 0x3ce   : > { %v3351_v29 = vsel %vm3276_vm0, %v3349_v63, %v3350_v18 }
 0x3cf   : > { %11832 = vst [vmem:[#allocation22_spill] sm:$0xff] %v10590_v48  ;;  %v3524_v44 = vadd.f32 %v3351_v29, %v3100_v6  ;;  %v2522_v40 = vpop.f32.mrb[56].mxu0  ;;  %8401 = vmatmul.mubr.bf16.gmra.mrb[204].mxu1 %v10590_v48  ;;  %v11837_v6 = vld [vmem:[#allocation62_spill] sm:$0xff]  ;;  %v11838_v29 = vld [vmem:[#allocation63_spill] sm:$0xff] }
 0x3d0   : > { %v3102_v46 = vadd.f32 %v2522_v40, %v11833_v30  ;;  %v2524_v12 = vpop.f32.mrb[57].mxu0 }
 0x3d1   : > { %v3903_v2 = vadd.f32 %v10446_v59, %v3524_v44  ;;  %v3103_v26 = vadd.f32 %v2524_v12, %v11834_v35  ;;  %v2526_v62 = vpop.f32.mrb[58].mxu0  ;;  %v11840_v12 = vld [vmem:[#allocation64_spill] sm:$0xff] }
 0x3d2   : > { %v3352_v27 = vrot.slane %v3102_v46, 7  ;;  %v2528_v4 = vpop.f32.mrb[59].mxu0  ;;  %v11841_v62 = vld [vmem:[#allocation65_spill] sm:$0xff] }
 0x3d3   : > { %v3982_v51 = vadd.f32 %v10573_v37, %v3903_v2 }
 0x3d4   : > { %v3353_v49 = vsel %vm3276_vm0, %v3350_v18, %v3352_v27  ;;  %4906 = vmatmul.mubr.bf16.gmra.mrb[164].mxu0 %v10529_v60 }
 0x3d5   : > { %v4054_v55 = vmax.f32 %v3982_v51, 0.0  ;;  %v3525_v13 = vadd.f32 %v3353_v49, %v3103_v26  ;;  %4914 = vmatprep.mubr.bf16.mxu0 %v11792_v16 }
 0x3d7   : > { %v10603_v41 = vpack.c.bf16 %v4054_v55, %v9377_v21  ;;  %v3904_v59 = vadd.f32 %v10439_v61, %v3525_v13  ;;  %v2532_v32 = vpop.f32.mrb[60].mxu0 }
 0x3d8   : > { %v3108_v5 = vadd.f32 %v2532_v32, %v11836_v57  ;;  %v2534_v28 = vpop.f32.mrb[61].mxu0 }
 0x3d9   : > { %11835 = vst [vmem:[#allocation23_spill] sm:$0xff] %v10603_v41  ;;  %v3983_v9 = vadd.f32 %v10573_v37, %v3904_v59  ;;  %v2536_v20 = vpop.f32.mrb[62].mxu0  ;;  %8404 = vmatprep.mubr.bf16.mxu1 %v10603_v41  ;;  %v11843_v28 = vld [vmem:[#allocation66_spill] sm:$0xff] }
 0x3da   : > { %v3111_v39 = vadd.f32 %v2536_v20, %v11837_v6  ;;  %v2538_v63 = vpop.f32.mrb[63].mxu0  ;;  %v3355_v44 = vrot.slane %v3108_v5, 7 }
 0x3db   : > { %v4055_v18 = vmax.f32 %v3983_v9, 0.0  ;;  %v3112_v15 = vadd.f32 %v2538_v63, %v11838_v29  ;;  %v11844_v63 = vld [vmem:[#allocation67_spill] sm:$0xff] }
 0x3dc   : > { %v3356_v40 = vrot.slane %v3111_v39, 7  ;;  %4915 = vmatmul.mubr.bf16.gmra.mrb[168].mxu0 %v10539_v50 }
 0x3dd   : > { %v10613_v61 = vpack.c.bf16 %v9377_v21, %v4055_v18  ;;  %4922 = vmatprep.mubr.bf16.mxu0 %v11792_v16 }
 0x3de   : > { %v3357_v23 = vsel %vm3276_vm0, %v3355_v44, %v3356_v40  ;;  %v11845_v44 = vld [vmem:[#allocation68_spill] sm:$0xff] }
 0x3df   : > { %11839 = vst [vmem:[#allocation24_spill] sm:$0xff] %v10613_v61  ;;  %v3528_v30 = vadd.f32 %v3357_v23, %v3112_v15  ;;  %v2542_v46 = vpop.f32.mrb[64].mxu0  ;;  %8405 = vmatmul.mubr.bf16.gmra.mrb[208].mxu1 %v10613_v61 }
 0x3e0   : > { %v3114_v2 = vadd.f32 %v2542_v46, %v11840_v12  ;;  %v2544_v35 = vpop.f32.mrb[65].mxu0 }
 0x3e1   : > { %v3907_v26 = vadd.f32 %v10461_v25, %v3528_v30  ;;  %v3115_v27 = vadd.f32 %v2544_v35, %v11841_v62  ;;  %v2546_v4 = vpop.f32.mrb[66].mxu0  ;;  %v11847_v35 = vld [vmem:[#allocation69_spill] sm:$0xff] }
 0x3e2   : > { %v3358_v51 = vrot.slane %v3114_v2, 7  ;;  %v2548_v49 = vpop.f32.mrb[67].mxu0  ;;  %v11848_v4 = vld [vmem:[#allocation70_spill] sm:$0xff] }
 0x3e3   : > { %v3986_v55 = vadd.f32 %v10573_v37, %v3907_v26 }
 0x3e4   : > { %v3359_v13 = vsel %vm3276_vm0, %v3356_v40, %v3358_v51  ;;  %4923 = vmatmul.mubr.bf16.gmra.mrb[172].mxu0 %v10552_v58 }
 0x3e5   : > { %v4058_v59 = vmax.f32 %v3986_v55, 0.0  ;;  %v3529_v32 = vadd.f32 %v3359_v13, %v3115_v27  ;;  %4931 = vmatprep.mubr.bf16.mxu0 %v11792_v16 }
 0x3e7   : > { %v10626_v57 = vpack.c.bf16 %v4058_v59, %v9377_v21  ;;  %v3908_v25 = vadd.f32 %v10457_v54, %v3529_v32  ;;  %v2552_v5 = vpop.f32.mrb[68].mxu0 }
 0x3e8   : > { %v3120_v9 = vadd.f32 %v2552_v5, %v11843_v28  ;;  %v2554_v20 = vpop.f32.mrb[69].mxu0 }
 0x3e9   : > { %11842 = vst [vmem:[#allocation25_spill] sm:$0xff] %v10626_v57  ;;  %v3987_v6 = vadd.f32 %v10573_v37, %v3908_v25  ;;  %v2556_v39 = vpop.f32.mrb[70].mxu0  ;;  %8408 = vmatprep.mubr.bf16.mxu1 %v10626_v57  ;;  %v11850_v20 = vld [vmem:[#allocation71_spill] sm:$0xff] }
 0x3ea   : > { %v3123_v18 = vadd.f32 %v2556_v39, %v11844_v63  ;;  %v2558_v29 = vpop.f32.mrb[71].mxu0  ;;  %v3361_v23 = vrot.slane %v3120_v9, 7 }
 0x3eb   : > { %v4059_v15 = vmax.f32 %v3987_v6, 0.0  ;;  %v3124_v40 = vadd.f32 %v2558_v29, %v11845_v44  ;;  %v11851_v29 = vld [vmem:[#allocation72_spill] sm:$0xff] }
 0x3ec   : > { %v3362_v30 = vrot.slane %v3123_v18, 7  ;;  %4932 = vmatmul.mubr.bf16.gmra.mrb[176].mxu0 %v10562_v45 }
 0x3ed   : > { %v10636_v54 = vpack.c.bf16 %v9377_v21, %v4059_v15  ;;  %4939 = vmatprep.mubr.bf16.mxu0 %v11792_v16 }
 0x3ee   : > { %v3363_v46 = vsel %vm3276_vm0, %v3361_v23, %v3362_v30  ;;  %v11852_v23 = vld [vmem:[#allocation73_spill] sm:$0xff] }
 0x3ef   : > { %11846 = vst [vmem:[#allocation26_spill] sm:$0xff] %v10636_v54  ;;  %v3532_v12 = vadd.f32 %v3363_v46, %v3124_v40  ;;  %v2562_v2 = vpop.f32.mrb[72].mxu0  ;;  %8409 = vmatmul.mubr.bf16.gmra.mrb[212].mxu1 %v10636_v54 }
 0x3f0   : > { %v3126_v26 = vadd.f32 %v2562_v2, %v11847_v35  ;;  %v2564_v62 = vpop.f32.mrb[73].mxu0 }
 0x3f1   : > { %v3911_v27 = vadd.f32 %v10481_v19, %v3532_v12  ;;  %v3127_v51 = vadd.f32 %v2564_v62, %v11848_v4  ;;  %v2566_v49 = vpop.f32.mrb[74].mxu0  ;;  %v11854_v62 = vld [vmem:[#allocation74_spill] sm:$0xff] }
 0x3f2   : > { %v3364_v55 = vrot.slane %v3126_v26, 7  ;;  %v2568_v13 = vpop.f32.mrb[75].mxu0  ;;  %v11855_v49 = vld [vmem:[#allocation75_spill] sm:$0xff] }
 0x3f3   : > { %v3990_v59 = vadd.f32 %v10573_v37, %v3911_v27 }
 0x3f4   : > { %v3365_v32 = vsel %vm3276_vm0, %v3362_v30, %v3364_v55  ;;  %4940 = vmatmul.mubr.bf16.gmra.mrb[180].mxu0 %v10580_v3 }
 0x3f5   : > { %v4062_v25 = vmax.f32 %v3990_v59, 0.0  ;;  %v3533_v5 = vadd.f32 %v3365_v32, %v3127_v51  ;;  %4948 = vmatprep.mubr.bf16.mxu0 %v11792_v16 }
 0x3f7   : > { %v10649_v28 = vpack.c.bf16 %v4062_v25, %v9377_v21  ;;  %v3912_v19 = vadd.f32 %v10474_v7, %v3533_v5  ;;  %v2572_v9 = vpop.f32.mrb[76].mxu0 }
 0x3f8   : > { %v3132_v6 = vadd.f32 %v2572_v9, %v11850_v20  ;;  %v2574_v39 = vpop.f32.mrb[77].mxu0 }
 0x3f9   : > { %11849 = vst [vmem:[#allocation27_spill] sm:$0xff] %v10649_v28  ;;  %v3991_v63 = vadd.f32 %v10573_v37, %v3912_v19  ;;  %v2576_v18 = vpop.f32.mrb[78].mxu0  ;;  %8412 = vmatprep.mubr.bf16.mxu1 %v10649_v28  ;;  %v11857_v39 = vld [vmem:[#allocation76_spill] sm:$0xff] }
 0x3fa   : > { %v3135_v15 = vadd.f32 %v2576_v18, %v11851_v29  ;;  %v2578_v44 = vpop.f32.mrb[79].mxu0  ;;  %v3367_v46 = vrot.slane %v3132_v6, 7 }
 0x3fb   : > { %v4063_v40 = vmax.f32 %v3991_v63, 0.0  ;;  %v3136_v30 = vadd.f32 %v2578_v44, %v11852_v23  ;;  %v11858_v44 = vld [vmem:[#allocation77_spill] sm:$0xff] }
 0x3fc   : > { %v3368_v12 = vrot.slane %v3135_v15, 7  ;;  %4949 = vmatmul.mubr.bf16.gmra.mrb[184].mxu0 %v10590_v48 }
 0x3fd   : > { %v10659_v7 = vpack.c.bf16 %v9377_v21, %v4063_v40  ;;  %4956 = vmatprep.mubr.bf16.mxu0 %v11792_v16 }
 0x3fe   : > { %v3369_v2 = vsel %vm3276_vm0, %v3367_v46, %v3368_v12  ;;  %v11859_v46 = vld [vmem:[#allocation78_spill] sm:$0xff] }
 0x3ff   : > { %11853 = vst [vmem:[#allocation28_spill] sm:$0xff] %v10659_v7  ;;  %v3536_v35 = vadd.f32 %v3369_v2, %v3136_v30  ;;  %v2582_v26 = vpop.f32.mrb[80].mxu0  ;;  %8413 = vmatmul.mubr.bf16.gmra.mrb[216].mxu1 %v10659_v7 }
 0x400   : > { %v3138_v27 = vadd.f32 %v2582_v26, %v11854_v62  ;;  %v2584_v4 = vpop.f32.mrb[81].mxu0 }
 0x401   : > { %v3915_v51 = vadd.f32 %v10496_v31, %v3536_v35  ;;  %v3139_v55 = vadd.f32 %v2584_v4, %v11855_v49  ;;  %v2586_v13 = vpop.f32.mrb[82].mxu0  ;;  %v11861_v4 = vld [vmem:[#allocation79_spill] sm:$0xff] }
 0x402   : > { %v3370_v59 = vrot.slane %v3138_v27, 7  ;;  %v2588_v32 = vpop.f32.mrb[83].mxu0  ;;  %v11862_v13 = vld [vmem:[#allocation80_spill] sm:$0xff] }
 0x403   : > { %v3994_v25 = vadd.f32 %v10573_v37, %v3915_v51 }
 0x404   : > { %v3371_v5 = vsel %vm3276_vm0, %v3368_v12, %v3370_v59  ;;  %4957 = vmatmul.mubr.bf16.gmra.mrb[188].mxu0 %v10603_v41 }
 0x405   : > { %v4066_v19 = vmax.f32 %v3994_v25, 0.0  ;;  %v3537_v9 = vadd.f32 %v3371_v5, %v3139_v55  ;;  %4965 = vmatprep.mubr.bf16.mxu0 %v11792_v16 }
 0x407   : > { %v10672_v20 = vpack.c.bf16 %v4066_v19, %v9377_v21  ;;  %v3916_v31 = vadd.f32 %v10492_v56, %v3537_v9  ;;  %v2592_v6 = vpop.f32.mrb[84].mxu0 }
 0x408   : > { %v3144_v63 = vadd.f32 %v2592_v6, %v11857_v39  ;;  %v2594_v18 = vpop.f32.mrb[85].mxu0 }
 0x409   : > { %11856 = vst [vmem:[#allocation29_spill] sm:$0xff] %v10672_v20  ;;  %v3995_v29 = vadd.f32 %v10573_v37, %v3916_v31  ;;  %v2596_v15 = vpop.f32.mrb[86].mxu0  ;;  %8416 = vmatprep.mubr.bf16.mxu1 %v10672_v20 }
 0x40a   : > { %v3147_v40 = vadd.f32 %v2596_v15, %v11858_v44  ;;  %v2598_v23 = vpop.f32.mrb[87].mxu0  ;;  %v3373_v2 = vrot.slane %v3144_v63, 7 }
 0x40b   : > { %v4067_v30 = vmax.f32 %v3995_v29, 0.0  ;;  %v3148_v12 = vadd.f32 %v2598_v23, %v11859_v46  ;;  %v11708_v46 = vmov 0.0|0.0  }
 0x40c   : > { %v3374_v35 = vrot.slane %v3147_v40, 7  ;;  %4966 = vmatmul.mubr.bf16.gmra.mrb[192].mxu0 %v10613_v61 }
 0x40d   : > { %v10682_v56 = vpack.c.bf16 %v9377_v21, %v4067_v30  ;;  %4973 = vmatprep.mubr.bf16.mxu0 %v11792_v16 }
 0x40e   : > { %v3375_v26 = vsel %vm3276_vm0, %v3373_v2, %v3374_v35  ;;  %v9079_v2 = vld [vmem:[#allocation7 + $0x180] ss:$12 sps:$4 sm:$0xff]  }
 0x40f   : > { %11860 = vst [vmem:[#allocation30_spill] sm:$0xff] %v10682_v56  ;;  %v3540_v62 = vadd.f32 %v3375_v26, %v3148_v12  ;;  %v2602_v27 = vpop.f32.mrb[88].mxu0  ;;  %8417 = vmatmul.mubr.bf16.gmra.mrb[220].mxu1 %v10682_v56 }
 0x410   : > { %v3150_v51 = vadd.f32 %v2602_v27, %v11861_v4  ;;  %v2604_v49 = vpop.f32.mrb[89].mxu0  ;;  %v9099_v4 = vld [vmem:[#allocation7 + $0x1b4] ss:$12 sps:$4 sm:$0xff]  }
 0x411   : > { %v3919_v55 = vadd.f32 %v10516_v34, %v3540_v62  ;;  %v3151_v59 = vadd.f32 %v2604_v49, %v11862_v13  ;;  %v2606_v32 = vpop.f32.mrb[90].mxu0  ;;  %v9082_v62 = vld [vmem:[#allocation7 + $0x198] ss:$12 sps:$4 sm:$0xff]   ;;  %v9097_v49 = vld [vmem:[#allocation7 + $0x1b0] ss:$12 sps:$4 sm:$0xff]  }
 0x412   : > { %v3376_v25 = vrot.slane %v3150_v51, 7  ;;  %v2608_v5 = vpop.f32.mrb[91].mxu0  ;;  %v9109_v32 = vld [vmem:[#allocation7 + $0x1c8] ss:$12 sps:$4 sm:$0xff]  }
 0x413   : > { %v3998_v19 = vadd.f32 %v10573_v37, %v3919_v55  ;;  %v9111_v55 = vld [vmem:[#allocation7 + $0x1cc] ss:$12 sps:$4 sm:$0xff]   ;;  %v9114_v5 = vld [vmem:[#allocation7 + $0x1e4] ss:$12 sps:$4 sm:$0xff]  }
 0x414   : > { %v3377_v9 = vsel %vm3276_vm0, %v3374_v35, %v3376_v25  ;;  %4974 = vmatmul.mubr.bf16.gmra.mrb[196].mxu0 %v10626_v57  ;;  %v9084_v35 = vld [vmem:[#allocation7 + $0x19c] ss:$12 sps:$4 sm:$0xff]  }
 0x415   : > { %v3541_v31 = vadd.f32 %v3377_v9, %v3151_v59  ;;  %v4070_v6 = vmax.f32 %v3998_v19, 0.0  ;;  %4982 = vmatprep.mubr.bf16.mxu0 %v11792_v16  ;;  %v9112_v9 = vld [vmem:[#allocation7 + $0x1e0] ss:$12 sps:$4 sm:$0xff]  }
 0x417   : > { %v3920_v39 = vadd.f32 %v10509_v42, %v3541_v31  ;;  %v10696_v63 = vpack.c.bf16 %v4070_v6, %v9377_v21  ;;  %v2612_v34 = vpop.f32.mrb[92].mxu0  ;;  %v9117_v31 = vld [vmem:[#allocation7 + $0x1fc] ss:$12 sps:$4 sm:$0xff]  }
 0x418   : > { %v2614_v18 = vpop.f32.mrb[93].mxu0  ;;  %v9115_v34 = vld [vmem:[#allocation7 + $0x1f8] ss:$12 sps:$4 sm:$0xff]  }
 0x419   : > { %11863 = vst [vmem:[#allocation31_spill] sm:$0xff] %v10696_v63  ;;  %v3999_v29 = vadd.f32 %v10573_v37, %v3920_v39  ;;  %8420 = vmatprep.mubr.bf16.mxu1 %v10696_v63  ;;  %v2616_v15 = vpop.f32.mrb[94].mxu0 }
 0x41a   : > { %v2618_v44 = vpop.f32.mrb[95].mxu0 }
 0x41b   : > { %v4071_v40 = vmax.f32 %v3999_v29, 0.0  ;;  %v9120_v29 = vld [vmem:[#allocation7 + $0x214] ss:$12 sps:$4 sm:$0xff]   ;;  %v9118_v44 = vld [vmem:[#allocation7 + $0x210] ss:$12 sps:$4 sm:$0xff]  }
 0x41c   : > { %4983 = vmatmul.mubr.bf16.gmra.mrb[200].mxu0 %v10636_v54 }
 0x41d   : > { %v10702_v23 = vpack.c.bf16 %v9377_v21, %v4071_v40  ;;  %4990 = vmatprep.mubr.bf16.mxu0 %v11792_v16  ;;  %v9123_v40 = vld [vmem:[#allocation7 + $0x22c] ss:$12 sps:$4 sm:$0xff]  }
 0x41f   : > { %11864 = vst [vmem:[#allocation32_spill] sm:$0xff] %v10702_v23  ;;  %8421 = vmatmul.mubr.bf16.gmra.mrb[224].mxu1 %v10702_v23  ;;  %v2622_v42 = vpop.f32.mrb[96].mxu0 }
 0x420   : > { %v2624_v30 = vpop.f32.mrb[97].mxu0  ;;  %8440 = vmatprep.mubr.bf16.mxu1 %v11708_v46 }
 0x421   : > { %v2626_v37 = vpop.f32.mrb[98].mxu0 }
 0x422   : > { %v2628_v12 = vpop.f32.mrb[99].mxu0  ;;  %v9121_v37 = vld [vmem:[#allocation7 + $0x228] ss:$12 sps:$4 sm:$0xff]  }
 0x424   : > { %4991 = vmatmul.mubr.bf16.gmra.mrb[204].mxu0 %v10649_v28 }
 0x425   : > { %4999 = vmatprep.mubr.bf16.mxu0 %v11792_v16 }
 0x427   : > { %v10709_v26 = vpop.f32.mrb[100].mxu0  ;;  %8441 = vmatmul.mubr.bf16.vlgmr.msra.gmra.mrb[164].mxu1 %v11708_v46 }
 0x428   : > { %v4773_v21 = vpop.f32.mrb[101].mxu0  ;;  %8444 = vmatprep.mubr.bf16.mxu1 %v10274_v10  ;;  %6182 = vmatpush1.bf16.msra.mxu1 %v9079_v2  ;;  %v10743_v2 = vld [vmem:[#allocation7 + $0x188] ss:$12 sps:$4 sm:$0xff]  }
 0x429   : > { %v10713_v27 = vpop.f32.mrb[102].mxu0  ;;  %6183 = vmatprep.subr.bf16.mxu1 %v9084_v35 }
 0x42a   : > { %v10715_v51 = vpop.f32.mrb[103].mxu0 }
 0x42c   : > { %5000 = vmatmul.mubr.bf16.gmra.mrb[208].mxu0 %v10659_v7  ;;  %6184 = vmatpush1.bf16.msra.mxu1 %v9082_v62 }
 0x42d   : > { %5007 = vmatprep.mubr.bf16.mxu0 %v11792_v16  ;;  %6185 = vmatprep.subr.bf16.mxu1 %v9099_v4 }
 0x42f   : > { %v10719_v13 = vpop.f32.mrb[104].mxu0  ;;  %8445 = vmatmul.mubr.bf16.gmra.mrb[168].mxu1 %v10278_v22 }
 0x430   : > { %v10722_v59 = vpop.f32.mrb[105].mxu0  ;;  %8448 = vmatprep.mubr.bf16.mxu1 %v10293_v0  ;;  %6186 = vmatpush1.bf16.msra.mxu1 %v9097_v49 }
 0x431   : > { %v4784_v25 = vpop.f32.mrb[106].mxu0  ;;  %6187 = vmatprep.subr.bf16.mxu1 %v9111_v55 }
 0x432   : > { %v4785_v19 = vpop.f32.mrb[107].mxu0 }
 0x434   : > { %5008 = vmatmul.mubr.bf16.gmra.mrb[212].mxu0 %v10672_v20  ;;  %6188 = vmatpush1.bf16.msra.mxu1 %v9109_v32 }
 0x435   : > { %5016 = vmatprep.mubr.bf16.mxu0 %v11792_v16  ;;  %6189 = vmatprep.subr.bf16.mxu1 %v9114_v5 }
 0x437   : > { %v10727_v6 = vpop.f32.mrb[108].mxu0  ;;  %8449 = vmatmul.mubr.bf16.gmra.mrb[172].mxu1 %v10305_v38 }
 0x438   : > { %v4790_v39 = vpop.f32.mrb[109].mxu0  ;;  %8452 = vmatprep.mubr.bf16.mxu1 %v10326_v11  ;;  %6190 = vmatpush1.bf16.msra.mxu1 %v9112_v9 }
 0x439   : > { %v10731_v18 = vpop.f32.mrb[110].mxu0  ;;  %6191 = vmatprep.subr.bf16.mxu1 %v9117_v31 }
 0x43a   : > { %v10733_v15 = vpop.f32.mrb[111].mxu0 }
 0x43c   : > { %5017 = vmatmul.mubr.bf16.gmra.mrb[216].mxu0 %v10682_v56  ;;  %6192 = vmatpush1.bf16.msra.mxu1 %v9115_v34 }
 0x43d   : > { %5024 = vmatprep.mubr.bf16.mxu0 %v11792_v16  ;;  %6193 = vmatprep.subr.bf16.mxu1 %v9120_v29 }
 0x43f   : > { %v10737_v42 = vpop.f32.mrb[112].mxu0  ;;  %8453 = vmatmul.mubr.bf16.gmra.mrb[176].mxu1 %v10338_v8 }
 0x440   : > { %v10740_v30 = vpop.f32.mrb[113].mxu0  ;;  %8456 = vmatprep.mubr.bf16.mxu1 %v10360_v47  ;;  %6194 = vmatpush1.bf16.msra.mxu1 %v9118_v44 }
 0x441   : > { %v4801_v12 = vpop.f32.mrb[114].mxu0  ;;  %6195 = vmatprep.subr.bf16.mxu1 %v9123_v40 }
 0x442   : > { %v4802_v35 = vpop.f32.mrb[115].mxu0 }
 0x444   : > { %5025 = vmatmul.mubr.bf16.gmra.mrb[220].mxu0 %v10696_v63  ;;  %6196 = vmatpush1.bf16.msra.mxu1 %v9121_v37 }
 0x445   : > { %5033 = vmatprep.mubr.bf16.mxu0 %v11792_v16  ;;  %8504 = vmatprep.subr.bf16.mxu1 %v10743_v2 }
 0x447   : > { %v10748_v21 = vpop.f32.mrb[116].mxu0  ;;  %8457 = vmatmul.mubr.bf16.gmra.mrb[180].mxu1 %v10373_v17 }
 0x448   : > { %v4807_v62 = vpop.f32.mrb[117].mxu0  ;;  %8460 = vmatprep.mubr.bf16.mxu1 %v10395_v1 }
 0x449   : > { %v10752_v4 = vpop.f32.mrb[118].mxu0 }
 0x44a   : > { %v10754_v49 = vpop.f32.mrb[119].mxu0 }
 0x44c   : > { %5034 = vmatmul.mubr.bf16.gmra.mrb[224].mxu0 %v10702_v23 }
 0x44d   : > { %5475 = vmatprep.mubr.bf16.mxu0 %v11792_v16 }
 0x44f   : > { %v10758_v55 = vpop.f32.mrb[120].mxu0  ;;  %8461 = vmatmul.mubr.bf16.gmra.mrb[184].mxu1 %v10408_v36 }
 0x450   : > { %v10761_v32 = vpop.f32.mrb[121].mxu0  ;;  %8464 = vmatprep.mubr.bf16.mxu1 %v10430_v43 }
 0x451   : > { %v4818_v25 = vpop.f32.mrb[122].mxu0 }
 0x452   : > { %v4819_v5 = vpop.f32.mrb[123].mxu0 }
 0x454   : > { %5476 = vmatmul.mubr.bf16.vlgmr.msra.gmra.mrb[228].mxu0 %v11708_v46 }
 0x455   : > { %5484 = vmatprep.mubr.bf16.mxu0 %v11792_v16 }
 0x457   : > { %v10766_v19 = vpop.f32.mrb[124].mxu0  ;;  %8465 = vmatmul.mubr.bf16.gmra.mrb[188].mxu1 %v10443_v52 }
 0x458   : > { %v4824_v9 = vpop.f32.mrb[125].mxu0  ;;  %8468 = vmatprep.mubr.bf16.mxu1 %v10465_v14 }
 0x459   : > { %v10770_v31 = vpop.f32.mrb[126].mxu0 }
 0x45a   : > { %v10772_v39 = vpop.f32.mrb[127].mxu0 }
 0x45c   : > { %5485 = vmatmul.mubr.bf16.gmra.mrb[232].mxu0 %v11708_v46 }
 0x45d   : > { %5492 = vmatprep.mubr.bf16.mxu0 %v11792_v16 }
 0x45f   : > { %v10776_v34 = vpop.f32.mrb[128].mxu0  ;;  %8469 = vmatmul.mubr.bf16.gmra.mrb[192].mxu1 %v10478_v53 }
 0x460   : > { %v10779_v29 = vpop.f32.mrb[129].mxu0  ;;  %8472 = vmatprep.mubr.bf16.mxu1 %v10500_v33 }
 0x461   : > { %v4835_v44 = vpop.f32.mrb[130].mxu0 }
 0x462   : > { %v4836_v40 = vpop.f32.mrb[131].mxu0 }
 0x464   : > { %5493 = vmatmul.mubr.bf16.gmra.mrb[236].mxu0 %v10274_v10 }
 0x465   : > { %5501 = vmatprep.mubr.bf16.mxu0 %v11792_v16 }
 0x467   : > { %v10784_v37 = vpop.f32.mrb[132].mxu0  ;;  %8473 = vmatmul.mubr.bf16.gmra.mrb[196].mxu1 %v10513_v24 }
 0x468   : > { %v4841_v12 = vpop.f32.mrb[133].mxu0  ;;  %8476 = vmatprep.mubr.bf16.mxu1 %v10529_v60 }
 0x469   : > { %v10788_v35 = vpop.f32.mrb[134].mxu0 }
 0x46a   : > { %v10790_v62 = vpop.f32.mrb[135].mxu0 }
 0x46c   : > { %5502 = vmatmul.mubr.bf16.gmra.mrb[240].mxu0 %v10278_v22 }
 0x46d   : > { %5509 = vmatprep.mubr.bf16.mxu0 %v11792_v16 }
 0x46f   : > { %v10794_v25 = vpop.f32.mrb[136].mxu0  ;;  %8477 = vmatmul.mubr.bf16.gmra.mrb[200].mxu1 %v10539_v50 }
 0x470   : > { %v10797_v10 = vpop.f32.mrb[137].mxu0  ;;  %8480 = vmatprep.mubr.bf16.mxu1 %v10552_v58 }
 0x471   : > { %v4852_v5 = vpop.f32.mrb[138].mxu0 }
 0x472   : > { %v4853_v9 = vpop.f32.mrb[139].mxu0 }
 0x474   : > { %5510 = vmatmul.mubr.bf16.gmra.mrb[244].mxu0 %v10293_v0 }
 0x475   : > { %5518 = vmatprep.mubr.bf16.mxu0 %v11792_v16 }
 0x477   : > { %v10802_v44 = vpop.f32.mrb[140].mxu0  ;;  %8481 = vmatmul.mubr.bf16.gmra.mrb[204].mxu1 %v10562_v45 }
 0x478   : > { %v4858_v22 = vpop.f32.mrb[141].mxu0  ;;  %8484 = vmatprep.mubr.bf16.mxu1 %v10580_v3 }
 0x479   : > { %v10806_v40 = vpop.f32.mrb[142].mxu0 }
 0x47a   : > { %v10808_v12 = vpop.f32.mrb[143].mxu0 }
 0x47b   : > { %11865 = vst [vmem:[#allocation33_spill] sm:$0xff] %v10808_v12 }
 0x47c   : > { %5519 = vmatmul.mubr.bf16.gmra.mrb[248].mxu0 %v10305_v38 }
 0x47d   : > { %5526 = vmatprep.mubr.bf16.mxu0 %v11792_v16 }
 0x47f   : > { %v10812_v5 = vpop.f32.mrb[144].mxu0  ;;  %8485 = vmatmul.mubr.bf16.gmra.mrb[208].mxu1 %v10590_v48 }
 0x480   : > { %11866 = vst [vmem:[#allocation34_spill] sm:$0xff] %v10812_v5  ;;  %v10815_v9 = vpop.f32.mrb[145].mxu0  ;;  %8488 = vmatprep.mubr.bf16.mxu1 %v10603_v41 }
 0x481   : > { %11867 = vst [vmem:[#allocation35_spill] sm:$0xff] %v10815_v9  ;;  %v4869_v46 = vpop.f32.mrb[146].mxu0 }
 0x482   : > { %v4870_v22 = vpop.f32.mrb[147].mxu0 }
 0x484   : > { %5527 = vmatmul.mubr.bf16.gmra.mrb[252].mxu0 %v10326_v11 }
 0x485   : > { %5535 = vmatprep.mubr.bf16.mxu0 %v11792_v16 }
 0x487   : > { %v10820_v23 = vpop.f32.mrb[148].mxu0  ;;  %8489 = vmatmul.mubr.bf16.gmra.mrb[212].mxu1 %v10613_v61 }
 0x488   : > { %11868 = vst [vmem:[#allocation36_spill] sm:$0xff] %v10820_v23  ;;  %v4875_v63 = vpop.f32.mrb[149].mxu0  ;;  %8492 = vmatprep.mubr.bf16.mxu1 %v10626_v57 }
 0x489   : > { %v10824_v5 = vpop.f32.mrb[150].mxu0 }
 0x48a   : > { %11869 = vst [vmem:[#allocation37_spill] sm:$0xff] %v10824_v5  ;;  %v10826_v12 = vpop.f32.mrb[151].mxu0 }
 0x48b   : > { %11870 = vst [vmem:[#allocation38_spill] sm:$0xff] %v10826_v12 }
 0x48c   : > { %5536 = vmatmul.mubr.bf16.gmra.mrb[0].mxu0 %v10338_v8 }
 0x48d   : > { %5543 = vmatprep.mubr.bf16.mxu0 %v11792_v16 }
 0x48f   : > { %v10830_v46 = vpop.f32.mrb[152].mxu0  ;;  %8493 = vmatmul.mubr.bf16.gmra.mrb[216].mxu1 %v10636_v54 }
 0x490   : > { %11871 = vst [vmem:[#allocation39_spill] sm:$0xff] %v10830_v46  ;;  %v10833_v22 = vpop.f32.mrb[153].mxu0  ;;  %8496 = vmatprep.mubr.bf16.mxu1 %v10649_v28 }
 0x491   : > { %11872 = vst [vmem:[#allocation40_spill] sm:$0xff] %v10833_v22  ;;  %v4886_v23 = vpop.f32.mrb[154].mxu0 }
 0x492   : > { %v4887_v63 = vpop.f32.mrb[155].mxu0 }
 0x494   : > { %5544 = vmatmul.mubr.bf16.gmra.mrb[4].mxu0 %v10360_v47 }
 0x495   : > { %5552 = vmatprep.mubr.bf16.mxu0 %v11792_v16 }
 0x497   : > { %v10838_v5 = vpop.f32.mrb[156].mxu0  ;;  %8497 = vmatmul.mubr.bf16.gmra.mrb[220].mxu1 %v10659_v7 }
 0x498   : > { %11873 = vst [vmem:[#allocation41_spill] sm:$0xff] %v10838_v5  ;;  %v4892_v12 = vpop.f32.mrb[157].mxu0  ;;  %8500 = vmatprep.mubr.bf16.mxu1 %v10672_v20 }
 0x499   : > { %v10842_v46 = vpop.f32.mrb[158].mxu0 }
 0x49a   : > { %11874 = vst [vmem:[#allocation42_spill] sm:$0xff] %v10842_v46  ;;  %v10844_v9 = vpop.f32.mrb[159].mxu0  ;;  %v9125_v46 = vld [vmem:[#allocation7 + $0x1a0] ss:$12 sps:$4 sm:$0xff]  }
 0x49b   : > { %11875 = vst [vmem:[#allocation43_spill] sm:$0xff] %v10844_v9 }
 0x49c   : > { %5553 = vmatmul.mubr.bf16.gmra.mrb[8].mxu0 %v10373_v17 }
 0x49d   : > { %5560 = vmatprep.mubr.bf16.mxu0 %v11792_v16 }
 0x49f   : > { %v10848_v23 = vpop.f32.mrb[160].mxu0  ;;  %8501 = vmatmul.mubr.bf16.gmra.mrb[224].mxu1 %v10682_v56 }
 0x4a0   : > { %11876 = vst [vmem:[#allocation44_spill] sm:$0xff] %v10848_v23  ;;  %v10851_v63 = vpop.f32.mrb[161].mxu0  ;;  %6213 = vmatprep.mubr.bf16.mxu1 %v11792_v16 }
 0x4a1   : > { %11877 = vst [vmem:[#allocation45_spill] sm:$0xff] %v10851_v63  ;;  %v4903_v5 = vpop.f32.mrb[162].mxu0  ;;  %v9126_v63 = vld [vmem:[#allocation7 + $0x1b8] ss:$12 sps:$4 sm:$0xff]  }
 0x4a2   : > { %v4904_v12 = vpop.f32.mrb[163].mxu0 }
 0x4a3   : > { %v9127_v12 = vld [vmem:[#allocation7 + $0x1d0] ss:$12 sps:$4 sm:$0xff]  }
 0x4a4   : > { %5561 = vmatmul.mubr.bf16.gmra.mrb[12].mxu0 %v10395_v1 }
 0x4a5   : > { %5569 = vmatprep.mubr.bf16.mxu0 %v11792_v16 }
 0x4a7   : > { %v10856_v9 = vpop.f32.mrb[164].mxu0  ;;  %6214 = vmatmul.mubr.bf16.vlgmr.msra.gmra.mrb[228].mxu1 %v10293_v0 }
 0x4a8   : > { %11878 = vst [vmem:[#allocation46_spill] sm:$0xff] %v10856_v9  ;;  %v4909_v22 = vpop.f32.mrb[165].mxu0  ;;  %8505 = vmatpush3.bf16.msra.mxu1 %v10743_v2  ;;  %6222 = vmatprep.mubr.bf16.mxu1 %v11792_v16 }
 0x4a9   : > { %v10861_v23 = vpop.f32.mrb[166].mxu0  ;;  %8506 = vmatprep.subr.bf16.mxu1 %v9125_v46 }
 0x4aa   : > { %11879 = vst [vmem:[#allocation47_spill] sm:$0xff] %v10861_v23  ;;  %v10863_v5 = vpop.f32.mrb[167].mxu0  ;;  %v9128_v23 = vld [vmem:[#allocation7 + $0x1e8] ss:$12 sps:$4 sm:$0xff]  }
 0x4ab   : > { %11880 = vst [vmem:[#allocation48_spill] sm:$0xff] %v10863_v5 }
 0x4ac   : > { %5570 = vmatmul.mubr.bf16.gmra.mrb[16].mxu0 %v10408_v36  ;;  %8507 = vmatpush3.bf16.msra.mxu1 %v9125_v46 }
 0x4ad   : > { %5577 = vmatprep.mubr.bf16.mxu0 %v11792_v16  ;;  %8508 = vmatprep.subr.bf16.mxu1 %v9126_v63 }
 0x4af   : > { %v10867_v9 = vpop.f32.mrb[168].mxu0  ;;  %6223 = vmatmul.mubr.bf16.gmra.mrb[232].mxu1 %v10305_v38 }
 0x4b0   : > { %11881 = vst [vmem:[#allocation49_spill] sm:$0xff] %v10867_v9  ;;  %v10870_v2 = vpop.f32.mrb[169].mxu0  ;;  %6230 = vmatprep.mubr.bf16.mxu1 %v11792_v16  ;;  %8509 = vmatpush3.bf16.msra.mxu1 %v9126_v63 }
 0x4b1   : > { %11882 = vst [vmem:[#allocation50_spill] sm:$0xff] %v10870_v2  ;;  %v4920_v22 = vpop.f32.mrb[170].mxu0  ;;  %8510 = vmatprep.subr.bf16.mxu1 %v9127_v12 }
 0x4b2   : > { %v4921_v5 = vpop.f32.mrb[171].mxu0 }
 0x4b4   : > { %5578 = vmatmul.mubr.bf16.gmra.mrb[20].mxu0 %v10430_v43  ;;  %8511 = vmatpush3.bf16.msra.mxu1 %v9127_v12 }
 0x4b5   : > { %5586 = vmatprep.mubr.bf16.mxu0 %v11792_v16  ;;  %8512 = vmatprep.subr.bf16.mxu1 %v9128_v23 }
 0x4b7   : > { %v10875_v46 = vpop.f32.mrb[172].mxu0  ;;  %6231 = vmatmul.mubr.bf16.gmra.mrb[236].mxu1 %v10326_v11 }
 0x4b8   : > { %11883 = vst [vmem:[#allocation51_spill] sm:$0xff] %v10875_v46  ;;  %v4926_v9 = vpop.f32.mrb[173].mxu0  ;;  %6239 = vmatprep.mubr.bf16.mxu1 %v11792_v16  ;;  %8513 = vmatpush3.bf16.msra.mxu1 %v9128_v23 }
 0x4b9   : > { %v10879_v2 = vpop.f32.mrb[174].mxu0 }
 0x4ba   : > { %11884 = vst [vmem:[#allocation52_spill] sm:$0xff] %v10879_v2  ;;  %v10881_v63 = vpop.f32.mrb[175].mxu0 }
 0x4bb   : > { %11885 = vst [vmem:[#allocation53_spill] sm:$0xff] %v10881_v63 }
 0x4bc   : > { %5587 = vmatmul.mubr.bf16.gmra.mrb[24].mxu0 %v10443_v52 }
 0x4bd   : > { %5594 = vmatprep.mubr.bf16.mxu0 %v11792_v16 }
 0x4bf   : > { %v10885_v5 = vpop.f32.mrb[176].mxu0  ;;  %6240 = vmatmul.mubr.bf16.gmra.mrb[240].mxu1 %v10338_v8 }
 0x4c0   : > { %11886 = vst [vmem:[#allocation54_spill] sm:$0xff] %v10885_v5  ;;  %v10888_v12 = vpop.f32.mrb[177].mxu0  ;;  %6247 = vmatprep.mubr.bf16.mxu1 %v11792_v16  ;;  %v9129_v5 = vld [vmem:[#allocation7 + $0x200] ss:$12 sps:$4 sm:$0xff]  }
 0x4c1   : > { %11887 = vst [vmem:[#allocation55_spill] sm:$0xff] %v10888_v12  ;;  %v4937_v9 = vpop.f32.mrb[178].mxu0  ;;  %8514 = vmatprep.subr.bf16.mxu1 %v9129_v5 }
 0x4c2   : > { %v4938_v22 = vpop.f32.mrb[179].mxu0  ;;  %8515 = vmatpush3.bf16.msra.mxu1 %v9129_v5 }
 0x4c4   : > { %5595 = vmatmul.mubr.bf16.gmra.mrb[28].mxu0 %v10465_v14 }
 0x4c5   : > { %5603 = vmatprep.mubr.bf16.mxu0 %v11792_v16 }
 0x4c7   : > { %v10893_v23 = vpop.f32.mrb[180].mxu0  ;;  %6248 = vmatmul.mubr.bf16.gmra.mrb[244].mxu1 %v10360_v47 }
 0x4c8   : > { %11888 = vst [vmem:[#allocation56_spill] sm:$0xff] %v10893_v23  ;;  %v4943_v63 = vpop.f32.mrb[181].mxu0  ;;  %6256 = vmatprep.mubr.bf16.mxu1 %v11792_v16 }
 0x4c9   : > { %v10897_v2 = vpop.f32.mrb[182].mxu0 }
 0x4ca   : > { %11889 = vst [vmem:[#allocation57_spill] sm:$0xff] %v10897_v2  ;;  %v10899_v46 = vpop.f32.mrb[183].mxu0 }
 0x4cb   : > { %11890 = vst [vmem:[#allocation58_spill] sm:$0xff] %v10899_v46 }
 0x4cc   : > { %5604 = vmatmul.mubr.bf16.gmra.mrb[32].mxu0 %v10478_v53 }
 0x4cd   : > { %5611 = vmatprep.mubr.bf16.mxu0 %v11792_v16 }
 0x4cf   : > { %v10903_v9 = vpop.f32.mrb[184].mxu0  ;;  %6257 = vmatmul.mubr.bf16.gmra.mrb[248].mxu1 %v10373_v17 }
 0x4d0   : > { %11891 = vst [vmem:[#allocation59_spill] sm:$0xff] %v10903_v9  ;;  %v10906_v22 = vpop.f32.mrb[185].mxu0  ;;  %6264 = vmatprep.mubr.bf16.mxu1 %v11792_v16 }
 0x4d1   : > { %11892 = vst [vmem:[#allocation60_spill] sm:$0xff] %v10906_v22  ;;  %v4954_v63 = vpop.f32.mrb[186].mxu0 }
 0x4d2   : > { %v4955_v23 = vpop.f32.mrb[187].mxu0 }
 0x4d4   : > { %5612 = vmatmul.mubr.bf16.gmra.mrb[36].mxu0 %v10500_v33 }
 0x4d5   : > { %5620 = vmatprep.mubr.bf16.mxu0 %v11792_v16 }
 0x4d7   : > { %v10911_v46 = vpop.f32.mrb[188].mxu0  ;;  %6265 = vmatmul.mubr.bf16.gmra.mrb[252].mxu1 %v10395_v1 }
 0x4d8   : > { %11893 = vst [vmem:[#allocation61_spill] sm:$0xff] %v10911_v46  ;;  %v4960_v5 = vpop.f32.mrb[189].mxu0  ;;  %6273 = vmatprep.mubr.bf16.mxu1 %v11792_v16 }
 0x4d9   : > { %v10915_v9 = vpop.f32.mrb[190].mxu0 }
 0x4da   : > { %11894 = vst [vmem:[#allocation62_spill] sm:$0xff] %v10915_v9  ;;  %v10917_v2 = vpop.f32.mrb[191].mxu0 }
 0x4db   : > { %11895 = vst [vmem:[#allocation63_spill] sm:$0xff] %v10917_v2 }
 0x4dc   : > { %5621 = vmatmul.mubr.bf16.gmra.mrb[40].mxu0 %v10513_v24 }
 0x4dd   : > { %5628 = vmatprep.mubr.bf16.mxu0 %v11792_v16 }
 0x4df   : > { %v10921_v23 = vpop.f32.mrb[192].mxu0  ;;  %6274 = vmatmul.mubr.bf16.gmra.mrb[0].mxu1 %v10408_v36 }
 0x4e0   : > { %11896 = vst [vmem:[#allocation64_spill] sm:$0xff] %v10921_v23  ;;  %v10924_v63 = vpop.f32.mrb[193].mxu0  ;;  %6281 = vmatprep.mubr.bf16.mxu1 %v11792_v16  ;;  %v9130_v23 = vld [vmem:[#allocation7 + $0x218] ss:$12 sps:$4 sm:$0xff]  }
 0x4e1   : > { %11897 = vst [vmem:[#allocation65_spill] sm:$0xff] %v10924_v63  ;;  %v4971_v46 = vpop.f32.mrb[194].mxu0  ;;  %8516 = vmatprep.subr.bf16.mxu1 %v9130_v23 }
 0x4e2   : > { %v4972_v5 = vpop.f32.mrb[195].mxu0  ;;  %8517 = vmatpush3.bf16.msra.mxu1 %v9130_v23 }
 0x4e4   : > { %5629 = vmatmul.mubr.bf16.gmra.mrb[44].mxu0 %v10529_v60 }
 0x4e5   : > { %5637 = vmatprep.mubr.bf16.mxu0 %v11792_v16 }
 0x4e7   : > { %v10929_v9 = vpop.f32.mrb[196].mxu0  ;;  %6282 = vmatmul.mubr.bf16.gmra.mrb[68].mxu1 %v10430_v43 }
 0x4e8   : > { %11898 = vst [vmem:[#allocation66_spill] sm:$0xff] %v10929_v9  ;;  %v4977_v2 = vpop.f32.mrb[197].mxu0  ;;  %6290 = vmatprep.mubr.bf16.mxu1 %v11792_v16 }
 0x4e9   : > { %v10933_v22 = vpop.f32.mrb[198].mxu0 }
 0x4ea   : > { %11899 = vst [vmem:[#allocation67_spill] sm:$0xff] %v10933_v22  ;;  %v10935_v12 = vpop.f32.mrb[199].mxu0 }
 0x4eb   : > { %11900 = vst [vmem:[#allocation68_spill] sm:$0xff] %v10935_v12 }
 0x4ec   : > { %5638 = vmatmul.mubr.bf16.gmra.mrb[48].mxu0 %v10539_v50 }
 0x4ed   : > { %5645 = vmatprep.mubr.bf16.mxu0 %v11792_v16 }
 0x4ef   : > { %v10939_v46 = vpop.f32.mrb[200].mxu0  ;;  %6291 = vmatmul.mubr.bf16.gmra.mrb[72].mxu1 %v10443_v52 }
 0x4f0   : > { %11901 = vst [vmem:[#allocation69_spill] sm:$0xff] %v10939_v46  ;;  %v10942_v5 = vpop.f32.mrb[201].mxu0  ;;  %6298 = vmatprep.mubr.bf16.mxu1 %v11792_v16 }
 0x4f1   : > { %11902 = vst [vmem:[#allocation70_spill] sm:$0xff] %v10942_v5  ;;  %v4988_v2 = vpop.f32.mrb[202].mxu0 }
 0x4f2   : > { %v4989_v9 = vpop.f32.mrb[203].mxu0 }
 0x4f4   : > { %5646 = vmatmul.mubr.bf16.gmra.mrb[52].mxu0 %v10552_v58 }
 0x4f5   : > { %5654 = vmatprep.mubr.bf16.mxu0 %v11792_v16 }
 0x4f7   : > { %v10947_v12 = vpop.f32.mrb[204].mxu0  ;;  %6299 = vmatmul.mubr.bf16.gmra.mrb[76].mxu1 %v10465_v14 }
 0x4f8   : > { %11903 = vst [vmem:[#allocation71_spill] sm:$0xff] %v10947_v12  ;;  %v4994_v23 = vpop.f32.mrb[205].mxu0  ;;  %6307 = vmatprep.mubr.bf16.mxu1 %v11792_v16 }
 0x4f9   : > { %v10951_v46 = vpop.f32.mrb[206].mxu0 }
 0x4fa   : > { %11904 = vst [vmem:[#allocation72_spill] sm:$0xff] %v10951_v46  ;;  %v10953_v22 = vpop.f32.mrb[207].mxu0 }
 0x4fb   : > { %11905 = vst [vmem:[#allocation73_spill] sm:$0xff] %v10953_v22 }
 0x4fc   : > { %5655 = vmatmul.mubr.bf16.gmra.mrb[56].mxu0 %v10562_v45 }
 0x4fd   : > { %5662 = vmatprep.mubr.bf16.mxu0 %v11792_v16 }
 0x4ff   : > { %v10957_v9 = vpop.f32.mrb[208].mxu0  ;;  %6308 = vmatmul.mubr.bf16.gmra.mrb[80].mxu1 %v10478_v53 }
 0x500   : > { %11906 = vst [vmem:[#allocation74_spill] sm:$0xff] %v10957_v9  ;;  %v10960_v2 = vpop.f32.mrb[209].mxu0  ;;  %6315 = vmatprep.mubr.bf16.mxu1 %v11792_v16  ;;  %v9131_v9 = vld [vmem:[#allocation7 + $0x230] ss:$12 sps:$4 sm:$0xff]  }
 0x501   : > { %11907 = vst [vmem:[#allocation75_spill] sm:$0xff] %v10960_v2  ;;  %v5005_v12 = vpop.f32.mrb[210].mxu0  ;;  %8518 = vmatprep.subr.bf16.mxu1 %v9131_v9 }
 0x502   : > { %v5006_v23 = vpop.f32.mrb[211].mxu0  ;;  %8519 = vmatpush3.bf16.msra.mxu1 %v9131_v9 }
 0x504   : > { %5663 = vmatmul.mubr.bf16.gmra.mrb[60].mxu0 %v10580_v3 }
 0x505   : > { %5671 = vmatprep.mubr.bf16.mxu0 %v11792_v16 }
 0x507   : > { %v10965_v46 = vpop.f32.mrb[212].mxu0  ;;  %6316 = vmatmul.mubr.bf16.gmra.mrb[84].mxu1 %v10500_v33 }
 0x508   : > { %11908 = vst [vmem:[#allocation76_spill] sm:$0xff] %v10965_v46  ;;  %v5011_v22 = vpop.f32.mrb[213].mxu0  ;;  %6324 = vmatprep.mubr.bf16.mxu1 %v11792_v16 }
 0x509   : > { %v10969_v5 = vpop.f32.mrb[214].mxu0 }
 0x50a   : > { %11909 = vst [vmem:[#allocation77_spill] sm:$0xff] %v10969_v5  ;;  %v10971_v63 = vpop.f32.mrb[215].mxu0 }
 0x50b   : > { %11910 = vst [vmem:[#allocation78_spill] sm:$0xff] %v10971_v63 }
 0x50c   : > { %5672 = vmatmul.mubr.bf16.gmra.mrb[64].mxu0 %v10590_v48 }
 0x50d   : > { %5679 = vmatprep.mubr.bf16.mxu0 %v11792_v16 }
 0x50f   : > { %v10975_v12 = vpop.f32.mrb[216].mxu0  ;;  %6325 = vmatmul.mubr.bf16.gmra.mrb[88].mxu1 %v10513_v24 }
 0x510   : > { %11911 = vst [vmem:[#allocation79_spill] sm:$0xff] %v10975_v12  ;;  %v10978_v23 = vpop.f32.mrb[217].mxu0  ;;  %6332 = vmatprep.mubr.bf16.mxu1 %v11792_v16 }
 0x511   : > { %11912 = vst [vmem:[#allocation80_spill] sm:$0xff] %v10978_v23  ;;  %v5022_v22 = vpop.f32.mrb[218].mxu0 }
 0x512   : > { %v5023_v46 = vpop.f32.mrb[219].mxu0 }
 0x514   : > { %5680 = vmatmul.mubr.bf16.gmra.mrb[68].mxu0 %v10603_v41 }
 0x515   : > { %5688 = vmatprep.mubr.bf16.mxu0 %v11792_v16 }
 0x517   : > { %v10983_v63 = vpop.f32.mrb[220].mxu0  ;;  %6333 = vmatmul.mubr.bf16.gmra.mrb[92].mxu1 %v10529_v60 }
 0x518   : > { %11913 = vst [vmem:[#allocation81_spill] sm:$0xff] %v10983_v63  ;;  %v5028_v9 = vpop.f32.mrb[221].mxu0  ;;  %6341 = vmatprep.mubr.bf16.mxu1 %v11792_v16 }
 0x519   : > { %v10987_v12 = vpop.f32.mrb[222].mxu0 }
 0x51a   : > { %11914 = vst [vmem:[#allocation82_spill] sm:$0xff] %v10987_v12  ;;  %v10989_v5 = vpop.f32.mrb[223].mxu0 }
 0x51b   : > { %11915 = vst [vmem:[#allocation83_spill] sm:$0xff] %v10989_v5 }
 0x51c   : > { %5689 = vmatmul.mubr.bf16.gmra.mrb[72].mxu0 %v10613_v61 }
 0x51d   : > { %5696 = vmatprep.mubr.bf16.mxu0 %v11792_v16 }
 0x51f   : > { %v10993_v46 = vpop.f32.mrb[224].mxu0  ;;  %6342 = vmatmul.mubr.bf16.gmra.mrb[96].mxu1 %v10539_v50 }
 0x520   : > { %11916 = vst [vmem:[#allocation84_spill] sm:$0xff] %v10993_v46  ;;  %v10996_v22 = vpop.f32.mrb[225].mxu0  ;;  %6349 = vmatprep.mubr.bf16.mxu1 %v11792_v16 }
 0x521   : > { %11917 = vst [vmem:[#allocation85_spill] sm:$0xff] %v10996_v22  ;;  %v5039_v63 = vpop.f32.mrb[226].mxu0 }
 0x522   : > { %v5040_v9 = vpop.f32.mrb[227].mxu0 }
 0x524   : > { %5697 = vmatmul.mubr.bf16.gmra.mrb[76].mxu0 %v10626_v57 }
 0x525   : > { %5705 = vmatprep.mubr.bf16.mxu0 %v11792_v16 }
 0x527   : > { %v5477_v12 = vpop.f32.mrb[228].mxu0  ;;  %6350 = vmatmul.mubr.bf16.gmra.mrb[100].mxu1 %v10552_v58 }
 0x528   : > { %v11003_v5 = vadd.f32 %v5477_v12, %v10709_v26  ;;  %v5479_v23 = vpop.f32.mrb[229].mxu0  ;;  %6358 = vmatprep.mubr.bf16.mxu1 %v11792_v16 }
 0x529   : > { %v5480_v46 = vpop.f32.mrb[230].mxu0 }
 0x52a   : > { %v11007_v22 = vadd.f32 %v5480_v46, %v10713_v27  ;;  %v5482_v2 = vpop.f32.mrb[231].mxu0 }
 0x52b   : > { %v11010_v63 = vadd.f32 %v5482_v2, %v10715_v51 }
 0x52c   : > { %5706 = vmatmul.mubr.bf16.gmra.mrb[80].mxu0 %v10636_v54 }
 0x52d   : > { %5713 = vmatprep.mubr.bf16.mxu0 %v11792_v16 }
 0x52f   : > { %v5486_v9 = vpop.f32.mrb[232].mxu0  ;;  %6359 = vmatmul.mubr.bf16.gmra.mrb[104].mxu1 %v10562_v45 }
 0x530   : > { %v11016_v26 = vadd.f32 %v5486_v9, %v10719_v13  ;;  %v5488_v12 = vpop.f32.mrb[233].mxu0  ;;  %6366 = vmatprep.mubr.bf16.mxu1 %v11792_v16 }
 0x531   : > { %v11020_v27 = vadd.f32 %v5488_v12, %v10722_v59  ;;  %v5490_v23 = vpop.f32.mrb[234].mxu0 }
 0x532   : > { %v5491_v46 = vpop.f32.mrb[235].mxu0 }
 0x534   : > { %5714 = vmatmul.mubr.bf16.gmra.mrb[84].mxu0 %v10649_v28 }
 0x535   : > { %5722 = vmatprep.mubr.bf16.mxu0 %v11792_v16 }
 0x537   : > { %v5494_v51 = vpop.f32.mrb[236].mxu0  ;;  %6367 = vmatmul.mubr.bf16.gmra.mrb[108].mxu1 %v10580_v3 }
 0x538   : > { %v11026_v2 = vadd.f32 %v5494_v51, %v10727_v6  ;;  %v5496_v13 = vpop.f32.mrb[237].mxu0  ;;  %6375 = vmatprep.mubr.bf16.mxu1 %v11792_v16 }
 0x539   : > { %v5497_v9 = vpop.f32.mrb[238].mxu0 }
 0x53a   : > { %v11030_v45 = vadd.f32 %v5497_v9, %v10731_v18  ;;  %v5499_v59 = vpop.f32.mrb[239].mxu0 }
 0x53b   : > { %v11033_v12 = vadd.f32 %v5499_v59, %v10733_v15 }
 0x53c   : > { %5723 = vmatmul.mubr.bf16.gmra.mrb[88].mxu0 %v10659_v7 }
 0x53d   : > { %5730 = vmatprep.mubr.bf16.mxu0 %v11792_v16 }
 0x53f   : > { %v5503_v23 = vpop.f32.mrb[240].mxu0  ;;  %6376 = vmatmul.mubr.bf16.gmra.mrb[112].mxu1 %v10590_v48 }
 0x540   : > { %v11039_v6 = vadd.f32 %v5503_v23, %v10737_v42  ;;  %v5505_v46 = vpop.f32.mrb[241].mxu0  ;;  %6383 = vmatprep.mubr.bf16.mxu1 %v11792_v16 }
 0x541   : > { %v11043_v18 = vadd.f32 %v5505_v46, %v10740_v30  ;;  %v5507_v51 = vpop.f32.mrb[242].mxu0 }
 0x542   : > { %v5508_v13 = vpop.f32.mrb[243].mxu0 }
 0x544   : > { %5731 = vmatmul.mubr.bf16.gmra.mrb[92].mxu0 %v10672_v20 }
 0x545   : > { %5739 = vmatprep.mubr.bf16.mxu0 %v11792_v16 }
 0x547   : > { %v5511_v15 = vpop.f32.mrb[244].mxu0  ;;  %6384 = vmatmul.mubr.bf16.gmra.mrb[116].mxu1 %v10603_v41 }
 0x548   : > { %v11049_v9 = vadd.f32 %v5511_v15, %v10748_v21  ;;  %v5513_v42 = vpop.f32.mrb[245].mxu0  ;;  %6392 = vmatprep.mubr.bf16.mxu1 %v11792_v16 }
 0x549   : > { %v5514_v59 = vpop.f32.mrb[246].mxu0 }
 0x54a   : > { %v11053_v23 = vadd.f32 %v5514_v59, %v10752_v4  ;;  %v5516_v30 = vpop.f32.mrb[247].mxu0 }
 0x54b   : > { %v11056_v46 = vadd.f32 %v5516_v30, %v10754_v49 }
 0x54c   : > { %5740 = vmatmul.mubr.bf16.gmra.mrb[96].mxu0 %v10682_v56 }
 0x54f   : > { %v5520_v51 = vpop.f32.mrb[248].mxu0  ;;  %6393 = vmatmul.mubr.bf16.gmra.mrb[120].mxu1 %v10613_v61 }
 0x550   : > { %v11061_v13 = vadd.f32 %v5520_v51, %v10758_v55  ;;  %v5522_v21 = vpop.f32.mrb[249].mxu0  ;;  %6400 = vmatprep.mubr.bf16.mxu1 %v11792_v16 }
 0x551   : > { %v11065_v15 = vadd.f32 %v5522_v21, %v10761_v32  ;;  %v5524_v4 = vpop.f32.mrb[250].mxu0 }
 0x552   : > { %v5525_v42 = vpop.f32.mrb[251].mxu0 }
 0x557   : > { %v5528_v59 = vpop.f32.mrb[252].mxu0  ;;  %6401 = vmatmul.mubr.bf16.gmra.mrb[124].mxu1 %v10626_v57 }
 0x558   : > { %v11069_v49 = vadd.f32 %v5528_v59, %v10766_v19  ;;  %v5530_v30 = vpop.f32.mrb[253].mxu0  ;;  %6409 = vmatprep.mubr.bf16.mxu1 %v11792_v16 }
 0x559   : > { %v5531_v61 = vpop.f32.mrb[254].mxu0 }
 0x55a   : > { %v11073_v55 = vadd.f32 %v5531_v61, %v10770_v31  ;;  %v5533_v51 = vpop.f32.mrb[255].mxu0 }
 0x55b   : > { %v11076_v41 = vadd.f32 %v5533_v51, %v10772_v39 }
 0x55f   : > { %v5537_v32 = vpop.f32.mrb[0].mxu0  ;;  %6410 = vmatmul.mubr.bf16.gmra.mrb[128].mxu1 %v10636_v54 }
 0x560   : > { %v11080_v21 = vadd.f32 %v5537_v32, %v10776_v34  ;;  %v5539_v4 = vpop.f32.mrb[1].mxu0  ;;  %6417 = vmatprep.mubr.bf16.mxu1 %v11792_v16 }
 0x561   : > { %v11084_v19 = vadd.f32 %v5539_v4, %v10779_v29  ;;  %v5541_v42 = vpop.f32.mrb[2].mxu0 }
 0x562   : > { %v5542_v59 = vpop.f32.mrb[3].mxu0 }
 0x567   : > { %v5545_v61 = vpop.f32.mrb[4].mxu0  ;;  %6418 = vmatmul.mubr.bf16.gmra.mrb[132].mxu1 %v10649_v28 }
 0x568   : > { %v11088_v31 = vadd.f32 %v5545_v61, %v10784_v37  ;;  %v5547_v39 = vpop.f32.mrb[5].mxu0  ;;  %6426 = vmatprep.mubr.bf16.mxu1 %v11792_v16 }
 0x569   : > { %v5548_v30 = vpop.f32.mrb[6].mxu0 }
 0x56a   : > { %v11092_v34 = vadd.f32 %v5548_v30, %v10788_v35  ;;  %v5550_v51 = vpop.f32.mrb[7].mxu0 }
 0x56b   : > { %v11095_v32 = vadd.f32 %v5550_v51, %v10790_v62 }
 0x56f   : > { %v5554_v29 = vpop.f32.mrb[8].mxu0  ;;  %6427 = vmatmul.mubr.bf16.gmra.mrb[136].mxu1 %v10659_v7  ;;  %v11918_v7 = vld [vmem:[#allocation33_spill] sm:$0xff] }
 0x570   : > { %v11099_v4 = vadd.f32 %v5554_v29, %v10794_v25  ;;  %v5556_v42 = vpop.f32.mrb[9].mxu0  ;;  %6434 = vmatprep.mubr.bf16.mxu1 %v11792_v16 }
 0x571   : > { %v11103_v37 = vadd.f32 %v5556_v42, %v10797_v10  ;;  %v5558_v59 = vpop.f32.mrb[10].mxu0 }
 0x572   : > { %v5559_v61 = vpop.f32.mrb[11].mxu0 }
 0x577   : > { %v5562_v35 = vpop.f32.mrb[12].mxu0  ;;  %6435 = vmatmul.mubr.bf16.gmra.mrb[140].mxu1 %v10672_v20 }
 0x578   : > { %v11107_v62 = vadd.f32 %v5562_v35, %v10802_v44  ;;  %v5564_v39 = vpop.f32.mrb[13].mxu0  ;;  %6443 = vmatprep.mubr.bf16.mxu1 %v11792_v16 }
 0x579   : > { %v5565_v30 = vpop.f32.mrb[14].mxu0 }
 0x57a   : > { %v11111_v25 = vadd.f32 %v5565_v30, %v10806_v40  ;;  %v5567_v51 = vpop.f32.mrb[15].mxu0  ;;  %v6215_v29 = vpop.f32.mrb[228].mxu1  ;;  %v11919_v40 = vld [vmem:[#allocation34_spill] sm:$0xff] }
 0x57b   : > { %v11114_v10 = vadd.f32 %v5567_v51, %v11918_v7  ;;  %v6759_v42 = vadd.f32 %v6215_v29, %v11003_v5  ;;  %v6217_v59 = vpop.f32.mrb[229].mxu1  ;;  %v11920_v5 = vld [vmem:[#allocation35_spill] sm:$0xff] }
 0x57c   : > { %v6218_v61 = vpop.f32.mrb[230].mxu1 }
 0x57d   : > { %v6760_v20 = vadd.f32 %v6218_v61, %v11007_v22  ;;  %v6220_v44 = vpop.f32.mrb[231].mxu1  ;;  %v6935_v39 = vrot.slane %v6759_v42, 7 }
 0x57e   : > { %v6761_v35 = vadd.f32 %v6220_v44, %v11010_v63 }
 0x57f   : > { %v6936_v28 = vrot.slane %v6760_v20, 7  ;;  %v5571_v54 = vpop.f32.mrb[16].mxu0  ;;  %6444 = vmatmul.mubr.bf16.gmra.mrb[144].mxu1 %v10682_v56 }
 0x580   : > { %v11121_v30 = vadd.f32 %v5571_v54, %v11919_v40  ;;  %v5573_v57 = vpop.f32.mrb[17].mxu0  ;;  %6451 = vmatprep.mubr.bf16.mxu1 %v11792_v16 }
 0x581   : > { %v6937_v7 = vsel %vm3276_vm0, %v6935_v39, %v6936_v28  ;;  %v11126_v51 = vadd.f32 %v5573_v57, %v11920_v5  ;;  %v5575_v22 = vpop.f32.mrb[18].mxu0  ;;  %v11922_v39 = vld [vmem:[#allocation31_spill] sm:$0xff]  ;;  %v11924_v5 = vld [vmem:[#allocation36_spill] sm:$0xff] }
 0x582   : > { %v11128_v29 = vadd.f32 %v6937_v7, %v6761_v35  ;;  %v5576_v63 = vpop.f32.mrb[19].mxu0  ;;  %v6224_v42 = vpop.f32.mrb[232].mxu1  ;;  %v11925_v22 = vld [vmem:[#allocation37_spill] sm:$0xff] }
 0x583   : > { %v6763_v20 = vadd.f32 %v6224_v42, %v11016_v26  ;;  %v6226_v59 = vpop.f32.mrb[233].mxu1 }
 0x584   : > { %11921 = vst [vmem:[#allocation33_spill] sm:$0xff] %v11128_v29  ;;  %v6764_v61 = vadd.f32 %v6226_v59, %v11020_v27  ;;  %v6228_v54 = vpop.f32.mrb[234].mxu1  ;;  %v11927_v29 = vld [vmem:[#allocation32_spill] sm:$0xff] }
 0x585   : > { %v6938_v44 = vrot.slane %v6763_v20, 7  ;;  %v6229_v40 = vpop.f32.mrb[235].mxu1  ;;  %v11926_v20 = vld [vmem:[#allocation38_spill] sm:$0xff] }
 0x587   : > { %v6939_v56 = vsel %vm3276_vm0, %v6936_v28, %v6938_v44  ;;  %v5579_v48 = vpop.f32.mrb[20].mxu0  ;;  %6452 = vmatmul.mubr.bf16.gmra.mrb[148].mxu1 %v11922_v39 }
 0x588   : > { %v11134_v57 = vadd.f32 %v6939_v56, %v6764_v61  ;;  %v11137_v35 = vadd.f32 %v5579_v48, %v11924_v5  ;;  %v5581_v7 = vpop.f32.mrb[21].mxu0  ;;  %6460 = vmatprep.mubr.bf16.mxu1 %v11792_v16 }
 0x589   : > { %v5582_v26 = vpop.f32.mrb[22].mxu0 }
 0x58a   : > { %11923 = vst [vmem:[#allocation34_spill] sm:$0xff] %v11134_v57  ;;  %v11141_v63 = vadd.f32 %v5582_v26, %v11925_v22  ;;  %v5584_v27 = vpop.f32.mrb[23].mxu0  ;;  %v6232_v42 = vpop.f32.mrb[236].mxu1  ;;  %v11928_v26 = vld [vmem:[#allocation39_spill] sm:$0xff] }
 0x58b   : > { %v11144_v59 = vadd.f32 %v5584_v27, %v11926_v20  ;;  %v6767_v28 = vadd.f32 %v6232_v42, %v11026_v2  ;;  %v6234_v54 = vpop.f32.mrb[237].mxu1  ;;  %v11929_v27 = vld [vmem:[#allocation40_spill] sm:$0xff] }
 0x58c   : > { %v6235_v56 = vpop.f32.mrb[238].mxu1 }
 0x58d   : > { %v6768_v61 = vadd.f32 %v6235_v56, %v11030_v45  ;;  %v6237_v48 = vpop.f32.mrb[239].mxu1  ;;  %v6940_v40 = vrot.slane %v6767_v28, 7 }
 0x58e   : > { %v6769_v44 = vadd.f32 %v6237_v48, %v11033_v12 }
 0x58f   : > { %v6941_v5 = vrot.slane %v6768_v61, 7  ;;  %v5588_v7 = vpop.f32.mrb[24].mxu0  ;;  %6461 = vmatmul.mubr.bf16.gmra.mrb[152].mxu1 %v11927_v29 }
 0x590   : > { %v11151_v22 = vadd.f32 %v5588_v7, %v11928_v26  ;;  %v5590_v57 = vpop.f32.mrb[25].mxu0  ;;  %6468 = vmatprep.mubr.bf16.mxu1 %v11792_v16 }
 0x591   : > { %v6942_v2 = vsel %vm3276_vm0, %v6940_v40, %v6941_v5  ;;  %v11156_v42 = vadd.f32 %v5590_v57, %v11929_v27  ;;  %v5592_v45 = vpop.f32.mrb[26].mxu0  ;;  %v11931_v40 = vmov 0.0|0.0   ;;  %v11932_v27 = vld [vmem:[#allocation41_spill] sm:$0xff] }
 0x592   : > { %v11158_v20 = vadd.f32 %v6942_v2, %v6769_v44  ;;  %v5593_v12 = vpop.f32.mrb[27].mxu0  ;;  %v6241_v28 = vpop.f32.mrb[240].mxu1  ;;  %v11933_v45 = vld [vmem:[#allocation42_spill] sm:$0xff] }
 0x593   : > { %v6771_v54 = vadd.f32 %v6241_v28, %v11039_v6  ;;  %v6243_v56 = vpop.f32.mrb[241].mxu1 }
 0x594   : > { %11930 = vst [vmem:[#allocation35_spill] sm:$0xff] %v11158_v20  ;;  %v6772_v61 = vadd.f32 %v6243_v56, %v11043_v18  ;;  %v6245_v48 = vpop.f32.mrb[242].mxu1 }
 0x595   : > { %v6943_v7 = vrot.slane %v6771_v54, 7  ;;  %v6246_v26 = vpop.f32.mrb[243].mxu1  ;;  %v11934_v54 = vld [vmem:[#allocation43_spill] sm:$0xff] }
 0x597   : > { %v6944_v29 = vsel %vm3276_vm0, %v6941_v5, %v6943_v7  ;;  %v5596_v39 = vpop.f32.mrb[28].mxu0  ;;  %6469 = vmatmul.mubr.bf16.gmra.mrb[156].mxu1 %v11931_v40 }
 0x598   : > { %v11164_v57 = vadd.f32 %v6944_v29, %v6772_v61  ;;  %v11167_v44 = vadd.f32 %v5596_v39, %v11932_v27  ;;  %v5598_v2 = vpop.f32.mrb[29].mxu0  ;;  %6477 = vmatprep.mubr.bf16.mxu1 %v11792_v16 }
 0x599   : > { %v5599_v6 = vpop.f32.mrb[30].mxu0  ;;  %v11935_v2 = vld [vmem:[#allocation44_spill] sm:$0xff] }
 0x59a   : > { %v11171_v12 = vadd.f32 %v5599_v6, %v11933_v45  ;;  %v5601_v18 = vpop.f32.mrb[31].mxu0  ;;  %v6249_v28 = vpop.f32.mrb[244].mxu1 }
 0x59b   : > { %v11174_v56 = vadd.f32 %v5601_v18, %v11934_v54  ;;  %v6775_v5 = vadd.f32 %v6249_v28, %v11049_v9  ;;  %v6251_v48 = vpop.f32.mrb[245].mxu1  ;;  %v11936_v18 = vld [vmem:[#allocation45_spill] sm:$0xff] }
 0x59c   : > { %v6252_v29 = vpop.f32.mrb[246].mxu1 }
 0x59d   : > { %v6776_v61 = vadd.f32 %v6252_v29, %v11053_v23  ;;  %v6254_v39 = vpop.f32.mrb[247].mxu1  ;;  %v6945_v26 = vrot.slane %v6775_v5, 7 }
 0x59e   : > { %v6777_v7 = vadd.f32 %v6254_v39, %v11056_v46 }
 0x59f   : > { %v6946_v16 = vrot.slane %v6776_v61, 7  ;;  %v5605_v27 = vpop.f32.mrb[32].mxu0  ;;  %6478 = vmatmul.mubr.bf16.gmra.mrb[4].mxu1 %v11931_v40 }
 0x5a0   : > { %v11181_v6 = vadd.f32 %v5605_v27, %v11935_v2  ;;  %v5607_v45 = vpop.f32.mrb[33].mxu0  ;;  %8520 = vmatprep.mubr.bf16.mxu1 %v10293_v0 }
 0x5a1   : > { %v6947_v9 = vsel %vm3276_vm0, %v6945_v26, %v6946_v16  ;;  %v11186_v28 = vadd.f32 %v5607_v45, %v11936_v18  ;;  %v5609_v23 = vpop.f32.mrb[34].mxu0  ;;  %v11937_v45 = vld [vmem:[#allocation46_spill] sm:$0xff]  ;;  %v11938_v18 = vld [vmem:[#allocation47_spill] sm:$0xff] }
 0x5a2   : > { %v11188_v54 = vadd.f32 %v6947_v9, %v6777_v7  ;;  %v5610_v46 = vpop.f32.mrb[35].mxu0  ;;  %v6258_v5 = vpop.f32.mrb[248].mxu1 }
 0x5a3   : > { %v6779_v48 = vadd.f32 %v6258_v5, %v11061_v13  ;;  %v6260_v29 = vpop.f32.mrb[249].mxu1  ;;  %v11939_v5 = vld [vmem:[#allocation48_spill] sm:$0xff] }
 0x5a4   : > { %v6780_v61 = vadd.f32 %v6260_v29, %v11065_v15  ;;  %v6262_v39 = vpop.f32.mrb[250].mxu1 }
 0x5a5   : > { %v6948_v27 = vrot.slane %v6779_v48, 7  ;;  %v6263_v2 = vpop.f32.mrb[251].mxu1 }
 0x5a7   : > { %v6949_v0 = vsel %vm3276_vm0, %v6946_v16, %v6948_v27  ;;  %v5613_v20 = vpop.f32.mrb[36].mxu0  ;;  %8521 = vmatmul.mubr.bf16.vlgmr.msra.gmra.mrb[164].mxu1 %v10305_v38 }
 0x5a8   : > { %v11194_v26 = vadd.f32 %v6949_v0, %v6780_v61  ;;  %v11197_v7 = vadd.f32 %v5613_v20, %v11937_v45  ;;  %v5615_v9 = vpop.f32.mrb[37].mxu0  ;;  %8524 = vmatprep.mubr.bf16.mxu1 %v10326_v11  ;;  %v11940_v0 = vld [vmem:[#allocation49_spill] sm:$0xff] }
 0x5a9   : > { %v5616_v13 = vpop.f32.mrb[38].mxu0 }
 0x5aa   : > { %v11201_v23 = vadd.f32 %v5616_v13, %v11938_v18  ;;  %v5618_v15 = vpop.f32.mrb[39].mxu0  ;;  %v6266_v46 = vpop.f32.mrb[252].mxu1  ;;  %v11941_v13 = vld [vmem:[#allocation50_spill] sm:$0xff] }
 0x5ab   : > { %v11204_v48 = vadd.f32 %v5618_v15, %v11939_v5  ;;  %v6783_v16 = vadd.f32 %v6266_v46, %v11069_v49  ;;  %v6268_v38 = vpop.f32.mrb[253].mxu1 }
 0x5ac   : > { %v6269_v29 = vpop.f32.mrb[254].mxu1 }
 0x5ad   : > { %v6784_v61 = vadd.f32 %v6269_v29, %v11073_v55  ;;  %v6271_v20 = vpop.f32.mrb[255].mxu1  ;;  %v6950_v27 = vrot.slane %v6783_v16, 7 }
 0x5ae   : > { %v6785_v39 = vadd.f32 %v6271_v20, %v11076_v41 }
 0x5af   : > { %v6951_v11 = vrot.slane %v6784_v61, 7  ;;  %v5622_v2 = vpop.f32.mrb[40].mxu0  ;;  %8525 = vmatmul.mubr.bf16.gmra.mrb[168].mxu1 %v10338_v8 }
 0x5b0   : > { %v11211_v45 = vadd.f32 %v5622_v2, %v11940_v0  ;;  %v5624_v9 = vpop.f32.mrb[41].mxu0  ;;  %8528 = vmatprep.mubr.bf16.mxu1 %v10360_v47  ;;  %v11942_v2 = vld [vmem:[#allocation51_spill] sm:$0xff] }
 0x5b1   : > { %v6952_v49 = vsel %vm3276_vm0, %v6950_v27, %v6951_v11  ;;  %v11216_v18 = vadd.f32 %v5624_v9, %v11941_v13  ;;  %v5626_v55 = vpop.f32.mrb[42].mxu0  ;;  %v11943_v9 = vld [vmem:[#allocation52_spill] sm:$0xff] }
 0x5b2   : > { %v11218_v15 = vadd.f32 %v6952_v49, %v6785_v39  ;;  %v5627_v41 = vpop.f32.mrb[43].mxu0  ;;  %v6275_v46 = vpop.f32.mrb[0].mxu1  ;;  %v11944_v55 = vld [vmem:[#allocation53_spill] sm:$0xff] }
 0x5b3   : > { %v6787_v5 = vadd.f32 %v6275_v46, %v11080_v21  ;;  %v6277_v16 = vpop.f32.mrb[1].mxu1 }
 0x5b4   : > { %v6788_v8 = vadd.f32 %v6277_v16, %v11084_v19  ;;  %v6279_v38 = vpop.f32.mrb[2].mxu1 }
 0x5b5   : > { %v6953_v29 = vrot.slane %v6787_v5, 7  ;;  %v6280_v61 = vpop.f32.mrb[3].mxu1 }
 0x5b6   : > { %v11945_v61 = vld [vmem:[#allocation54_spill] sm:$0xff] }
 0x5b7   : > { %v6954_v47 = vsel %vm3276_vm0, %v6951_v11, %v6953_v29  ;;  %v5630_v20 = vpop.f32.mrb[44].mxu0  ;;  %8529 = vmatmul.mubr.bf16.gmra.mrb[172].mxu1 %v10373_v17 }
 0x5b8   : > { %v11224_v27 = vadd.f32 %v6954_v47, %v6788_v8  ;;  %v11227_v39 = vadd.f32 %v5630_v20, %v11942_v2  ;;  %v5632_v0 = vpop.f32.mrb[45].mxu0  ;;  %8532 = vmatprep.mubr.bf16.mxu1 %v10395_v1  ;;  %v11946_v2 = vld [vmem:[#allocation55_spill] sm:$0xff] }
 0x5b9   : > { %v5633_v21 = vpop.f32.mrb[46].mxu0 }
 0x5ba   : > { %v11231_v49 = vadd.f32 %v5633_v21, %v11943_v9  ;;  %v5635_v19 = vpop.f32.mrb[47].mxu0  ;;  %v6283_v13 = vpop.f32.mrb[68].mxu1 }
 0x5bb   : > { %v11234_v41 = vadd.f32 %v5635_v19, %v11944_v55  ;;  %v6791_v11 = vadd.f32 %v6283_v13, %v11088_v31  ;;  %v6285_v17 = vpop.f32.mrb[69].mxu1 }
 0x5bc   : > { %v6286_v46 = vpop.f32.mrb[70].mxu1 }
 0x5bd   : > { %v6792_v5 = vadd.f32 %v6286_v46, %v11092_v34  ;;  %v6288_v16 = vpop.f32.mrb[71].mxu1  ;;  %v6955_v38 = vrot.slane %v6791_v11, 7 }
 0x5be   : > { %v6793_v8 = vadd.f32 %v6288_v16, %v11095_v32  ;;  %v11947_v16 = vld [vmem:[#allocation56_spill] sm:$0xff] }
 0x5bf   : > { %v6956_v1 = vrot.slane %v6792_v5, 7  ;;  %v5639_v29 = vpop.f32.mrb[48].mxu0  ;;  %8533 = vmatmul.mubr.bf16.gmra.mrb[176].mxu1 %v10408_v36 }
 0x5c0   : > { %v11241_v47 = vadd.f32 %v5639_v29, %v11945_v61  ;;  %v5641_v20 = vpop.f32.mrb[49].mxu0  ;;  %8536 = vmatprep.mubr.bf16.mxu1 %v10430_v43  ;;  %v11948_v29 = vld [vmem:[#allocation57_spill] sm:$0xff] }
 0x5c1   : > { %v6957_v31 = vsel %vm3276_vm0, %v6955_v38, %v6956_v1  ;;  %v11246_v0 = vadd.f32 %v5641_v20, %v11946_v2  ;;  %v5643_v34 = vpop.f32.mrb[50].mxu0 }
 0x5c2   : > { %v11248_v21 = vadd.f32 %v6957_v31, %v6793_v8  ;;  %v5644_v32 = vpop.f32.mrb[51].mxu0  ;;  %v6292_v9 = vpop.f32.mrb[72].mxu1  ;;  %v11949_v31 = vld [vmem:[#allocation58_spill] sm:$0xff] }
 0x5c3   : > { %v6795_v19 = vadd.f32 %v6292_v9, %v11099_v4  ;;  %v6294_v13 = vpop.f32.mrb[73].mxu1 }
 0x5c4   : > { %v6796_v36 = vadd.f32 %v6294_v13, %v11103_v37  ;;  %v6296_v55 = vpop.f32.mrb[74].mxu1 }
 0x5c5   : > { %v6958_v11 = vrot.slane %v6795_v19, 7  ;;  %v6297_v17 = vpop.f32.mrb[75].mxu1  ;;  %v11950_v55 = vld [vmem:[#allocation59_spill] sm:$0xff] }
 0x5c7   : > { %v6959_v43 = vsel %vm3276_vm0, %v6956_v1, %v6958_v11  ;;  %v5647_v46 = vpop.f32.mrb[52].mxu0  ;;  %8537 = vmatmul.mubr.bf16.gmra.mrb[180].mxu1 %v10443_v52 }
 0x5c8   : > { %v11254_v5 = vadd.f32 %v6959_v43, %v6796_v36  ;;  %v11257_v8 = vadd.f32 %v5647_v46, %v11947_v16  ;;  %v5649_v38 = vpop.f32.mrb[53].mxu0  ;;  %8540 = vmatprep.mubr.bf16.mxu1 %v10465_v14  ;;  %v11951_v43 = vld [vmem:[#allocation60_spill] sm:$0xff] }
 0x5c9   : > { %v5650_v4 = vpop.f32.mrb[54].mxu0 }
 0x5ca   : > { %v11261_v61 = vadd.f32 %v5650_v4, %v11948_v29  ;;  %v5652_v37 = vpop.f32.mrb[55].mxu0  ;;  %v6300_v20 = vpop.f32.mrb[76].mxu1 }
 0x5cb   : > { %v11264_v2 = vadd.f32 %v5652_v37, %v11949_v31  ;;  %v6799_v1 = vadd.f32 %v6300_v20, %v11107_v62  ;;  %v6302_v52 = vpop.f32.mrb[77].mxu1 }
 0x5cc   : > { %v6303_v34 = vpop.f32.mrb[78].mxu1 }
 0x5cd   : > { %v6800_v32 = vadd.f32 %v6303_v34, %v11111_v25  ;;  %v6305_v9 = vpop.f32.mrb[79].mxu1  ;;  %v6960_v13 = vrot.slane %v6799_v1, 7  ;;  %v11952_v34 = vld [vmem:[#allocation61_spill] sm:$0xff] }
 0x5ce   : > { %v6801_v19 = vadd.f32 %v6305_v9, %v11114_v10 }
 0x5cf   : > { %v6961_v14 = vrot.slane %v6800_v32, 7  ;;  %v5656_v36 = vpop.f32.mrb[56].mxu0  ;;  %8541 = vmatmul.mubr.bf16.gmra.mrb[184].mxu1 %v10478_v53 }
 0x5d0   : > { %v11271_v11 = vadd.f32 %v5656_v36, %v11950_v55  ;;  %v5658_v17 = vpop.f32.mrb[57].mxu0  ;;  %8544 = vmatprep.mubr.bf16.mxu1 %v10500_v33  ;;  %v11954_v55 = vld [vmem:[#allocation63_spill] sm:$0xff] }
 0x5d1   : > { %v6962_v62 = vsel %vm3276_vm0, %v6960_v13, %v6961_v14  ;;  %v11276_v46 = vadd.f32 %v5658_v17, %v11951_v43  ;;  %v5660_v25 = vpop.f32.mrb[58].mxu0 }
 0x5d2   : > { %v11278_v16 = vadd.f32 %v6962_v62, %v6801_v19  ;;  %v5661_v10 = vpop.f32.mrb[59].mxu0  ;;  %v6309_v38 = vpop.f32.mrb[80].mxu1  ;;  %v11953_v19 = vld [vmem:[#allocation62_spill] sm:$0xff] }
 0x5d3   : > { %v6803_v4 = vadd.f32 %v6309_v38, %v11121_v30  ;;  %v6311_v29 = vpop.f32.mrb[81].mxu1 }
 0x5d4   : > { %v6804_v53 = vadd.f32 %v6311_v29, %v11126_v51  ;;  %v6313_v37 = vpop.f32.mrb[82].mxu1  ;;  %v11955_v29 = vld [vmem:[#allocation64_spill] sm:$0xff] }
 0x5d5   : > { %v6963_v20 = vrot.slane %v6803_v4, 7  ;;  %v6314_v31 = vpop.f32.mrb[83].mxu1 }
 0x5d7   : > { %v6964_v33 = vsel %vm3276_vm0, %v6961_v14, %v6963_v20  ;;  %v5664_v1 = vpop.f32.mrb[60].mxu0  ;;  %8545 = vmatmul.mubr.bf16.gmra.mrb[188].mxu1 %v10513_v24  ;;  %v11956_v20 = vld [vmem:[#allocation65_spill] sm:$0xff] }
 0x5d8   : > { %v11284_v52 = vadd.f32 %v6964_v33, %v6804_v53  ;;  %v11287_v32 = vadd.f32 %v5664_v1, %v11952_v34  ;;  %v5666_v9 = vpop.f32.mrb[61].mxu0  ;;  %8548 = vmatprep.mubr.bf16.mxu1 %v10529_v60 }
 0x5d9   : > { %v5667_v30 = vpop.f32.mrb[62].mxu0 }
 0x5da   : > { %v11291_v13 = vadd.f32 %v5667_v30, %v11953_v19  ;;  %v5669_v51 = vpop.f32.mrb[63].mxu0  ;;  %v6317_v36 = vpop.f32.mrb[84].mxu1 }
 0x5db   : > { %v11294_v17 = vadd.f32 %v5669_v51, %v11954_v55  ;;  %v6807_v14 = vadd.f32 %v6317_v36, %v11137_v35  ;;  %v6319_v24 = vpop.f32.mrb[85].mxu1  ;;  %v11957_v55 = vld [vmem:[#allocation21_spill] sm:$0xff] }
 0x5dc   : > { %v6320_v62 = vpop.f32.mrb[86].mxu1  ;;  %v11958_v24 = vld [vmem:[#allocation66_spill] sm:$0xff] }
 0x5dd   : > { %v6808_v43 = vadd.f32 %v6320_v62, %v11141_v63  ;;  %v6322_v25 = vpop.f32.mrb[87].mxu1  ;;  %v6965_v38 = vrot.slane %v6807_v14, 7 }
 0x5de   : > { %v6809_v10 = vadd.f32 %v6322_v25, %v11144_v59  ;;  %v11959_v25 = vld [vmem:[#allocation67_spill] sm:$0xff] }
 0x5df   : > { %v6966_v60 = vrot.slane %v6808_v43, 7  ;;  %v5673_v4 = vpop.f32.mrb[64].mxu0  ;;  %8549 = vmatmul.mubr.bf16.gmra.mrb[192].mxu1 %v10539_v50 }
 0x5e0   : > { %v11301_v53 = vadd.f32 %v5673_v4, %v11955_v29  ;;  %v5675_v37 = vpop.f32.mrb[65].mxu0  ;;  %8552 = vmatprep.mubr.bf16.mxu1 %v10552_v58  ;;  %v11960_v4 = vld [vmem:[#allocation68_spill] sm:$0xff] }
 0x5e1   : > { %v6967_v35 = vsel %vm3276_vm0, %v6965_v38, %v6966_v60  ;;  %v11306_v31 = vadd.f32 %v5675_v37, %v11956_v20  ;;  %v5677_v63 = vpop.f32.mrb[66].mxu0 }
 0x5e2   : > { %v11308_v33 = vadd.f32 %v6967_v35, %v6809_v10  ;;  %v5678_v59 = vpop.f32.mrb[67].mxu0  ;;  %v6326_v1 = vpop.f32.mrb[88].mxu1 }
 0x5e3   : > { %v6811_v34 = vadd.f32 %v6326_v1, %v11151_v22  ;;  %v6328_v9 = vpop.f32.mrb[89].mxu1 }
 0x5e4   : > { %v6812_v50 = vadd.f32 %v6328_v9, %v11156_v42  ;;  %v6330_v30 = vpop.f32.mrb[90].mxu1  ;;  %v11961_v9 = vld [vmem:[#allocation22_spill] sm:$0xff] }
 0x5e5   : > { %v6968_v19 = vrot.slane %v6811_v34, 7  ;;  %v6331_v51 = vpop.f32.mrb[91].mxu1 }
 0x5e6   : > { %v11963_v51 = vld [vmem:[#allocation23_spill] sm:$0xff] }
 0x5e7   : > { %v6969_v58 = vsel %vm3276_vm0, %v6966_v60, %v6968_v19  ;;  %v5681_v36 = vpop.f32.mrb[68].mxu0  ;;  %8553 = vmatmul.mubr.bf16.gmra.mrb[196].mxu1 %v11957_v55 }
 0x5e8   : > { %v11314_v14 = vadd.f32 %v6969_v58, %v6812_v50  ;;  %v11317_v62 = vadd.f32 %v5681_v36, %v11958_v24  ;;  %v5683_v43 = vpop.f32.mrb[69].mxu0  ;;  %8556 = vmatprep.mubr.bf16.mxu1 %v10580_v3  ;;  %v11962_v50 = vld [vmem:[#allocation69_spill] sm:$0xff]  ;;  %v11964_v58 = vld [vmem:[#allocation70_spill] sm:$0xff] }
 0x5e9   : > { %v5684_v22 = vpop.f32.mrb[70].mxu0 }
 0x5ea   : > { %v11321_v10 = vadd.f32 %v5684_v22, %v11959_v25  ;;  %v5686_v42 = vpop.f32.mrb[71].mxu0  ;;  %v6334_v38 = vpop.f32.mrb[92].mxu1 }
 0x5eb   : > { %v11324_v29 = vadd.f32 %v5686_v42, %v11960_v4  ;;  %v6815_v60 = vadd.f32 %v6334_v38, %v11167_v44  ;;  %v6336_v37 = vpop.f32.mrb[93].mxu1 }
 0x5ec   : > { %v6337_v35 = vpop.f32.mrb[94].mxu1 }
 0x5ed   : > { %v6816_v20 = vadd.f32 %v6337_v35, %v11171_v12  ;;  %v6339_v63 = vpop.f32.mrb[95].mxu1  ;;  %v6970_v1 = vrot.slane %v6815_v60, 7  ;;  %v11965_v35 = vld [vmem:[#allocation24_spill] sm:$0xff] }
 0x5ee   : > { %v6817_v59 = vadd.f32 %v6339_v63, %v11174_v56  ;;  %v11966_v63 = vld [vmem:[#allocation71_spill] sm:$0xff] }
 0x5ef   : > { %v6971_v3 = vrot.slane %v6816_v20, 7  ;;  %v5690_v34 = vpop.f32.mrb[72].mxu0  ;;  %8557 = vmatmul.mubr.bf16.gmra.mrb[200].mxu1 %v11961_v9  ;;  %v11968_v9 = vld [vmem:[#allocation72_spill] sm:$0xff] }
 0x5f0   : > { %v11331_v30 = vadd.f32 %v5690_v34, %v11962_v50  ;;  %v5692_v19 = vpop.f32.mrb[73].mxu0  ;;  %8560 = vmatprep.mubr.bf16.mxu1 %v11963_v51  ;;  %v11967_v34 = vld [vmem:[#allocation25_spill] sm:$0xff] }
 0x5f1   : > { %v6972_v44 = vsel %vm3276_vm0, %v6970_v1, %v6971_v3  ;;  %v11336_v36 = vadd.f32 %v5692_v19, %v11964_v58  ;;  %v5694_v12 = vpop.f32.mrb[74].mxu0  ;;  %v11969_v51 = vld [vmem:[#allocation73_spill] sm:$0xff] }
 0x5f2   : > { %v11338_v55 = vadd.f32 %v6972_v44, %v6817_v59  ;;  %v5695_v56 = vpop.f32.mrb[75].mxu0  ;;  %v6343_v24 = vpop.f32.mrb[96].mxu1 }
 0x5f3   : > { %v6819_v43 = vadd.f32 %v6343_v24, %v11181_v6  ;;  %v6345_v22 = vpop.f32.mrb[97].mxu1 }
 0x5f4   : > { %v6820_v25 = vadd.f32 %v6345_v22, %v11186_v28  ;;  %v6347_v42 = vpop.f32.mrb[98].mxu1 }
 0x5f5   : > { %v6973_v38 = vrot.slane %v6819_v43, 7  ;;  %v6348_v4 = vpop.f32.mrb[99].mxu1 }
 0x5f6   : > { %v11971_v4 = vld [vmem:[#allocation74_spill] sm:$0xff] }
 0x5f7   : > { %v6974_v60 = vsel %vm3276_vm0, %v6971_v3, %v6973_v38  ;;  %v5698_v37 = vpop.f32.mrb[76].mxu0  ;;  %8561 = vmatmul.mubr.bf16.gmra.mrb[204].mxu1 %v11965_v35  ;;  %v11970_v38 = vld [vmem:[#allocation26_spill] sm:$0xff]  ;;  %v11972_v35 = vld [vmem:[#allocation27_spill] sm:$0xff] }
 0x5f8   : > { %v11344_v20 = vadd.f32 %v6974_v60, %v6820_v25  ;;  %v11347_v59 = vadd.f32 %v5698_v37, %v11966_v63  ;;  %v5700_v1 = vpop.f32.mrb[77].mxu0  ;;  %8564 = vmatprep.mubr.bf16.mxu1 %v11967_v34  ;;  %v11973_v63 = vld [vmem:[#allocation75_spill] sm:$0xff] }
 0x5f9   : > { %v5701_v6 = vpop.f32.mrb[78].mxu0 }
 0x5fa   : > { %v11351_v50 = vadd.f32 %v5701_v6, %v11968_v9  ;;  %v5703_v28 = vpop.f32.mrb[79].mxu0  ;;  %v6351_v19 = vpop.f32.mrb[100].mxu1 }
 0x5fb   : > { %v11354_v44 = vadd.f32 %v5703_v28, %v11969_v51  ;;  %v6823_v3 = vadd.f32 %v6351_v19, %v11197_v7  ;;  %v6353_v58 = vpop.f32.mrb[101].mxu1 }
 0x5fc   : > { %v6354_v12 = vpop.f32.mrb[102].mxu1 }
 0x5fd   : > { %v6824_v56 = vadd.f32 %v6354_v12, %v11201_v23  ;;  %v6356_v24 = vpop.f32.mrb[103].mxu1  ;;  %v6975_v22 = vrot.slane %v6823_v3, 7 }
 0x5fe   : > { %v6825_v43 = vadd.f32 %v6356_v24, %v11204_v48  ;;  %v11974_v24 = vld [vmem:[#allocation28_spill] sm:$0xff] }
 0x5ff   : > { %v6976_v25 = vrot.slane %v6824_v56, 7  ;;  %v5707_v42 = vpop.f32.mrb[80].mxu0  ;;  %8565 = vmatmul.mubr.bf16.gmra.mrb[208].mxu1 %v11970_v38 }
 0x600   : > { %v11361_v60 = vadd.f32 %v5707_v42, %v11971_v4  ;;  %v5709_v37 = vpop.f32.mrb[81].mxu0  ;;  %8568 = vmatprep.mubr.bf16.mxu1 %v11972_v35  ;;  %v11975_v42 = vld [vmem:[#allocation76_spill] sm:$0xff]  ;;  %v11976_v4 = vld [vmem:[#allocation29_spill] sm:$0xff] }
 0x601   : > { %v6977_v7 = vsel %vm3276_vm0, %v6975_v22, %v6976_v25  ;;  %v11366_v1 = vadd.f32 %v5709_v37, %v11973_v63  ;;  %v5711_v23 = vpop.f32.mrb[82].mxu0  ;;  %v11977_v37 = vld [vmem:[#allocation77_spill] sm:$0xff]  ;;  %v11978_v63 = vld [vmem:[#allocation78_spill] sm:$0xff] }
 0x602   : > { %v11368_v34 = vadd.f32 %v6977_v7, %v6825_v43  ;;  %v5712_v48 = vpop.f32.mrb[83].mxu0  ;;  %v6360_v6 = vpop.f32.mrb[104].mxu1 }
 0x603   : > { %v6827_v9 = vadd.f32 %v6360_v6, %v11211_v45  ;;  %v6362_v28 = vpop.f32.mrb[105].mxu1 }
 0x604   : > { %v6828_v19 = vadd.f32 %v6362_v28, %v11216_v18  ;;  %v6364_v51 = vpop.f32.mrb[106].mxu1 }
 0x605   : > { %v6978_v3 = vrot.slane %v6827_v9, 7  ;;  %v6365_v58 = vpop.f32.mrb[107].mxu1 }
 0x607   : > { %v6979_v12 = vsel %vm3276_vm0, %v6976_v25, %v6978_v3  ;;  %v5715_v56 = vpop.f32.mrb[84].mxu0  ;;  %8569 = vmatmul.mubr.bf16.gmra.mrb[212].mxu1 %v11974_v24 }
 0x608   : > { %v11374_v22 = vadd.f32 %v6979_v12, %v6828_v19  ;;  %v11377_v43 = vadd.f32 %v5715_v56, %v11975_v42  ;;  %v5717_v38 = vpop.f32.mrb[85].mxu0  ;;  %8572 = vmatprep.mubr.bf16.mxu1 %v11976_v4  ;;  %v11979_v12 = vld [vmem:[#allocation30_spill] sm:$0xff]  ;;  %v11980_v56 = vld [vmem:[#allocation79_spill] sm:$0xff]  ;;  %v11982_v4 = vld [vmem:[#allocation80_spill] sm:$0xff] }
 0x609   : > { %v5718_v45 = vpop.f32.mrb[86].mxu0  ;;  %v11981_v38 = vld [vmem:[#allocation31_spill] sm:$0xff] }
 0x60a   : > { %v11381_v35 = vadd.f32 %v5718_v45, %v11977_v37  ;;  %v5720_v18 = vpop.f32.mrb[87].mxu0  ;;  %v6368_v7 = vpop.f32.mrb[108].mxu1 }
 0x60b   : > { %v11384_v23 = vadd.f32 %v5720_v18, %v11978_v63  ;;  %v6831_v25 = vadd.f32 %v6368_v7, %v11227_v39  ;;  %v6370_v48 = vpop.f32.mrb[109].mxu1 }
 0x60c   : > { %v6371_v6 = vpop.f32.mrb[110].mxu1 }
 0x60d   : > { %v6832_v9 = vadd.f32 %v6371_v6, %v11231_v49  ;;  %v6373_v28 = vpop.f32.mrb[111].mxu1  ;;  %v6980_v51 = vrot.slane %v6831_v25, 7 }
 0x60e   : > { %v6833_v19 = vadd.f32 %v6373_v28, %v11234_v41 }
 0x60f   : > { %v6981_v3 = vrot.slane %v6832_v9, 7  ;;  %v5724_v58 = vpop.f32.mrb[88].mxu0  ;;  %8573 = vmatmul.mubr.bf16.gmra.mrb[216].mxu1 %v11979_v12 }
 0x610   : > { %v11391_v24 = vadd.f32 %v5724_v58, %v11980_v56  ;;  %v5726_v42 = vpop.f32.mrb[89].mxu0  ;;  %8576 = vmatprep.mubr.bf16.mxu1 %v11981_v38  ;;  %v11984_v56 = vld [vmem:[#allocation81_spill] sm:$0xff]  ;;  %v11985_v38 = vld [vmem:[#allocation82_spill] sm:$0xff] }
 0x611   : > { %v6982_v39 = vsel %vm3276_vm0, %v6980_v51, %v6981_v3  ;;  %v11396_v45 = vadd.f32 %v5726_v42, %v11982_v4  ;;  %v5728_v49 = vpop.f32.mrb[90].mxu0  ;;  %v11983_v51 = vld [vmem:[#allocation32_spill] sm:$0xff] }
 0x612   : > { %v11398_v37 = vadd.f32 %v6982_v39, %v6833_v19  ;;  %v5729_v41 = vpop.f32.mrb[91].mxu0  ;;  %v6377_v18 = vpop.f32.mrb[112].mxu1  ;;  %v11986_v49 = vld [vmem:[#allocation83_spill] sm:$0xff] }
 0x613   : > { %v6835_v7 = vadd.f32 %v6377_v18, %v11241_v47  ;;  %v6379_v63 = vpop.f32.mrb[113].mxu1 }
 0x614   : > { %v6836_v25 = vadd.f32 %v6379_v63, %v11246_v0  ;;  %v6381_v48 = vpop.f32.mrb[114].mxu1 }
 0x615   : > { %v6983_v6 = vrot.slane %v6835_v7, 7  ;;  %v6382_v9 = vpop.f32.mrb[115].mxu1 }
 0x617   : > { %v6984_v28 = vsel %vm3276_vm0, %v6981_v3, %v6983_v6  ;;  %v5732_v58 = vpop.f32.mrb[92].mxu0  ;;  %8577 = vmatmul.mubr.bf16.gmra.mrb[220].mxu1 %v11983_v51 }
 0x618   : > { %v11404_v12 = vadd.f32 %v6984_v28, %v6836_v25  ;;  %v11407_v19 = vadd.f32 %v5732_v58, %v11984_v56  ;;  %v5734_v42 = vpop.f32.mrb[93].mxu0  ;;  %8580 = vmatprep.mubr.bf16.mxu1 %v11931_v40  ;;  %v11987_v58 = vld [vmem:[#allocation84_spill] sm:$0xff] }
 0x619   : > { %v5735_v47 = vpop.f32.mrb[94].mxu0 }
 0x61a   : > { %v11411_v39 = vadd.f32 %v5735_v47, %v11985_v38  ;;  %v5737_v0 = vpop.f32.mrb[95].mxu0  ;;  %v6385_v4 = vpop.f32.mrb[116].mxu1  ;;  %v11988_v47 = vld [vmem:[#allocation85_spill] sm:$0xff] }
 0x61b   : > { %v11414_v41 = vadd.f32 %v5737_v0, %v11986_v49  ;;  %v6839_v3 = vadd.f32 %v6385_v4, %v11257_v8  ;;  %v6387_v18 = vpop.f32.mrb[117].mxu1 }
 0x61c   : > { %v6388_v7 = vpop.f32.mrb[118].mxu1 }
 0x61d   : > { %v6840_v63 = vadd.f32 %v6388_v7, %v11261_v61  ;;  %v6390_v25 = vpop.f32.mrb[119].mxu1  ;;  %v6985_v6 = vrot.slane %v6839_v3, 7 }
 0x61e   : > { %v6841_v48 = vadd.f32 %v6390_v25, %v11264_v2 }
 0x61f   : > { %v6986_v9 = vrot.slane %v6840_v63, 7  ;;  %v5741_v28 = vpop.f32.mrb[96].mxu0  ;;  %8581 = vmatmul.mubr.bf16.gmra.mrb[224].mxu1 %v11931_v40 }
 0x620   : > { %v11421_v51 = vadd.f32 %v5741_v28, %v11987_v58  ;;  %v5743_v56 = vpop.f32.mrb[97].mxu0 }
 0x621   : > { %v6987_v42 = vsel %vm3276_vm0, %v6985_v6, %v6986_v9  ;;  %v11425_v8 = vadd.f32 %v5743_v56, %v11988_v47  ;;  %v5745_v38 = vpop.f32.mrb[98].mxu0 }
 0x622   : > { %v11427_v0 = vadd.f32 %v6987_v42, %v6841_v48  ;;  %v5746_v61 = vpop.f32.mrb[99].mxu0  ;;  %v6394_v4 = vpop.f32.mrb[120].mxu1 }
 0x623   : > { %v6843_v2 = vadd.f32 %v6394_v4, %v11271_v11  ;;  %v6396_v49 = vpop.f32.mrb[121].mxu1 }
 0x624   : > { %v6844_v3 = vadd.f32 %v6396_v49, %v11276_v46  ;;  %v6398_v40 = vpop.f32.mrb[122].mxu1 }
 0x625   : > { %v6988_v18 = vrot.slane %v6843_v2, 7  ;;  %v6399_v7 = vpop.f32.mrb[123].mxu1 }
 0x627   : > { %v6989_v63 = vsel %vm3276_vm0, %v6986_v9, %v6988_v18 }
 0x628   : > { %v11432_v25 = vadd.f32 %v6989_v63, %v6844_v3 }
 0x62a   : > { %v6402_v6 = vpop.f32.mrb[124].mxu1 }
 0x62b   : > { %v6847_v28 = vadd.f32 %v6402_v6, %v11287_v32  ;;  %v6404_v58 = vpop.f32.mrb[125].mxu1 }
 0x62c   : > { %v6405_v48 = vpop.f32.mrb[126].mxu1 }
 0x62d   : > { %v6848_v56 = vadd.f32 %v6405_v48, %v11291_v13  ;;  %v6407_v42 = vpop.f32.mrb[127].mxu1  ;;  %v6990_v47 = vrot.slane %v6847_v28, 7 }
 0x62e   : > { %v6849_v11 = vadd.f32 %v6407_v42, %v11294_v17 }
 0x62f   : > { %v6991_v38 = vrot.slane %v6848_v56, 7 }
 0x631   : > { %v6992_v46 = vsel %vm3276_vm0, %v6990_v47, %v6991_v38 }
 0x632   : > { %v11438_v61 = vadd.f32 %v6992_v46, %v6849_v11  ;;  %v6411_v4 = vpop.f32.mrb[128].mxu1 }
 0x633   : > { %v6851_v9 = vadd.f32 %v6411_v4, %v11301_v53  ;;  %v6413_v2 = vpop.f32.mrb[129].mxu1 }
 0x634   : > { %v6852_v49 = vadd.f32 %v6413_v2, %v11306_v31  ;;  %v6415_v32 = vpop.f32.mrb[130].mxu1 }
 0x635   : > { %v6993_v3 = vrot.slane %v6851_v9, 7  ;;  %v6416_v40 = vpop.f32.mrb[131].mxu1 }
 0x637   : > { %v6994_v13 = vsel %vm3276_vm0, %v6991_v38, %v6993_v3 }
 0x638   : > { %v11443_v18 = vadd.f32 %v6994_v13, %v6852_v49 }
 0x63a   : > { %v6419_v17 = vpop.f32.mrb[132].mxu1 }
 0x63b   : > { %v6855_v7 = vadd.f32 %v6419_v17, %v11317_v62  ;;  %v6421_v63 = vpop.f32.mrb[133].mxu1 }
 0x63c   : > { %v6422_v6 = vpop.f32.mrb[134].mxu1 }
 0x63d   : > { %v6856_v28 = vadd.f32 %v6422_v6, %v11321_v10  ;;  %v6424_v58 = vpop.f32.mrb[135].mxu1  ;;  %v6995_v48 = vrot.slane %v6855_v7, 7 }
 0x63e   : > { %v6857_v53 = vadd.f32 %v6424_v58, %v11324_v29 }
 0x63f   : > { %v6996_v56 = vrot.slane %v6856_v28, 7 }
 0x641   : > { %v6997_v31 = vsel %vm3276_vm0, %v6995_v48, %v6996_v56 }
 0x642   : > { %v11449_v42 = vadd.f32 %v6997_v31, %v6857_v53  ;;  %v6428_v11 = vpop.f32.mrb[136].mxu1 }
 0x643   : > { %v6859_v47 = vadd.f32 %v6428_v11, %v11331_v30  ;;  %v6430_v38 = vpop.f32.mrb[137].mxu1 }
 0x644   : > { %v6860_v46 = vadd.f32 %v6430_v38, %v11336_v36  ;;  %v6432_v62 = vpop.f32.mrb[138].mxu1 }
 0x645   : > { %v6998_v4 = vrot.slane %v6859_v47, 7  ;;  %v6433_v9 = vpop.f32.mrb[139].mxu1 }
 0x647   : > { %v6999_v10 = vsel %vm3276_vm0, %v6996_v56, %v6998_v4 }
 0x648   : > { %v11454_v2 = vadd.f32 %v6999_v10, %v6860_v46 }
 0x64a   : > { %v6436_v29 = vpop.f32.mrb[140].mxu1 }
 0x64b   : > { %v6863_v49 = vadd.f32 %v6436_v29, %v11347_v59  ;;  %v6438_v32 = vpop.f32.mrb[141].mxu1 }
 0x64c   : > { %v6439_v3 = vpop.f32.mrb[142].mxu1 }
 0x64d   : > { %v6864_v40 = vadd.f32 %v6439_v3, %v11351_v50  ;;  %v6441_v13 = vpop.f32.mrb[143].mxu1  ;;  %v7000_v17 = vrot.slane %v6863_v49, 7 }
 0x64e   : > { %v6865_v30 = vadd.f32 %v6441_v13, %v11354_v44 }
 0x64f   : > { %v7001_v7 = vrot.slane %v6864_v40, 7 }
 0x651   : > { %v7002_v36 = vsel %vm3276_vm0, %v7000_v17, %v7001_v7 }
 0x652   : > { %v11460_v63 = vadd.f32 %v7002_v36, %v6865_v30  ;;  %v6445_v6 = vpop.f32.mrb[144].mxu1 }
 0x653   : > { %v6867_v28 = vadd.f32 %v6445_v6, %v11361_v60  ;;  %v6447_v58 = vpop.f32.mrb[145].mxu1 }
 0x654   : > { %v6868_v53 = vadd.f32 %v6447_v58, %v11366_v1  ;;  %v6449_v59 = vpop.f32.mrb[146].mxu1 }
 0x655   : > { %v7003_v48 = vrot.slane %v6867_v28, 7  ;;  %v6450_v56 = vpop.f32.mrb[147].mxu1 }
 0x657   : > { %v7004_v50 = vsel %vm3276_vm0, %v7001_v7, %v7003_v48 }
 0x658   : > { %v11465_v31 = vadd.f32 %v7004_v50, %v6868_v53 }
 0x65a   : > { %v6453_v44 = vpop.f32.mrb[148].mxu1 }
 0x65b   : > { %v6871_v11 = vadd.f32 %v6453_v44, %v11377_v43  ;;  %v6455_v47 = vpop.f32.mrb[149].mxu1 }
 0x65c   : > { %v6456_v38 = vpop.f32.mrb[150].mxu1 }
 0x65d   : > { %v6872_v46 = vadd.f32 %v6456_v38, %v11381_v35  ;;  %v6458_v62 = vpop.f32.mrb[151].mxu1  ;;  %v7005_v4 = vrot.slane %v6871_v11, 7 }
 0x65e   : > { %v6873_v60 = vadd.f32 %v6458_v62, %v11384_v23  ;;  %v9170_v62 = vld [vmem:[#allocation2 + $0x28] sm:$0xff] }
 0x65f   : > { %v7006_v9 = vrot.slane %v6872_v46, 7 }
 0x661   : > { %v7007_v1 = vsel %vm3276_vm0, %v7005_v4, %v7006_v9 }
 0x662   : > { %v11471_v10 = vadd.f32 %v7007_v1, %v6873_v60  ;;  %v6462_v29 = vpop.f32.mrb[152].mxu1  ;;  %v7305_v60 = vrot.slane %v9170_v62, 4 }
 0x663   : > { %v6875_v49 = vadd.f32 %v6462_v29, %v11391_v24  ;;  %v6464_v32 = vpop.f32.mrb[153].mxu1 }
 0x664   : > { %v6876_v3 = vadd.f32 %v6464_v32, %v11396_v45  ;;  %v6466_v43 = vpop.f32.mrb[154].mxu1 }
 0x665   : > { %v7008_v40 = vrot.slane %v6875_v49, 7  ;;  %v6467_v13 = vpop.f32.mrb[155].mxu1  ;;  %v11494_v43 = vld [vmem:[%s11699_s4] ss:$0 sm:$0xff] }
 0x667   : > { %v7009_v35 = vsel %vm3276_vm0, %v7006_v9, %v7008_v40  ;;  %v11989_v40 = vld [vmem:[#allocation34_spill] sm:$0xff] }
 0x668   : > { %v11476_v30 = vadd.f32 %v7009_v35, %v6876_v3 }
 0x66a   : > { %v6470_v23 = vpop.f32.mrb[156].mxu1 }
 0x66b   : > { %v6879_v17 = vadd.f32 %v6470_v23, %v11407_v19  ;;  %v6472_v7 = vpop.f32.mrb[157].mxu1 }
 0x66c   : > { %v6473_v36 = vpop.f32.mrb[158].mxu1 }
 0x66d   : > { %v6880_v6 = vadd.f32 %v6473_v36, %v11411_v39  ;;  %v6475_v28 = vpop.f32.mrb[159].mxu1  ;;  %v7010_v58 = vrot.slane %v6879_v17, 7  ;;  %v11990_v17 = vld [vmem:[#allocation33_spill] sm:$0xff] }
 0x66e   : > { %v6881_v24 = vadd.f32 %v6475_v28, %v11414_v41  ;;  %v9169_v41 = vld [vmem:[#allocation2 + $0x20] sm:$0xff] }
 0x66f   : > { %v7011_v53 = vrot.slane %v6880_v6, 7  ;;  %v7304_v46 = vrot.slane %v9169_v41, 4  ;;  %v9171_v6 = vld [vmem:[#allocation2 + $0x30] sm:$0xff] }
 0x670   : > { %v7307_v28 = vrot.slane %v9171_v6, 4 }
 0x671   : > { %v7012_v45 = vsel %vm3276_vm0, %v7010_v58, %v7011_v53  ;;  %v7306_v49 = vsel %vm7303_vm2, %v7304_v46, %v7305_v60 }
 0x672   : > { %v11482_v59 = vadd.f32 %v7012_v45, %v6881_v24  ;;  %v6479_v48 = vpop.f32.mrb[4].mxu1  ;;  %v7369_v35 = vunpack.c.h.bf16 %v7306_v49  ;;  %v7368_v36 = vunpack.c.l.bf16 %v7306_v49  ;;  %v9172_v24 = vld [vmem:[#allocation2 + $0x38] sm:$0xff] }
 0x673   : > { %v6883_v56 = vadd.f32 %v6479_v48, %v11421_v51  ;;  %v6481_v50 = vpop.f32.mrb[5].mxu1  ;;  %v7308_v58 = vrot.slane %v9172_v24, 4 }
 0x674   : > { %v6884_v44 = vadd.f32 %v6481_v50, %v11425_v8  ;;  %v6483_v19 = vpop.f32.mrb[6].mxu1 }
 0x675   : > { %v7013_v11 = vrot.slane %v6883_v56, 7  ;;  %v6484_v47 = vpop.f32.mrb[7].mxu1 }
 0x677   : > { %v7014_v39 = vsel %vm3276_vm0, %v7011_v53, %v7013_v11 }
 0x678   : > { %v11487_v38 = vadd.f32 %v7014_v39, %v6884_v44  ;;  %v7309_v39 = vsel %vm7303_vm2, %v7307_v28, %v7308_v58 }
 0x67a   : > { %v8522_v4 = vpop.f32.mrb[164].mxu1 }
 0x67b   : > { %v6520_v9 = vpop.f32.mrb[165].mxu1  ;;  %v7128_v29 = vrot.slane %v8522_v4, 1 }
 0x67c   : > { %v8523_v1 = vpop.f32.mrb[166].mxu1 }
 0x67d   : > { %v7130_v51 = vrot.slane %v8523_v1, 1  ;;  %v6522_v8 = vpop.f32.mrb[167].mxu1  ;;  %v7371_v1 = vunpack.c.h.bf16 %v7309_v39 }
 0x67e   : > { %v7127_v32 = vrot.slane %v6522_v8, 1  ;;  %v7370_v8 = vunpack.c.l.bf16 %v7309_v39 }
 0x67f   : > { %v7131_v3 = vsel %vm3619_vm1, %v7128_v29, %v7130_v51  ;;  %v11991_v51 = vld [vmem:[#allocation35_spill] sm:$0xff] }
 0x680   : > { %v7240_v13 = vadd.f32 %v7131_v3, %v11989_v40  ;;  %v7129_v23 = vsel %vm3619_vm1, %v7127_v32, %v7128_v29  ;;  %v9173_v32 = vld [vmem:[#allocation2 + $0x40] sm:$0xff]  ;;  %v9174_v40 = vld [vmem:[#allocation2 + $0x48] sm:$0xff] }
 0x681   : > { %v7239_v7 = vadd.f32 %v7129_v23, %v11990_v17  ;;  %v7310_v3 = vrot.slane %v9173_v32, 4 }
 0x682   : > { %v7408_v53 = vadd.f32 %v11494_v43, %v7240_v13  ;;  %v8526_v45 = vpop.f32.mrb[168].mxu1  ;;  %v7311_v13 = vrot.slane %v9174_v40, 4 }
 0x683   : > { %v7407_v48 = vadd.f32 %v11494_v43, %v7239_v7  ;;  %v6535_v56 = vpop.f32.mrb[169].mxu1  ;;  %v7133_v11 = vrot.slane %v8526_v45, 1 }
 0x684   : > { %v7440_v50 = vadd.f32 %v7408_v53, %v7369_v35  ;;  %v8527_v44 = vpop.f32.mrb[170].mxu1  ;;  %v7312_v58 = vsel %vm7303_vm2, %v7310_v3, %v7311_v13 }
 0x685   : > { %v7439_v19 = vadd.f32 %v7407_v48, %v7368_v36  ;;  %v7135_v47 = vrot.slane %v8527_v44, 1  ;;  %v6537_v41 = vpop.f32.mrb[171].mxu1  ;;  %v7372_v39 = vunpack.c.l.bf16 %v7312_v58 }
 0x686   : > { %v7472_v46 = vmax.f32 %v7440_v50, 0.0  ;;  %v7132_v62 = vrot.slane %v6537_v41, 1  ;;  %v9175_v41 = vld [vmem:[#allocation2 + $0x50] sm:$0xff] }
 0x687   : > { %v7471_v60 = vmax.f32 %v7439_v19, 0.0  ;;  %v7136_v4 = vsel %vm3619_vm1, %v7133_v11, %v7135_v47  ;;  %v7373_v19 = vunpack.c.h.bf16 %v7312_v58  ;;  %v9178_v58 = vld [vmem:[#allocation2 + $0x68] sm:$0xff] }
 0x688   : > { %7504 = vst [vmem:[%s9555_s13 + $0x8] sm:$0xff] %v7472_v46  ;;  %v7242_v9 = vadd.f32 %v7136_v4, %v11164_v57  ;;  %v7134_v29 = vsel %vm3619_vm1, %v7132_v62, %v7133_v11  ;;  %v7313_v46 = vrot.slane %v9175_v41, 4  ;;  %v9176_v62 = vld [vmem:[#allocation2 + $0x58] sm:$0xff] }
 0x689   : > { %7503 = vst [vmem:[%s9555_s13] sm:$0xff] %v7471_v60  ;;  %v7241_v49 = vadd.f32 %v7134_v29, %v11991_v51  ;;  %v7314_v60 = vrot.slane %v9176_v62, 4 }
 0x68a   : > { %v7410_v35 = vadd.f32 %v11494_v43, %v7242_v9  ;;  %v8530_v23 = vpop.f32.mrb[172].mxu1 }
 0x68b   : > { %v7409_v17 = vadd.f32 %v11494_v43, %v7241_v49  ;;  %v6550_v7 = vpop.f32.mrb[173].mxu1  ;;  %v7138_v28 = vrot.slane %v8530_v23, 1 }
 0x68c   : > { %v7442_v57 = vadd.f32 %v7410_v35, %v7371_v1  ;;  %v8531_v36 = vpop.f32.mrb[174].mxu1 }
 0x68d   : > { %v7441_v6 = vadd.f32 %v7409_v17, %v7370_v8  ;;  %v7140_v24 = vrot.slane %v8531_v36, 1  ;;  %v6552_v53 = vpop.f32.mrb[175].mxu1 }
 0x68e   : > { %v7474_v45 = vmax.f32 %v7442_v57, 0.0  ;;  %v7137_v48 = vrot.slane %v6552_v53, 1  ;;  %v7317_v53 = vrot.slane %v9178_v58, 4 }
 0x68f   : > { %v7473_v56 = vmax.f32 %v7441_v6, 0.0  ;;  %v7141_v50 = vsel %vm3619_vm1, %v7138_v28, %v7140_v24 }
 0x690   : > { %7506 = vst [vmem:[%s9555_s13 + $0x18] sm:$0xff] %v7474_v45  ;;  %v7244_v44 = vadd.f32 %v7141_v50, %v11194_v26  ;;  %v7139_v11 = vsel %vm3619_vm1, %v7137_v48, %v7138_v28  ;;  %v9177_v28 = vld [vmem:[#allocation2 + $0x60] sm:$0xff] }
 0x691   : > { %7505 = vst [vmem:[%s9555_s13 + $0x10] sm:$0xff] %v7473_v56  ;;  %v7243_v47 = vadd.f32 %v7139_v11, %v11188_v54  ;;  %v7315_v54 = vsel %vm7303_vm2, %v7313_v46, %v7314_v60  ;;  %v7316_v24 = vrot.slane %v9177_v28, 4 }
 0x692   : > { %v7412_v4 = vadd.f32 %v11494_v43, %v7244_v44  ;;  %v8534_v9 = vpop.f32.mrb[176].mxu1  ;;  %v7375_v7 = vunpack.c.h.bf16 %v7315_v54  ;;  %v7374_v6 = vunpack.c.l.bf16 %v7315_v54 }
 0x693   : > { %v7411_v1 = vadd.f32 %v11494_v43, %v7243_v47  ;;  %v6565_v29 = vpop.f32.mrb[177].mxu1  ;;  %v7143_v8 = vrot.slane %v8534_v9, 1 }
 0x694   : > { %v7444_v26 = vadd.f32 %v7412_v4, %v7373_v19  ;;  %v8535_v51 = vpop.f32.mrb[178].mxu1 }
 0x695   : > { %v7443_v49 = vadd.f32 %v7411_v1, %v7372_v39  ;;  %v7145_v32 = vrot.slane %v8535_v51, 1  ;;  %v6567_v3 = vpop.f32.mrb[179].mxu1  ;;  %v9179_v51 = vld [vmem:[#allocation2 + $0x70] sm:$0xff] }
 0x696   : > { %v7476_v40 = vmax.f32 %v7444_v26, 0.0  ;;  %v7142_v13 = vrot.slane %v6567_v3, 1 }
 0x697   : > { %v7475_v35 = vmax.f32 %v7443_v49, 0.0  ;;  %v7146_v23 = vsel %vm3619_vm1, %v7143_v8, %v7145_v32  ;;  %v7319_v49 = vrot.slane %v9179_v51, 4 }
 0x698   : > { %7508 = vst [vmem:[%s9555_s13 + $0x28] sm:$0xff] %v7476_v40  ;;  %v7246_v17 = vadd.f32 %v7146_v23, %v11224_v27  ;;  %v7144_v57 = vsel %vm3619_vm1, %v7142_v13, %v7143_v8  ;;  %v9180_v8 = vld [vmem:[#allocation2 + $0x78] sm:$0xff] }
 0x699   : > { %7507 = vst [vmem:[%s9555_s13 + $0x20] sm:$0xff] %v7475_v35  ;;  %v7245_v36 = vadd.f32 %v7144_v57, %v11218_v15  ;;  %v7318_v15 = vsel %vm7303_vm2, %v7316_v24, %v7317_v53  ;;  %v7320_v32 = vrot.slane %v9180_v8, 4 }
 0x69a   : > { %v7414_v45 = vadd.f32 %v11494_v43, %v7246_v17  ;;  %v8538_v48 = vpop.f32.mrb[180].mxu1  ;;  %v7377_v9 = vunpack.c.h.bf16 %v7318_v15  ;;  %v7376_v26 = vunpack.c.l.bf16 %v7318_v15 }
 0x69b   : > { %v7413_v56 = vadd.f32 %v11494_v43, %v7245_v36  ;;  %v6580_v50 = vpop.f32.mrb[181].mxu1  ;;  %v7148_v11 = vrot.slane %v8538_v48, 1 }
 0x69c   : > { %v7446_v27 = vadd.f32 %v7414_v45, %v7375_v7  ;;  %v8539_v44 = vpop.f32.mrb[182].mxu1  ;;  %v9181_v50 = vld [vmem:[#allocation2 + $0x80] sm:$0xff] }
 0x69d   : > { %v7445_v19 = vadd.f32 %v7413_v56, %v7374_v6  ;;  %v7150_v47 = vrot.slane %v8539_v44, 1  ;;  %v6582_v39 = vpop.f32.mrb[183].mxu1  ;;  %v9182_v44 = vld [vmem:[#allocation2 + $0x88] sm:$0xff] }
 0x69e   : > { %v7478_v41 = vmax.f32 %v7446_v27, 0.0  ;;  %v7147_v46 = vrot.slane %v6582_v39, 1  ;;  %v7322_v27 = vrot.slane %v9181_v50, 4 }
 0x69f   : > { %v7477_v62 = vmax.f32 %v7445_v19, 0.0  ;;  %v7151_v60 = vsel %vm3619_vm1, %v7148_v11, %v7150_v47  ;;  %v7323_v19 = vrot.slane %v9182_v44, 4 }
 0x6a0   : > { %7510 = vst [vmem:[%s9555_s13 + $0x38] sm:$0xff] %v7478_v41  ;;  %v7248_v4 = vadd.f32 %v7151_v60, %v11254_v5  ;;  %v7149_v1 = vsel %vm3619_vm1, %v7147_v46, %v7148_v11 }
 0x6a1   : > { %7509 = vst [vmem:[%s9555_s13 + $0x30] sm:$0xff] %v7477_v62  ;;  %v7247_v29 = vadd.f32 %v7149_v1, %v11248_v21  ;;  %v7321_v21 = vsel %vm7303_vm2, %v7319_v49, %v7320_v32 }
 0x6a2   : > { %v7416_v54 = vadd.f32 %v11494_v43, %v7248_v4  ;;  %v8542_v3 = vpop.f32.mrb[184].mxu1  ;;  %v7379_v53 = vunpack.c.h.bf16 %v7321_v21  ;;  %v7378_v56 = vunpack.c.l.bf16 %v7321_v21 }
 0x6a3   : > { %v7415_v40 = vadd.f32 %v11494_v43, %v7247_v29  ;;  %v6595_v13 = vpop.f32.mrb[185].mxu1  ;;  %v7153_v17 = vrot.slane %v8542_v3, 1  ;;  %v9183_v3 = vld [vmem:[#allocation2 + $0x90] sm:$0xff] }
 0x6a4   : > { %v7448_v5 = vadd.f32 %v7416_v54, %v7377_v9  ;;  %v8543_v35 = vpop.f32.mrb[186].mxu1  ;;  %v9184_v13 = vld [vmem:[#allocation2 + $0x98] sm:$0xff] }
 0x6a5   : > { %v7447_v23 = vadd.f32 %v7415_v40, %v7376_v26  ;;  %v7155_v7 = vrot.slane %v8543_v35, 1  ;;  %v6597_v57 = vpop.f32.mrb[187].mxu1  ;;  %v7325_v40 = vrot.slane %v9183_v3, 4 }
 0x6a6   : > { %v7480_v36 = vmax.f32 %v7448_v5, 0.0  ;;  %v7152_v6 = vrot.slane %v6597_v57, 1  ;;  %v7326_v5 = vrot.slane %v9184_v13, 4 }
 0x6a7   : > { %v7479_v28 = vmax.f32 %v7447_v23, 0.0  ;;  %v7156_v24 = vsel %vm3619_vm1, %v7153_v17, %v7155_v7 }
 0x6a8   : > { %7512 = vst [vmem:[%s9555_s13 + $0x48] sm:$0xff] %v7480_v36  ;;  %v7250_v58 = vadd.f32 %v7156_v24, %v11284_v52  ;;  %v7154_v45 = vsel %vm3619_vm1, %v7152_v6, %v7153_v17 }
 0x6a9   : > { %7511 = vst [vmem:[%s9555_s13 + $0x40] sm:$0xff] %v7479_v28  ;;  %v7249_v48 = vadd.f32 %v7154_v45, %v11278_v16  ;;  %v7324_v16 = vsel %vm7303_vm2, %v7322_v27, %v7323_v19  ;;  %v9185_v19 = vld [vmem:[#allocation2 + $0xa0] sm:$0xff] }
 0x6aa   : > { %v7418_v11 = vadd.f32 %v11494_v43, %v7250_v58  ;;  %v8546_v47 = vpop.f32.mrb[188].mxu1  ;;  %v7381_v49 = vunpack.c.h.bf16 %v7324_v16  ;;  %v7380_v54 = vunpack.c.l.bf16 %v7324_v16 }
 0x6ab   : > { %v7417_v15 = vadd.f32 %v11494_v43, %v7249_v48  ;;  %v6610_v39 = vpop.f32.mrb[189].mxu1  ;;  %v7158_v62 = vrot.slane %v8546_v47, 1  ;;  %v9186_v47 = vld [vmem:[#allocation2 + $0xa8] sm:$0xff] }
 0x6ac   : > { %v7450_v52 = vadd.f32 %v7418_v11, %v7379_v53  ;;  %v8547_v41 = vpop.f32.mrb[190].mxu1  ;;  %v7328_v11 = vrot.slane %v9185_v19, 4 }
 0x6ad   : > { %v7449_v46 = vadd.f32 %v7417_v15, %v7378_v56  ;;  %v7160_v60 = vrot.slane %v8547_v41, 1  ;;  %v6612_v4 = vpop.f32.mrb[191].mxu1  ;;  %v7329_v15 = vrot.slane %v9186_v47, 4 }
 0x6ae   : > { %v7482_v9 = vmax.f32 %v7450_v52, 0.0  ;;  %v7157_v1 = vrot.slane %v6612_v4, 1 }
 0x6af   : > { %v7481_v29 = vmax.f32 %v7449_v46, 0.0  ;;  %v7161_v26 = vsel %vm3619_vm1, %v7158_v62, %v7160_v60 }
 0x6b0   : > { %7514 = vst [vmem:[%s9555_s13 + $0x58] sm:$0xff] %v7482_v9  ;;  %v7252_v51 = vadd.f32 %v7161_v26, %v11314_v14  ;;  %v7159_v8 = vsel %vm3619_vm1, %v7157_v1, %v7158_v62 }
 0x6b1   : > { %7513 = vst [vmem:[%s9555_s13 + $0x50] sm:$0xff] %v7481_v29  ;;  %v7251_v32 = vadd.f32 %v7159_v8, %v11308_v33  ;;  %v7327_v33 = vsel %vm7303_vm2, %v7325_v40, %v7326_v5  ;;  %v9187_v40 = vld [vmem:[#allocation2 + $0xb0] sm:$0xff]  ;;  %v9188_v5 = vld [vmem:[#allocation2 + $0xb8] sm:$0xff] }
 0x6b2   : > { %v7420_v35 = vadd.f32 %v11494_v43, %v7252_v51  ;;  %v8550_v23 = vpop.f32.mrb[192].mxu1  ;;  %v7383_v56 = vunpack.c.h.bf16 %v7327_v33  ;;  %v7382_v44 = vunpack.c.l.bf16 %v7327_v33  ;;  %v7331_v13 = vrot.slane %v9187_v40, 4 }
 0x6b3   : > { %v7419_v17 = vadd.f32 %v11494_v43, %v7251_v32  ;;  %v6625_v7 = vpop.f32.mrb[193].mxu1  ;;  %v7163_v36 = vrot.slane %v8550_v23, 1 }
 0x6b4   : > { %v7452_v14 = vadd.f32 %v7420_v35, %v7381_v49  ;;  %v8551_v21 = vpop.f32.mrb[194].mxu1  ;;  %v7332_v35 = vrot.slane %v9188_v5, 4 }
 0x6b5   : > { %v7451_v57 = vadd.f32 %v7419_v17, %v7380_v54  ;;  %v7165_v6 = vrot.slane %v8551_v21, 1  ;;  %v6627_v28 = vpop.f32.mrb[195].mxu1 }
 0x6b6   : > { %v7484_v24 = vmax.f32 %v7452_v14, 0.0  ;;  %v7162_v58 = vrot.slane %v6627_v28, 1 }
 0x6b7   : > { %v7483_v53 = vmax.f32 %v7451_v57, 0.0  ;;  %v7166_v45 = vsel %vm3619_vm1, %v7163_v36, %v7165_v6 }
 0x6b8   : > { %7516 = vst [vmem:[%s9555_s13 + $0x68] sm:$0xff] %v7484_v24  ;;  %v7254_v48 = vadd.f32 %v7166_v45, %v11344_v20  ;;  %v7164_v50 = vsel %vm3619_vm1, %v7162_v58, %v7163_v36 }
 0x6b9   : > { %7515 = vst [vmem:[%s9555_s13 + $0x60] sm:$0xff] %v7483_v53  ;;  %v7253_v27 = vadd.f32 %v7164_v50, %v11338_v55  ;;  %v7330_v55 = vsel %vm7303_vm2, %v7328_v11, %v7329_v15  ;;  %v9190_v11 = vld [vmem:[#allocation2 + $0xc8] sm:$0xff] }
 0x6ba   : > { %v7422_v39 = vadd.f32 %v11494_v43, %v7254_v48  ;;  %v8554_v52 = vpop.f32.mrb[196].mxu1  ;;  %v7385_v8 = vunpack.c.h.bf16 %v7330_v55  ;;  %v7384_v3 = vunpack.c.l.bf16 %v7330_v55  ;;  %v7335_v47 = vrot.slane %v9190_v11, 4 }
 0x6bb   : > { %v7421_v41 = vadd.f32 %v11494_v43, %v7253_v27  ;;  %v6640_v46 = vpop.f32.mrb[197].mxu1  ;;  %v7168_v16 = vrot.slane %v8554_v52, 1 }
 0x6bc   : > { %v7454_v20 = vadd.f32 %v7422_v39, %v7383_v56  ;;  %v8555_v62 = vpop.f32.mrb[198].mxu1 }
 0x6bd   : > { %v7453_v60 = vadd.f32 %v7421_v41, %v7382_v44  ;;  %v7170_v4 = vrot.slane %v8555_v62, 1  ;;  %v6642_v9 = vpop.f32.mrb[199].mxu1  ;;  %v9189_v44 = vld [vmem:[#allocation2 + $0xc0] sm:$0xff] }
 0x6be   : > { %v7486_v1 = vmax.f32 %v7454_v20, 0.0  ;;  %v7167_v29 = vrot.slane %v6642_v9, 1  ;;  %v7334_v19 = vrot.slane %v9189_v44, 4 }
 0x6bf   : > { %v7485_v26 = vmax.f32 %v7453_v60, 0.0  ;;  %v7171_v51 = vsel %vm3619_vm1, %v7168_v16, %v7170_v4 }
 0x6c0   : > { %7518 = vst [vmem:[%s9555_s13 + $0x78] sm:$0xff] %v7486_v1  ;;  %v7256_v49 = vadd.f32 %v7171_v51, %v11374_v22  ;;  %v7169_v32 = vsel %vm3619_vm1, %v7167_v29, %v7168_v16 }
 0x6c1   : > { %7517 = vst [vmem:[%s9555_s13 + $0x70] sm:$0xff] %v7485_v26  ;;  %v7255_v54 = vadd.f32 %v7169_v32, %v11368_v34  ;;  %v7333_v34 = vsel %vm7303_vm2, %v7331_v13, %v7332_v35  ;;  %v9191_v32 = vld [vmem:[#allocation2 + $0xd0] sm:$0xff] }
 0x6c2   : > { %v7424_v23 = vadd.f32 %v11494_v43, %v7256_v49  ;;  %v8558_v17 = vpop.f32.mrb[200].mxu1  ;;  %v7387_v48 = vunpack.c.h.bf16 %v7333_v34  ;;  %v7386_v27 = vunpack.c.l.bf16 %v7333_v34 }
 0x6c3   : > { %v7423_v7 = vadd.f32 %v11494_v43, %v7255_v54  ;;  %v6655_v14 = vpop.f32.mrb[201].mxu1  ;;  %v7173_v36 = vrot.slane %v8558_v17, 1  ;;  %v7337_v54 = vrot.slane %v9191_v32, 4 }
 0x6c4   : > { %v7456_v22 = vadd.f32 %v7424_v23, %v7385_v8  ;;  %v8559_v21 = vpop.f32.mrb[202].mxu1 }
 0x6c5   : > { %v7455_v57 = vadd.f32 %v7423_v7, %v7384_v3  ;;  %v7175_v6 = vrot.slane %v8559_v21, 1  ;;  %v6657_v33 = vpop.f32.mrb[203].mxu1  ;;  %v9192_v3 = vld [vmem:[#allocation2 + $0xd8] sm:$0xff] }
 0x6c6   : > { %v7488_v28 = vmax.f32 %v7456_v22, 0.0  ;;  %v7172_v24 = vrot.slane %v6657_v33, 1  ;;  %v7338_v40 = vrot.slane %v9192_v3, 4 }
 0x6c7   : > { %v7487_v58 = vmax.f32 %v7455_v57, 0.0  ;;  %v7176_v53 = vsel %vm3619_vm1, %v7173_v36, %v7175_v6 }
 0x6c8   : > { %7520 = vst [vmem:[%s9555_s13 + $0x88] sm:$0xff] %v7488_v28  ;;  %v7258_v45 = vadd.f32 %v7176_v53, %v11404_v12  ;;  %v7174_v56 = vsel %vm3619_vm1, %v7172_v24, %v7173_v36 }
 0x6c9   : > { %7519 = vst [vmem:[%s9555_s13 + $0x80] sm:$0xff] %v7487_v58  ;;  %v7257_v50 = vadd.f32 %v7174_v56, %v11398_v37  ;;  %v7336_v37 = vsel %vm7303_vm2, %v7334_v19, %v7335_v47  ;;  %v9194_v56 = vld [vmem:[#allocation2 + $0xe8] sm:$0xff] }
 0x6ca   : > { %v7426_v15 = vadd.f32 %v11494_v43, %v7258_v45  ;;  %v8562_v39 = vpop.f32.mrb[204].mxu1  ;;  %v7389_v26 = vunpack.c.h.bf16 %v7336_v37  ;;  %v7388_v8 = vunpack.c.l.bf16 %v7336_v37  ;;  %v9193_v45 = vld [vmem:[#allocation2 + $0xe0] sm:$0xff] }
 0x6cb   : > { %v7425_v52 = vadd.f32 %v11494_v43, %v7257_v50  ;;  %v6670_v41 = vpop.f32.mrb[205].mxu1  ;;  %v7178_v62 = vrot.slane %v8562_v39, 1  ;;  %v7341_v50 = vrot.slane %v9194_v56, 4 }
 0x6cc   : > { %v7458_v12 = vadd.f32 %v7426_v15, %v7387_v48  ;;  %v8563_v46 = vpop.f32.mrb[206].mxu1  ;;  %v7340_v48 = vrot.slane %v9193_v45, 4 }
 0x6cd   : > { %v7457_v20 = vadd.f32 %v7425_v52, %v7386_v27  ;;  %v7180_v60 = vrot.slane %v8563_v46, 1  ;;  %v6672_v16 = vpop.f32.mrb[207].mxu1 }
 0x6ce   : > { %v7490_v4 = vmax.f32 %v7458_v12, 0.0  ;;  %v7177_v55 = vrot.slane %v6672_v16, 1 }
 0x6cf   : > { %v7489_v9 = vmax.f32 %v7457_v20, 0.0  ;;  %v7181_v1 = vsel %vm3619_vm1, %v7178_v62, %v7180_v60 }
 0x6d0   : > { %7522 = vst [vmem:[%s9555_s13 + $0x98] sm:$0xff] %v7490_v4  ;;  %v7260_v29 = vadd.f32 %v7181_v1, %v11432_v25  ;;  %v7179_v51 = vsel %vm3619_vm1, %v7177_v55, %v7178_v62 }
 0x6d1   : > { %7521 = vst [vmem:[%s9555_s13 + $0x90] sm:$0xff] %v7489_v9  ;;  %v7259_v49 = vadd.f32 %v7179_v51, %v11427_v0  ;;  %v7339_v0 = vsel %vm7303_vm2, %v7337_v54, %v7338_v40  ;;  %v9195_v9 = vld [vmem:[#allocation2 + $0xf0] sm:$0xff] }
 0x6d2   : > { %v7428_v13 = vadd.f32 %v11494_v43, %v7260_v29  ;;  %v8566_v5 = vpop.f32.mrb[208].mxu1  ;;  %v7391_v28 = vunpack.c.h.bf16 %v7339_v0  ;;  %v7390_v53 = vunpack.c.l.bf16 %v7339_v0  ;;  %v7343_v1 = vrot.slane %v9195_v9, 4  ;;  %v9196_v29 = vld [vmem:[#allocation2 + $0xf8] sm:$0xff] }
 0x6d3   : > { %v7427_v35 = vadd.f32 %v11494_v43, %v7259_v49  ;;  %v6685_v23 = vpop.f32.mrb[209].mxu1  ;;  %v7183_v14 = vrot.slane %v8566_v5, 1 }
 0x6d4   : > { %v7460_v25 = vadd.f32 %v7428_v13, %v7389_v26  ;;  %v8567_v17 = vpop.f32.mrb[210].mxu1  ;;  %v7344_v26 = vrot.slane %v9196_v29, 4 }
 0x6d5   : > { %v7459_v7 = vadd.f32 %v7427_v35, %v7388_v8  ;;  %v7185_v22 = vrot.slane %v8567_v17, 1  ;;  %v6687_v21 = vpop.f32.mrb[211].mxu1 }
 0x6d6   : > { %v7492_v57 = vmax.f32 %v7460_v25, 0.0  ;;  %v7182_v36 = vrot.slane %v6687_v21, 1 }
 0x6d7   : > { %v7491_v6 = vmax.f32 %v7459_v7, 0.0  ;;  %v7186_v34 = vsel %vm3619_vm1, %v7183_v14, %v7185_v22 }
 0x6d8   : > { %7524 = vst [vmem:[%s9555_s13 + $0xa8] sm:$0xff] %v7492_v57  ;;  %v7262_v33 = vadd.f32 %v7186_v34, %v11443_v18  ;;  %v7184_v24 = vsel %vm3619_vm1, %v7182_v36, %v7183_v14  ;;  %v9197_v57 = vld [vmem:[#allocation2 + $0x100] sm:$0xff] }
 0x6d9   : > { %7523 = vst [vmem:[%s9555_s13 + $0xa0] sm:$0xff] %v7491_v6  ;;  %v7261_v58 = vadd.f32 %v7184_v24, %v11438_v61  ;;  %v7342_v61 = vsel %vm7303_vm2, %v7340_v48, %v7341_v50  ;;  %v7346_v36 = vrot.slane %v9197_v57, 4  ;;  %v9198_v6 = vld [vmem:[#allocation2 + $0x108] sm:$0xff] }
 0x6da   : > { %v7430_v27 = vadd.f32 %v11494_v43, %v7262_v33  ;;  %v8570_v44 = vpop.f32.mrb[212].mxu1  ;;  %v7393_v37 = vunpack.c.h.bf16 %v7342_v61  ;;  %v7392_v55 = vunpack.c.l.bf16 %v7342_v61  ;;  %v7347_v34 = vrot.slane %v9198_v6, 4  ;;  %v9199_v61 = vld [vmem:[#allocation2 + $0x110] sm:$0xff] }
 0x6db   : > { %v7429_v19 = vadd.f32 %v11494_v43, %v7261_v58  ;;  %v6700_v11 = vpop.f32.mrb[213].mxu1  ;;  %v7188_v39 = vrot.slane %v8570_v44, 1 }
 0x6dc   : > { %v7462_v18 = vadd.f32 %v7430_v27, %v7391_v28  ;;  %v8571_v47 = vpop.f32.mrb[214].mxu1 }
 0x6dd   : > { %v7461_v15 = vadd.f32 %v7429_v19, %v7390_v53  ;;  %v7190_v52 = vrot.slane %v8571_v47, 1  ;;  %v6702_v41 = vpop.f32.mrb[215].mxu1 }
 0x6de   : > { %v7494_v12 = vmax.f32 %v7462_v18, 0.0  ;;  %v7187_v46 = vrot.slane %v6702_v41, 1  ;;  %v7349_v41 = vrot.slane %v9199_v61, 4 }
 0x6df   : > { %v7493_v20 = vmax.f32 %v7461_v15, 0.0  ;;  %v7191_v62 = vsel %vm3619_vm1, %v7188_v39, %v7190_v52 }
 0x6e0   : > { %7526 = vst [vmem:[%s9555_s13 + $0xb8] sm:$0xff] %v7494_v12  ;;  %v7264_v60 = vadd.f32 %v7191_v62, %v11454_v2  ;;  %v7189_v16 = vsel %vm3619_vm1, %v7187_v46, %v7188_v39  ;;  %v9200_v12 = vld [vmem:[#allocation2 + $0x118] sm:$0xff] }
 0x6e1   : > { %7525 = vst [vmem:[%s9555_s13 + $0xb0] sm:$0xff] %v7493_v20  ;;  %v7263_v4 = vadd.f32 %v7189_v16, %v11449_v42  ;;  %v7345_v42 = vsel %vm7303_vm2, %v7343_v1, %v7344_v26  ;;  %v7350_v46 = vrot.slane %v9200_v12, 4 }
 0x6e2   : > { %v7432_v51 = vadd.f32 %v11494_v43, %v7264_v60  ;;  %v8574_v49 = vpop.f32.mrb[216].mxu1  ;;  %v7395_v14 = vunpack.c.h.bf16 %v7345_v42  ;;  %v7394_v21 = vunpack.c.l.bf16 %v7345_v42 }
 0x6e3   : > { %v7431_v8 = vadd.f32 %v11494_v43, %v7263_v4  ;;  %v6715_v32 = vpop.f32.mrb[217].mxu1  ;;  %v7193_v40 = vrot.slane %v8574_v49, 1 }
 0x6e4   : > { %v7464_v2 = vadd.f32 %v7432_v51, %v7393_v37  ;;  %v8575_v54 = vpop.f32.mrb[218].mxu1 }
 0x6e5   : > { %v7463_v3 = vadd.f32 %v7431_v8, %v7392_v55  ;;  %v7195_v13 = vrot.slane %v8575_v54, 1  ;;  %v6717_v5 = vpop.f32.mrb[219].mxu1 }
 0x6e6   : > { %v7496_v35 = vmax.f32 %v7464_v2, 0.0  ;;  %v7192_v23 = vrot.slane %v6717_v5, 1 }
 0x6e7   : > { %v7495_v25 = vmax.f32 %v7463_v3, 0.0  ;;  %v7196_v17 = vsel %vm3619_vm1, %v7193_v40, %v7195_v13 }
 0x6e8   : > { %7528 = vst [vmem:[%s9555_s13 + $0xc8] sm:$0xff] %v7496_v35  ;;  %v7266_v7 = vadd.f32 %v7196_v17, %v11465_v31  ;;  %v7194_v22 = vsel %vm3619_vm1, %v7192_v23, %v7193_v40 }
 0x6e9   : > { %7527 = vst [vmem:[%s9555_s13 + $0xc0] sm:$0xff] %v7495_v25  ;;  %v7265_v0 = vadd.f32 %v7194_v22, %v11460_v63  ;;  %v7348_v63 = vsel %vm7303_vm2, %v7346_v36, %v7347_v34 }
 0x6ea   : > { %v7434_v33 = vadd.f32 %v11494_v43, %v7266_v7  ;;  %v8578_v28 = vpop.f32.mrb[220].mxu1  ;;  %v7397_v47 = vunpack.c.h.bf16 %v7348_v63  ;;  %v7396_v52 = vunpack.c.l.bf16 %v7348_v63 }
 0x6eb   : > { %v7433_v24 = vadd.f32 %v11494_v43, %v7265_v0  ;;  %v6730_v58 = vpop.f32.mrb[221].mxu1  ;;  %v7198_v48 = vrot.slane %v8578_v28, 1 }
 0x6ec   : > { %v7466_v31 = vadd.f32 %v7434_v33, %v7395_v14  ;;  %v8579_v53 = vpop.f32.mrb[222].mxu1 }
 0x6ed   : > { %v7465_v45 = vadd.f32 %v7433_v24, %v7394_v21  ;;  %v7200_v56 = vrot.slane %v8579_v53, 1  ;;  %v6732_v50 = vpop.f32.mrb[223].mxu1 }
 0x6ee   : > { %v7498_v27 = vmax.f32 %v7466_v31, 0.0  ;;  %v7197_v44 = vrot.slane %v6732_v50, 1 }
 0x6ef   : > { %v7497_v19 = vmax.f32 %v7465_v45, 0.0  ;;  %v7201_v11 = vsel %vm3619_vm1, %v7198_v48, %v7200_v56 }
 0x6f0   : > { %7530 = vst [vmem:[%s9555_s13 + $0xd8] sm:$0xff] %v7498_v27  ;;  %v7268_v18 = vadd.f32 %v7201_v11, %v11476_v30  ;;  %v7199_v15 = vsel %vm3619_vm1, %v7197_v44, %v7198_v48 }
 0x6f1   : > { %7529 = vst [vmem:[%s9555_s13 + $0xd0] sm:$0xff] %v7497_v19  ;;  %v7267_v39 = vadd.f32 %v7199_v15, %v11471_v10  ;;  %v7351_v10 = vsel %vm7303_vm2, %v7349_v41, %v7350_v46 }
 0x6f2   : > { %v7436_v20 = vadd.f32 %v11494_v43, %v7268_v18  ;;  %v8582_v62 = vpop.f32.mrb[224].mxu1  ;;  %v7399_v32 = vunpack.c.h.bf16 %v7351_v10  ;;  %v7398_v3 = vunpack.c.l.bf16 %v7351_v10 }
 0x6f3   : > { %v7435_v60 = vadd.f32 %v11494_v43, %v7267_v39  ;;  %v6745_v37 = vpop.f32.mrb[225].mxu1  ;;  %v7203_v55 = vrot.slane %v8582_v62, 1 }
 0x6f4   : > { %v7468_v30 = vadd.f32 %v7436_v20, %v7397_v47  ;;  %v8583_v16 = vpop.f32.mrb[226].mxu1 }
 0x6f5   : > { %v7467_v4 = vadd.f32 %v7435_v60, %v7396_v52  ;;  %v7205_v9 = vrot.slane %v8583_v16, 1  ;;  %v6747_v1 = vpop.f32.mrb[227].mxu1 }
 0x6f6   : > { %v7500_v29 = vmax.f32 %v7468_v30, 0.0  ;;  %v7202_v26 = vrot.slane %v6747_v1, 1 }
 0x6f7   : > { %v7499_v51 = vmax.f32 %v7467_v4, 0.0  ;;  %v7206_v49 = vsel %vm3619_vm1, %v7203_v55, %v7205_v9 }
 0x6f8   : > { %7532 = vst [vmem:[%s9555_s13 + $0xe8] sm:$0xff] %v7500_v29  ;;  %v7270_v8 = vadd.f32 %v7206_v49, %v11487_v38  ;;  %v7204_v2 = vsel %vm3619_vm1, %v7202_v26, %v7203_v55 }
 0x6f9   : > { %7531 = vst [vmem:[%s9555_s13 + $0xe0] sm:$0xff] %v7499_v51  ;;  %v7269_v54 = vadd.f32 %v7204_v2, %v11482_v59 }
 0x6fa   : > { %v7438_v40 = vadd.f32 %v11494_v43, %v7270_v8 }
 0x6fb   : > { %v7437_v13 = vadd.f32 %v11494_v43, %v7269_v54 }
 0x6fc   : > { %v7470_v42 = vadd.f32 %v7438_v40, %v7399_v32 }
 0x6fd   : > { %v7469_v5 = vadd.f32 %v7437_v13, %v7398_v3 }
 0x6fe   : > { %v7502_v38 = vmax.f32 %v7470_v42, 0.0 }
 0x6ff   : > { %v7501_v59 = vmax.f32 %v7469_v5, 0.0 }
 0x700   : > { %7534 = vst [vmem:[%s9555_s13 + $0xf8] sm:$0xff] %v7502_v38 }
 0x701   : > { %7533 = vst [vmem:[%s9555_s13 + $0xf0] sm:$0xff] %v7501_v59 }
 0x702   : > { %9294 = shalt.err (!%p9291_p2)
}
 0x703   : > { %s9295_s11 = scalar_lea.hbm %s11641_s29, 4096  ;;  %s9299_s12 = scalar_lea.hbm %s11700_s5, 8192 }
 0x704   : > { %p9296_p3 = scmp.ne.s32.totalorder %s11641_s29, %s9295_s11  ;;  %p9300_p7 = scmp.lt.u32.totalorder %s11641_s29, %s11700_s5 }
 0x705   : > { %p9301_p9 = scmp.lt.u32.totalorder %s9299_s12, %s9295_s11  ;;  %p9303_p0 = scmp.lt.u32.totalorder %s9295_s11, %s11641_s29 }
 0x706   : > { %p9297_p5 = pnand %p9296_p3, %p11992_p4 }
 0x707   : > { %p9302_p12 = por %p9301_p9, %p9300_p7 }
 0x708   : > { %p9298_p6 = pneg %p9297_p5 }
 0x709   : > { %p9304_p13 = por %p9303_p0, %p9302_p12 }
 0x70b   : > { %p9305_p1 = pnand %p9304_p13, %p9298_p6 }
 0x70d   : > { %9308 = shalt.err (!%p9305_p1)
}
 0x70e   : > { %s9380_s17 = smov 128   ;;  %s9381_s24 = smov 8  }
 0x70f   : > { %8864 = dma.vmem_to_hbm [thread:$0]  (%p11992_p4), %s11643_s25, 4096, %s11641_s29, %s11649_s10, %s9380_s17, %s9380_s17, %s9381_s24  }
 0x710 PF: > { %p8881_p8 = scmp.ge.s32.totalorder %s9369_s23, 2  ;;  %s7567_s27 = sand.u32 1, %s9349_s18  }
 0x711   : > { %p11993_p10 = scmp.ne.s32.totalorder %s11726_s30, 0  ;;  %s7568_s8 = scalar_lea.sflag [#allocation6], %s7567_s27 }
 0x713   : > { %p8874_p11 = pnand %p8881_p8, %p11993_p10 }
 0x715   : > { %9344 = dma.done.wait (!%p8874_p11), %s7568_s8, 4096  }
 0x716   : > { %9346 = vsyncadd (!%p8874_p11), %s7568_s8, 4294963200  ;;  %s20_s23 = sadd.s32 1, %s9369_s23   ;;  %s11994_s28 = sld [smem:[#allocation20_spill]] }
 0x717   : > { %p17_p2 = scmp.ge.s32.totalorder %s20_s23, 4   ;;  %s11995_s18 = smov %s9353_s19 }
 0x718   : > { %s11996_s19 = smov %s9357_s20  ;;  %s11997_s20 = smov %s9465_s6 }
 0x719   : > { %s11998_s21 = smov %s9365_s22  ;;  %19 = sbr.rel (!%p17_p2) target bundleno = 6 (0x6), region = 100 }
 0x71c   : > { %s11999_s22 = smov %s11994_s28 }
 0x720   :  { %7573 = vsyncpa [#allocation5], 1 }
 0x721   :  { %7575 = vsyncpa [#allocation5 + $0x1], 1 }
 0x722   :  { %7576 = vsyncpa [#allocation8], 1 }
 0x723   :  { %7577 = vsyncpa [#allocation6], 1 }
 0x724   :  { %7579 = vsyncpa [#allocation6 + $0x1], 1 }
 0x725   :  { %7580 = vsyncmov [#allocation3] }
 0x728   :  { %s7581_s30 = vpop.sfrf %7580 }
 0x729   :  { %p7824_p4 = scmp.ne.s32.totalorder %s7581_s30, 0 }
 0x72b   :  { %7585 = shalt.err (%p7824_p4)  }
 0x72c   :  { %7587 = vsyncmov [#allocation3 + $0x1] }
 0x72f   :  { %s7588_s25 = vpop.sfrf %7587 }
 0x730   :  { %p7825_p3 = scmp.ne.s32.totalorder %s7588_s25, 0 }
 0x732   :  { %7592 = shalt.err (%p7825_p3)  }

</bundles_post_ra>
